<compile_context>
chip_gen: v5e
topology: v5e:2x2
jax: 0.10.0
libtpu: 0.0.40
codegen_flags: <defaults>
</compile_context>

<pallas_src>
import functools

import jax
import jax.numpy as jnp
import numpy as np
from jax import lax
from jax.experimental import pallas as pl
from jax.experimental.pallas import tpu as pltpu


# ----------------------------------------------------------------------------
# Fused Pallas kernel:
#   pw1 + BN + ReLU6  ->  3x3 depthwise + BN + ReLU6  ->  pw2 + BN (+ residual)
# ----------------------------------------------------------------------------
def _fused_block_kernel(*refs, stride, th, th_in, height, width, wp, wo, hid,
                        oup, has_expand, use_res, bot_pad):
    if has_expand:
        x_ref, w1_ref, b1_ref, wdw_ref, b2_ref, w2_ref, b3_ref, o_ref = refs
    else:
        x_ref, wdw_ref, b2_ref, w2_ref, b3_ref, o_ref = refs

    r = pl.program_id(1)
    # First (unpadded) input row of this tile's halo window; window row j maps
    # to input row (a + j).  a == -1 for the first tile.
    a = r * (th * stride) - 1

    # ---- gather the th_in halo rows from the VMEM-resident input image ------
    # Edge rows are read clamped and zeroed AFTER pw1 (zero padding applies to
    # the pw1 output, not to x).
    bulk_cnt = th_in - 1 - bot_pad
    bulk_start = pl.multiple_of(r * (th * stride), th * stride)
    pieces = [
        x_ref[pl.ds(jnp.maximum(a, 0), 1)],        # window row j = 0
        x_ref[pl.ds(bulk_start, bulk_cnt)],        # rows j = 1 .. th_in-1-bot_pad
    ]
    if bot_pad:
        pieces.append(x_ref[pl.ds(jnp.minimum(a + th_in - 1, height - 1), 1)])
    xwin = jnp.concatenate(pieces, axis=0)                      # (th_in, W, Cin)

    # ---- pw1: 1x1 conv (BN folded) on the MXU in bf16, f32 accumulate -------
    if has_expand:
        x2d = xwin.reshape(th_in * width, xwin.shape[-1]).astype(jnp.bfloat16)
        h2d = jnp.dot(x2d, w1_ref[...], preferred_element_type=jnp.float32)
        h2d = jnp.clip(h2d + b1_ref[...], 0.0, 6.0)
        hwin = h2d.reshape(th_in, width, hid)
    else:
        hwin = xwin.astype(jnp.float32)

    # ---- vertical zero padding of the depthwise input (single fused mask) ---
    row_in = a + lax.broadcasted_iota(jnp.int32, (th_in, 1, 1), 0)
    hwin = jnp.where((row_in >= 0) & (row_in < height), hwin, 0.0)

    # ---- horizontal zero padding (sublane-aligned width, all in VMEM) -------
    zl = jnp.zeros((th_in, 1, hid), jnp.float32)
    zr = jnp.zeros((th_in, wp - 1 - width, hid), jnp.float32)
    hp = jnp.concatenate([zl, hwin, zr], axis=1)                # (th_in, wp, hid)

    # ---- 3x3 depthwise conv (BN scale folded into wdw) + ReLU6 --------------
    wv = wdw_ref[...]                                           # (3, 3, hid)
    acc = jnp.zeros((th, wo, hid), jnp.float32)
    for dy in range(3):
        rows = hp[dy:dy + (th - 1) * stride + 1:stride]         # (th, wp, hid)
        for dx in range(3):
            patch = rows[:, dx:dx + (wo - 1) * stride + 1:stride, :]
            acc = acc + patch * wv[dy, dx, :]
    ydw = jnp.clip(acc + b2_ref[...], 0.0, 6.0)                 # (th, wo, hid)

    # ---- pw2: 1x1 projection (BN folded), bf16 MXU + optional residual ------
    y2d = jnp.dot(ydw.reshape(th * wo, hid).astype(jnp.bfloat16), w2_ref[...],
                  preferred_element_type=jnp.float32) + b3_ref[...]
    if use_res:
        res_start = pl.multiple_of(r * th, th)
        res = x_ref[pl.ds(res_start, th)].reshape(th * wo, oup)
        y2d = y2d + res.astype(jnp.float32)

    o_ref[...] = y2d.reshape(th, wo, oup).astype(o_ref.dtype)


# ----------------------------------------------------------------------------
# Wrapper (NHWC core)
# ----------------------------------------------------------------------------
def _vmem_budget_bytes():
    """Per-chip scoped-VMEM budget (v7x has half the VMEM of v5e/v6e)."""
    cap = 64 * 1024 * 1024
    try:
        cap = int(getattr(pltpu.get_tpu_info(), "vmem_capacity_bytes", cap))
    except Exception:
        pass
    return max(32 * 1024 * 1024, min(cap // 2, 96 * 1024 * 1024))


def _pick_row_tile(ho, max_th):
    t = max(1, min(max_th, ho))
    while ho % t:
        t -= 1
    return t


def inverted_residual_nhwc(x, params, *, stride, expand_ratio):
    assert stride in (1, 2)
    n, h, w, inp = x.shape
    has_expand = expand_ratio != 1
    hid = params["dw_w"].shape[-1]
    oup = params["pw2_w"].shape[1]
    if not has_expand:
        assert hid == inp
    use_res = (stride == 1) and (inp == oup)

    ho = (h - 1) // stride + 1
    wo = (w - 1) // stride + 1
    wp = ((w + 2 + 7) // 8) * 8                 # padded width, sublane aligned

    # ---- VMEM-budgeted row-tile selection ------------------------------------
    itm = x.dtype.itemsize
    w1_bytes = (inp * hid * 2 + hid * 4) if has_expand else 0
    wt_bytes = w1_bytes + 9 * hid * 4 + hid * 4 + hid * oup * 2 + oup * 4
    fixed = 2 * h * w * inp * itm + 2 * wt_bytes     # resident image + weights

    def tile_bytes(th):
        th_in = (th - 1) * stride + 3
        b = 4 * th_in * wp * hid * 2                 # expanded window (f32) x2
        b += 4 * th * wo * (2 * hid + oup)           # acc/ydw + y2d (f32)
        b += 6 * th_in * w * max(inp, hid)           # xwin + bf16 copy (upper bound)
        b += 2 * th * wo * hid                       # bf16 copy feeding pw2
        b += 2 * th * wo * oup * itm                 # double-buffered output tile
        return b

    budget = _vmem_budget_bytes()
    th = _pick_row_tile(ho, min(ho, 32))             # full height when it fits
    while th > 1 and fixed + tile_bytes(th) > budget:
        th = _pick_row_tile(ho, th - 1)
    nr = ho // th
    th_in = (th - 1) * stride + 3                    # halo'd input rows per tile
    bot_pad = max(0, (ho - 1) * stride + 2 - h)      # 0 or 1 bottom padding rows

    # ---- fold BN scale into conv weights; only biases stay separate ----------
    f32, bf16 = jnp.float32, jnp.bfloat16
    wdw = (params["dw_w"] * params["bn2_scale"]).astype(f32)
    b2 = params["bn2_bias"].reshape(1, hid).astype(f32)
    w2 = (params["pw2_w"] * params["bn3_scale"][None, :]).astype(bf16)
    b3 = params["bn3_bias"].reshape(1, oup).astype(f32)

    args = [x]
    in_specs = [pl.BlockSpec((None, h, w, inp), lambda i, r: (i, 0, 0, 0))]
    if has_expand:
        w1 = (params["pw1_w"] * params["bn1_scale"][None, :]).astype(bf16)
        b1 = params["bn1_bias"].reshape(1, hid).astype(f32)
        args += [w1, b1]
        in_specs += [pl.BlockSpec((inp, hid), lambda i, r: (0, 0)),
                     pl.BlockSpec((1, hid), lambda i, r: (0, 0))]
    args += [wdw, b2, w2, b3]
    in_specs += [pl.BlockSpec((3, 3, hid), lambda i, r: (0, 0, 0)),
                 pl.BlockSpec((1, hid), lambda i, r: (0, 0)),
                 pl.BlockSpec((hid, oup), lambda i, r: (0, 0)),
                 pl.BlockSpec((1, oup), lambda i, r: (0, 0))]

    kernel = functools.partial(
        _fused_block_kernel, stride=stride, th=th, th_in=th_in, height=h,
        width=w, wp=wp, wo=wo, hid=hid, oup=oup, has_expand=has_expand,
        use_res=use_res, bot_pad=bot_pad)

    return pl.pallas_call(
        kernel,
        out_shape=jax.ShapeDtypeStruct((n, ho, wo, oup), x.dtype),
        grid=(n, nr),
        in_specs=in_specs,
        out_specs=pl.BlockSpec((None, th, wo, oup), lambda i, r: (i, r, 0, 0)),
        compiler_params=pltpu.CompilerParams(
            # batch parallel (v7x megacore shards on batch -> one resident
            # image per core); row axis arbitrary (sequential per image).
            dimension_semantics=("parallel", "arbitrary"),
            vmem_limit_bytes=int(budget)),
    )(*args)


def inverted_residual(x_nchw, params, *, stride, expand_ratio):
    """NCHW adapter for parity with the PyTorch module.

    In a full NHWC network `inverted_residual_nhwc` is called directly and
    these two transposes disappear.
    """
    x = jnp.transpose(x_nchw, (0, 2, 3, 1))
    out = inverted_residual_nhwc(x, params, stride=stride, expand_ratio=expand_ratio)
    return jnp.transpose(out, (0, 3, 1, 2))


# ----------------------------------------------------------------------------
# Pure-JAX reference (lax.conv, f32) for correctness check
# ----------------------------------------------------------------------------
def inverted_residual_ref(x_nchw, params, *, stride, expand_ratio):
    dn = ("NHWC", "HWIO", "NHWC")
    x = jnp.transpose(x_nchw, (0, 2, 3, 1))
    h = x
    if expand_ratio != 1:
        w1 = params["pw1_w"][None, None]  # (1,1,Cin,Hid)
        h = lax.conv_general_dilated(h, w1, (1, 1), "VALID", dimension_numbers=dn)
        h = jnp.clip(h * params["bn1_scale"] + params["bn1_bias"], 0.0, 6.0)
    c = h.shape[-1]
    wd = params["dw_w"][:, :, None, :]  # (3,3,1,C)
    h = lax.conv_general_dilated(
        h, wd, (stride, stride), ((1, 1), (1, 1)),
        dimension_numbers=dn, feature_group_count=c,
    )
    h = jnp.clip(h * params["bn2_scale"] + params["bn2_bias"], 0.0, 6.0)
    w2 = params["pw2_w"][None, None]
    h = lax.conv_general_dilated(h, w2, (1, 1), "VALID", dimension_numbers=dn)
    h = h * params["bn3_scale"] + params["bn3_bias"]
    out = jnp.transpose(h, (0, 3, 1, 2))
    if stride == 1 and x_nchw.shape[1] == out.shape[1]:
        out = out + x_nchw
    return out


# ----------------------------------------------------------------------------
# Deterministic parameter init (shapes per nn.Module.__init__)
# ----------------------------------------------------------------------------
def init_params(key, inp, oup, expand_ratio):
    hid = int(inp * expand_ratio)
    ks = jax.random.split(key, 16)
    eps = 1e-5  # BatchNorm2d default

    def bn_fold(kg, kb, km, kv, c):
        gamma = jax.random.uniform(kg, (c,), jnp.float32, 0.5, 1.5)
        beta = jax.random.normal(kb, (c,), jnp.float32) * 0.1
        mean = jax.random.normal(km, (c,), jnp.float32) * 0.1
        var = jax.random.uniform(kv, (c,), jnp.float32, 0.5, 1.5)
        scale = gamma / jnp.sqrt(var + eps)
        return scale, beta - mean * scale

    p = {}
    if expand_ratio != 1:
        p["pw1_w"] = jax.random.normal(ks[0], (inp, hid), jnp.float32) * 0.1
        p["bn1_scale"], p["bn1_bias"] = bn_fold(ks[1], ks[2], ks[3], ks[4], hid)
    p["dw_w"] = jax.random.normal(ks[5], (3, 3, hid), jnp.float32) * 0.1
    p["bn2_scale"], p["bn2_bias"] = bn_fold(ks[6], ks[7], ks[8], ks[9], hid)
    p["pw2_w"] = jax.random.normal(ks[10], (hid, oup), jnp.float32) * 0.1
    p["bn3_scale"], p["bn3_bias"] = bn_fold(ks[11], ks[12], ks[13], ks[14], oup)
    return p


if __name__ == "__main__":
    key = jax.random.PRNGKey(0)
    kx, kp1, kp2 = jax.random.split(key, 3)

    N, INP, H, W = 2, 4, 16, 16
    x = jax.random.normal(kx, (N, INP, H, W), jnp.float32)

    # Tolerances loosened vs. the f32 lax.conv reference because the two 1x1
    # convs now run on the MXU in bf16 (f32 accumulate).
    # Case 1: stride=1, expand_ratio=2, inp == oup -> residual connection path.
    p1 = init_params(kp1, INP, INP, 2)
    out1 = jax.block_until_ready(inverted_residual(x, p1, stride=1, expand_ratio=2))
    ref1 = inverted_residual_ref(x, p1, stride=1, expand_ratio=2)
    np.testing.assert_allclose(np.asarray(out1), np.asarray(ref1), rtol=2e-2, atol=2e-2)

    # Case 2: stride=2, expand_ratio=1 -> depthwise-first path, strided taps.
    p2 = init_params(kp2, INP, 8, 1)
    out2 = jax.block_until_ready(inverted_residual(x, p2, stride=2, expand_ratio=1))
    ref2 = inverted_residual_ref(x, p2, stride=2, expand_ratio=1)
    np.testing.assert_allclose(np.asarray(out2), np.asarray(ref2), rtol=2e-2, atol=2e-2)

    print("KERNEL_OK")
</pallas_src>

<mosaic_0001>
module attributes {stable_mosaic.version = 11 : i64} {
  func.func @_fused_block_kernel(%arg0: i32, %arg1: i32, %arg2: memref<1x16x16x4xf32, #tpu.memory_space<vmem>>, %arg3: memref<4x8xbf16, #tpu.memory_space<vmem>>, %arg4: memref<1x8xf32, #tpu.memory_space<vmem>>, %arg5: memref<3x3x8xf32, #tpu.memory_space<vmem>>, %arg6: memref<1x8xf32, #tpu.memory_space<vmem>>, %arg7: memref<8x4xbf16, #tpu.memory_space<vmem>>, %arg8: memref<1x4xf32, #tpu.memory_space<vmem>>, %arg9: memref<1x16x16x4xf32, #tpu.memory_space<vmem>>) attributes {dimension_semantics = [#tpu.dimension_semantics<parallel>, #tpu.dimension_semantics<arbitrary>], iteration_bounds = array<i64: 2, 1>, scalar_prefetch = 0 : i64, scratch_operands = 0 : i64, tpu.core_type = #tpu.core_type<tc>, window_params = [{transform_indices = @transform_0, window_bounds = array<i64: 1, 16, 16, 4>}, {pipeline_mode = #tpu.pipeline_mode<synchronous>, transform_indices = @transform_1, window_bounds = array<i64: 4, 8>}, {pipeline_mode = #tpu.pipeline_mode<synchronous>, transform_indices = @transform_2, window_bounds = array<i64: 1, 8>}, {pipeline_mode = #tpu.pipeline_mode<synchronous>, transform_indices = @transform_3, window_bounds = array<i64: 3, 3, 8>}, {pipeline_mode = #tpu.pipeline_mode<synchronous>, transform_indices = @transform_4, window_bounds = array<i64: 1, 8>}, {pipeline_mode = #tpu.pipeline_mode<synchronous>, transform_indices = @transform_5, window_bounds = array<i64: 8, 4>}, {pipeline_mode = #tpu.pipeline_mode<synchronous>, transform_indices = @transform_6, window_bounds = array<i64: 1, 4>}, {transform_indices = @transform_7, window_bounds = array<i64: 1, 16, 16, 4>}]} {
    %c16_i32 = arith.constant 16 : i32
    %0 = arith.muli %arg1, %c16_i32 : i32
    %c1_i32 = arith.constant 1 : i32
    %1 = arith.subi %0, %c1_i32 : i32
    %c16_i32_0 = arith.constant 16 : i32
    %2 = arith.muli %arg1, %c16_i32_0 : i32
    %3 = tpu.assume_multiple %2, 16 : i32
    %c0_i32 = arith.constant 0 : i32
    %4 = arith.maxsi %1, %c0_i32 : i32
    %c0 = arith.constant 0 : index
    %5 = arith.index_cast %4 : i32 to index
    %c0_1 = arith.constant 0 : index
    %c0_2 = arith.constant 0 : index
    %6 = vector.load %arg2[%c0, %5, %c0_1, %c0_2] : memref<1x16x16x4xf32, #tpu.memory_space<vmem>>, vector<1x1x16x4xf32>
    %7 = vector.shape_cast %6 : vector<1x1x16x4xf32> to vector<1x16x4xf32>
    %c0_3 = arith.constant 0 : index
    %8 = arith.index_cast %3 : i32 to index
    %c0_4 = arith.constant 0 : index
    %c0_5 = arith.constant 0 : index
    %9 = vector.load %arg2[%c0_3, %8, %c0_4, %c0_5] : memref<1x16x16x4xf32, #tpu.memory_space<vmem>>, vector<1x16x16x4xf32>
    %10 = vector.shape_cast %9 : vector<1x16x16x4xf32> to vector<16x16x4xf32>
    %c18_i32 = arith.constant 18 : i32
    %11 = arith.addi %1, %c18_i32 : i32
    %c1_i32_6 = arith.constant 1 : i32
    %12 = arith.subi %11, %c1_i32_6 : i32
    %c15_i32 = arith.constant 15 : i32
    %13 = arith.minsi %12, %c15_i32 : i32
    %c0_7 = arith.constant 0 : index
    %14 = arith.index_cast %13 : i32 to index
    %c0_8 = arith.constant 0 : index
    %c0_9 = arith.constant 0 : index
    %15 = vector.load %arg2[%c0_7, %14, %c0_8, %c0_9] : memref<1x16x16x4xf32, #tpu.memory_space<vmem>>, vector<1x1x16x4xf32>
    %16 = vector.shape_cast %15 : vector<1x1x16x4xf32> to vector<1x16x4xf32>
    %17 = tpu.concatenate %7, %10, %16 in 0 : vector<1x16x4xf32>, vector<16x16x4xf32>, vector<1x16x4xf32> -> vector<18x16x4xf32>
    %18 = vector.shape_cast %17 : vector<18x16x4xf32> to vector<288x4xf32>
    %19 = arith.truncf %18 : vector<288x4xf32> to vector<288x4xbf16>
    %c0_10 = arith.constant 0 : index
    %c0_11 = arith.constant 0 : index
    %20 = vector.load %arg3[%c0_10, %c0_11] : memref<4x8xbf16, #tpu.memory_space<vmem>>, vector<4x8xbf16>
    %cst = arith.constant dense<0.000000e+00> : vector<288x8xf32>
    %21 = tpu.matmul %19, %20, %cst {dimension_numbers = #tpu.dot_dimension_numbers<[1], [0], [0], [1], [0, 0, 1, 1], [], []>} : vector<288x4xbf16>, vector<4x8xbf16>, vector<288x8xf32> -> vector<288x8xf32>
    %c0_12 = arith.constant 0 : index
    %c0_13 = arith.constant 0 : index
    %22 = vector.load %arg4[%c0_12, %c0_13] : memref<1x8xf32, #tpu.memory_space<vmem>>, vector<1x8xf32>
    %23 = vector.broadcast %22 : vector<1x8xf32> to vector<288x8xf32>
    %24 = arith.addf %21, %23 : vector<288x8xf32>
    %cst_14 = arith.constant 0.000000e+00 : f32
    %cst_15 = arith.constant 6.000000e+00 : f32
    %25 = vector.broadcast %cst_14 : f32 to vector<288x8xf32>
    %26 = arith.maximumf %25, %24 : vector<288x8xf32>
    %27 = vector.broadcast %cst_15 : f32 to vector<288x8xf32>
    %28 = arith.minimumf %27, %26 : vector<288x8xf32>
    %29 = vector.shape_cast %28 : vector<288x8xf32> to vector<18x16x8xf32>
    %30 = tpu.iota {dimensions = array<i32: 0>} : vector<18x1x1xi32>
    %31 = vector.broadcast %1 : i32 to vector<18x1x1xi32>
    %32 = arith.addi %31, %30 : vector<18x1x1xi32>
    %c0_i32_16 = arith.constant 0 : i32
    %33 = vector.broadcast %c0_i32_16 : i32 to vector<18x1x1xi32>
    %34 = arith.cmpi sge, %32, %33 : vector<18x1x1xi32>
    %c16_i32_17 = arith.constant 16 : i32
    %35 = vector.broadcast %c16_i32_17 : i32 to vector<18x1x1xi32>
    %36 = arith.cmpi slt, %32, %35 : vector<18x1x1xi32>
    %37 = arith.andi %34, %36 : vector<18x1x1xi1>
    %cst_18 = arith.constant 0.000000e+00 : f32
    %38 = vector.shape_cast %37 : vector<18x1x1xi1> to vector<18x1x1xi1>
    %39 = vector.broadcast %38 : vector<18x1x1xi1> to vector<18x16x8xi1>
    %40 = vector.broadcast %cst_18 : f32 to vector<18x16x8xf32>
    %41 = arith.select %39, %29, %40 : vector<18x16x8xi1>, vector<18x16x8xf32>
    %cst_19 = arith.constant 0.000000e+00 : f32
    %42 = vector.broadcast %cst_19 : f32 to vector<18x1x8xf32>
    %cst_20 = arith.constant 0.000000e+00 : f32
    %43 = vector.broadcast %cst_20 : f32 to vector<18x7x8xf32>
    %44 = tpu.concatenate %42, %41, %43 in 1 : vector<18x1x8xf32>, vector<18x16x8xf32>, vector<18x7x8xf32> -> vector<18x24x8xf32>
    %c0_21 = arith.constant 0 : index
    %c0_22 = arith.constant 0 : index
    %c0_23 = arith.constant 0 : index
    %45 = vector.load %arg5[%c0_21, %c0_22, %c0_23] : memref<3x3x8xf32, #tpu.memory_space<vmem>>, vector<3x3x8xf32>
    %cst_24 = arith.constant 0.000000e+00 : f32
    %46 = vector.broadcast %cst_24 : f32 to vector<16x16x8xf32>
    %47 = vector.extract_strided_slice %44 {offsets = [0, 0, 0], sizes = [16, 24, 8], strides = [1, 1, 1]} : vector<18x24x8xf32> to vector<16x24x8xf32>
    %48 = vector.extract_strided_slice %47 {offsets = [0, 0, 0], sizes = [16, 16, 8], strides = [1, 1, 1]} : vector<16x24x8xf32> to vector<16x16x8xf32>
    %49 = vector.extract_strided_slice %45 {offsets = [0, 0, 0], sizes = [1, 1, 8], strides = [1, 1, 1]} : vector<3x3x8xf32> to vector<1x1x8xf32>
    %50 = vector.shape_cast %49 : vector<1x1x8xf32> to vector<8xf32>
    %51 = vector.shape_cast %50 : vector<8xf32> to vector<1x1x8xf32>
    %52 = vector.broadcast %51 : vector<1x1x8xf32> to vector<16x16x8xf32>
    %53 = arith.mulf %48, %52 : vector<16x16x8xf32>
    %54 = arith.addf %46, %53 : vector<16x16x8xf32>
    %55 = vector.extract_strided_slice %47 {offsets = [0, 1, 0], sizes = [16, 16, 8], strides = [1, 1, 1]} : vector<16x24x8xf32> to vector<16x16x8xf32>
    %56 = vector.extract_strided_slice %45 {offsets = [0, 1, 0], sizes = [1, 1, 8], strides = [1, 1, 1]} : vector<3x3x8xf32> to vector<1x1x8xf32>
    %57 = vector.shape_cast %56 : vector<1x1x8xf32> to vector<8xf32>
    %58 = vector.shape_cast %57 : vector<8xf32> to vector<1x1x8xf32>
    %59 = vector.broadcast %58 : vector<1x1x8xf32> to vector<16x16x8xf32>
    %60 = arith.mulf %55, %59 : vector<16x16x8xf32>
    %61 = arith.addf %54, %60 : vector<16x16x8xf32>
    %62 = vector.extract_strided_slice %47 {offsets = [0, 2, 0], sizes = [16, 16, 8], strides = [1, 1, 1]} : vector<16x24x8xf32> to vector<16x16x8xf32>
    %63 = vector.extract_strided_slice %45 {offsets = [0, 2, 0], sizes = [1, 1, 8], strides = [1, 1, 1]} : vector<3x3x8xf32> to vector<1x1x8xf32>
    %64 = vector.shape_cast %63 : vector<1x1x8xf32> to vector<8xf32>
    %65 = vector.shape_cast %64 : vector<8xf32> to vector<1x1x8xf32>
    %66 = vector.broadcast %65 : vector<1x1x8xf32> to vector<16x16x8xf32>
    %67 = arith.mulf %62, %66 : vector<16x16x8xf32>
    %68 = arith.addf %61, %67 : vector<16x16x8xf32>
    %69 = vector.extract_strided_slice %44 {offsets = [1, 0, 0], sizes = [16, 24, 8], strides = [1, 1, 1]} : vector<18x24x8xf32> to vector<16x24x8xf32>
    %70 = vector.extract_strided_slice %69 {offsets = [0, 0, 0], sizes = [16, 16, 8], strides = [1, 1, 1]} : vector<16x24x8xf32> to vector<16x16x8xf32>
    %71 = vector.extract_strided_slice %45 {offsets = [1, 0, 0], sizes = [1, 1, 8], strides = [1, 1, 1]} : vector<3x3x8xf32> to vector<1x1x8xf32>
    %72 = vector.shape_cast %71 : vector<1x1x8xf32> to vector<8xf32>
    %73 = vector.shape_cast %72 : vector<8xf32> to vector<1x1x8xf32>
    %74 = vector.broadcast %73 : vector<1x1x8xf32> to vector<16x16x8xf32>
    %75 = arith.mulf %70, %74 : vector<16x16x8xf32>
    %76 = arith.addf %68, %75 : vector<16x16x8xf32>
    %77 = vector.extract_strided_slice %69 {offsets = [0, 1, 0], sizes = [16, 16, 8], strides = [1, 1, 1]} : vector<16x24x8xf32> to vector<16x16x8xf32>
    %78 = vector.extract_strided_slice %45 {offsets = [1, 1, 0], sizes = [1, 1, 8], strides = [1, 1, 1]} : vector<3x3x8xf32> to vector<1x1x8xf32>
    %79 = vector.shape_cast %78 : vector<1x1x8xf32> to vector<8xf32>
    %80 = vector.shape_cast %79 : vector<8xf32> to vector<1x1x8xf32>
    %81 = vector.broadcast %80 : vector<1x1x8xf32> to vector<16x16x8xf32>
    %82 = arith.mulf %77, %81 : vector<16x16x8xf32>
    %83 = arith.addf %76, %82 : vector<16x16x8xf32>
    %84 = vector.extract_strided_slice %69 {offsets = [0, 2, 0], sizes = [16, 16, 8], strides = [1, 1, 1]} : vector<16x24x8xf32> to vector<16x16x8xf32>
    %85 = vector.extract_strided_slice %45 {offsets = [1, 2, 0], sizes = [1, 1, 8], strides = [1, 1, 1]} : vector<3x3x8xf32> to vector<1x1x8xf32>
    %86 = vector.shape_cast %85 : vector<1x1x8xf32> to vector<8xf32>
    %87 = vector.shape_cast %86 : vector<8xf32> to vector<1x1x8xf32>
    %88 = vector.broadcast %87 : vector<1x1x8xf32> to vector<16x16x8xf32>
    %89 = arith.mulf %84, %88 : vector<16x16x8xf32>
    %90 = arith.addf %83, %89 : vector<16x16x8xf32>
    %91 = vector.extract_strided_slice %44 {offsets = [2, 0, 0], sizes = [16, 24, 8], strides = [1, 1, 1]} : vector<18x24x8xf32> to vector<16x24x8xf32>
    %92 = vector.extract_strided_slice %91 {offsets = [0, 0, 0], sizes = [16, 16, 8], strides = [1, 1, 1]} : vector<16x24x8xf32> to vector<16x16x8xf32>
    %93 = vector.extract_strided_slice %45 {offsets = [2, 0, 0], sizes = [1, 1, 8], strides = [1, 1, 1]} : vector<3x3x8xf32> to vector<1x1x8xf32>
    %94 = vector.shape_cast %93 : vector<1x1x8xf32> to vector<8xf32>
    %95 = vector.shape_cast %94 : vector<8xf32> to vector<1x1x8xf32>
    %96 = vector.broadcast %95 : vector<1x1x8xf32> to vector<16x16x8xf32>
    %97 = arith.mulf %92, %96 : vector<16x16x8xf32>
    %98 = arith.addf %90, %97 : vector<16x16x8xf32>
    %99 = vector.extract_strided_slice %91 {offsets = [0, 1, 0], sizes = [16, 16, 8], strides = [1, 1, 1]} : vector<16x24x8xf32> to vector<16x16x8xf32>
    %100 = vector.extract_strided_slice %45 {offsets = [2, 1, 0], sizes = [1, 1, 8], strides = [1, 1, 1]} : vector<3x3x8xf32> to vector<1x1x8xf32>
    %101 = vector.shape_cast %100 : vector<1x1x8xf32> to vector<8xf32>
    %102 = vector.shape_cast %101 : vector<8xf32> to vector<1x1x8xf32>
    %103 = vector.broadcast %102 : vector<1x1x8xf32> to vector<16x16x8xf32>
    %104 = arith.mulf %99, %103 : vector<16x16x8xf32>
    %105 = arith.addf %98, %104 : vector<16x16x8xf32>
    %106 = vector.extract_strided_slice %91 {offsets = [0, 2, 0], sizes = [16, 16, 8], strides = [1, 1, 1]} : vector<16x24x8xf32> to vector<16x16x8xf32>
    %107 = vector.extract_strided_slice %45 {offsets = [2, 2, 0], sizes = [1, 1, 8], strides = [1, 1, 1]} : vector<3x3x8xf32> to vector<1x1x8xf32>
    %108 = vector.shape_cast %107 : vector<1x1x8xf32> to vector<8xf32>
    %109 = vector.shape_cast %108 : vector<8xf32> to vector<1x1x8xf32>
    %110 = vector.broadcast %109 : vector<1x1x8xf32> to vector<16x16x8xf32>
    %111 = arith.mulf %106, %110 : vector<16x16x8xf32>
    %112 = arith.addf %105, %111 : vector<16x16x8xf32>
    %c0_25 = arith.constant 0 : index
    %c0_26 = arith.constant 0 : index
    %113 = vector.load %arg6[%c0_25, %c0_26] : memref<1x8xf32, #tpu.memory_space<vmem>>, vector<1x8xf32>
    %114 = vector.shape_cast %113 : vector<1x8xf32> to vector<1x1x8xf32>
    %115 = vector.broadcast %114 : vector<1x1x8xf32> to vector<16x16x8xf32>
    %116 = arith.addf %112, %115 : vector<16x16x8xf32>
    %cst_27 = arith.constant 0.000000e+00 : f32
    %cst_28 = arith.constant 6.000000e+00 : f32
    %117 = vector.broadcast %cst_27 : f32 to vector<16x16x8xf32>
    %118 = arith.maximumf %117, %116 : vector<16x16x8xf32>
    %119 = vector.broadcast %cst_28 : f32 to vector<16x16x8xf32>
    %120 = arith.minimumf %119, %118 : vector<16x16x8xf32>
    %121 = vector.shape_cast %120 : vector<16x16x8xf32> to vector<256x8xf32>
    %122 = arith.truncf %121 : vector<256x8xf32> to vector<256x8xbf16>
    %c0_29 = arith.constant 0 : index
    %c0_30 = arith.constant 0 : index
    %123 = vector.load %arg7[%c0_29, %c0_30] : memref<8x4xbf16, #tpu.memory_space<vmem>>, vector<8x4xbf16>
    %cst_31 = arith.constant dense<0.000000e+00> : vector<256x4xf32>
    %124 = tpu.matmul %122, %123, %cst_31 {dimension_numbers = #tpu.dot_dimension_numbers<[1], [0], [0], [1], [0, 0, 1, 1], [], []>} : vector<256x8xbf16>, vector<8x4xbf16>, vector<256x4xf32> -> vector<256x4xf32>
    %c0_32 = arith.constant 0 : index
    %c0_33 = arith.constant 0 : index
    %125 = vector.load %arg8[%c0_32, %c0_33] : memref<1x4xf32, #tpu.memory_space<vmem>>, vector<1x4xf32>
    %126 = vector.broadcast %125 : vector<1x4xf32> to vector<256x4xf32>
    %127 = arith.addf %124, %126 : vector<256x4xf32>
    %c16_i32_34 = arith.constant 16 : i32
    %128 = arith.muli %arg1, %c16_i32_34 : i32
    %129 = tpu.assume_multiple %128, 16 : i32
    %c0_35 = arith.constant 0 : index
    %130 = arith.index_cast %129 : i32 to index
    %c0_36 = arith.constant 0 : index
    %c0_37 = arith.constant 0 : index
    %131 = vector.load %arg2[%c0_35, %130, %c0_36, %c0_37] : memref<1x16x16x4xf32, #tpu.memory_space<vmem>>, vector<1x16x16x4xf32>
    %132 = vector.shape_cast %131 : vector<1x16x16x4xf32> to vector<16x16x4xf32>
    %133 = vector.shape_cast %132 : vector<16x16x4xf32> to vector<256x4xf32>
    %134 = arith.addf %127, %133 : vector<256x4xf32>
    %135 = vector.shape_cast %134 : vector<256x4xf32> to vector<16x16x4xf32>
    %c0_38 = arith.constant 0 : index
    %c0_39 = arith.constant 0 : index
    %c0_40 = arith.constant 0 : index
    %c0_41 = arith.constant 0 : index
    %136 = vector.load %arg9[%c0_38, %c0_39, %c0_40, %c0_41] : memref<1x16x16x4xf32, #tpu.memory_space<vmem>>, vector<1x16x16x4xf32>
    %137 = vector.shape_cast %136 : vector<1x16x16x4xf32> to vector<16x16x4xf32>
    %138 = vector.shape_cast %135 : vector<16x16x4xf32> to vector<1x16x16x4xf32>
    tpu.vector_store %arg9[%c0_38, %c0_39, %c0_40, %c0_41], %138 {strides = array<i32>} : memref<1x16x16x4xf32, #tpu.memory_space<vmem>>, vector<1x16x16x4xf32>,
    return
  }
  func.func @transform_0(%arg0: i32, %arg1: i32) -> (i32, i32, i32, i32) {
    %c0_i32 = arith.constant 0 : i32
    %c0_i32_0 = arith.constant 0 : i32
    %c0_i32_1 = arith.constant 0 : i32
    %c0_i32_2 = arith.constant 0 : i32
    return %arg0, %c0_i32, %c0_i32_0, %c0_i32_1 : i32, i32, i32, i32
  }
  func.func @transform_1(%arg0: i32, %arg1: i32) -> (i32, i32) {
    %c0_i32 = arith.constant 0 : i32
    %c0_i32_0 = arith.constant 0 : i32
    %c0_i32_1 = arith.constant 0 : i32
    return %c0_i32, %c0_i32_0 : i32, i32
  }
  func.func @transform_2(%arg0: i32, %arg1: i32) -> (i32, i32) {
    %c0_i32 = arith.constant 0 : i32
    %c0_i32_0 = arith.constant 0 : i32
    %c0_i32_1 = arith.constant 0 : i32
    return %c0_i32, %c0_i32_0 : i32, i32
  }
  func.func @transform_3(%arg0: i32, %arg1: i32) -> (i32, i32, i32) {
    %c0_i32 = arith.constant 0 : i32
    %c0_i32_0 = arith.constant 0 : i32
    %c0_i32_1 = arith.constant 0 : i32
    %c0_i32_2 = arith.constant 0 : i32
    return %c0_i32, %c0_i32_0, %c0_i32_1 : i32, i32, i32
  }
  func.func @transform_4(%arg0: i32, %arg1: i32) -> (i32, i32) {
    %c0_i32 = arith.constant 0 : i32
    %c0_i32_0 = arith.constant 0 : i32
    %c0_i32_1 = arith.constant 0 : i32
    return %c0_i32, %c0_i32_0 : i32, i32
  }
  func.func @transform_5(%arg0: i32, %arg1: i32) -> (i32, i32) {
    %c0_i32 = arith.constant 0 : i32
    %c0_i32_0 = arith.constant 0 : i32
    %c0_i32_1 = arith.constant 0 : i32
    return %c0_i32, %c0_i32_0 : i32, i32
  }
  func.func @transform_6(%arg0: i32, %arg1: i32) -> (i32, i32) {
    %c0_i32 = arith.constant 0 : i32
    %c0_i32_0 = arith.constant 0 : i32
    %c0_i32_1 = arith.constant 0 : i32
    return %c0_i32, %c0_i32_0 : i32, i32
  }
  func.func @transform_7(%arg0: i32, %arg1: i32) -> (i32, i32, i32, i32) {
    %c0_i32 = arith.constant 0 : i32
    %c0_i32_0 = arith.constant 0 : i32
    %c0_i32_1 = arith.constant 0 : i32
    return %arg0, %arg1, %c0_i32, %c0_i32_0 : i32, i32, i32, i32
  }
}

</mosaic_0001>

<bundles_post_ra>
// kernel: tpu_custom_call.1
= control target key start
LH: loop header
LB: loop body
LE: loop exit
PB: predicated region body
PF: predicated region fallthrough
CT: control target
= control target key end

     0   :  { %s3178_s24 = smov 0   ;;  %s3180_s25 = smov 0   ;;  %s5414_s0 = inlined_call_operand.vmem [shape: f32[2,16,16,4], index: 0, kind: input, shape index: {}]   ;;  %s5415_s1 = inlined_call_operand.vmem [shape: bf16[4,8], index: 1, kind: input, shape index: {}]   ;;  %s5416_s2 = inlined_call_operand.vmem [shape: f32[1,8], index: 2, kind: input, shape index: {}]   ;;  %s5417_s3 = inlined_call_operand.vmem [shape: f32[3,3,8], index: 3, kind: input, shape index: {}]   ;;  %s5418_s4 = inlined_call_operand.vmem [shape: f32[1,8], index: 4, kind: input, shape index: {}]   ;;  %s5419_s5 = inlined_call_operand.vmem [shape: bf16[8,4], index: 5, kind: input, shape index: {}]   ;;  %s5420_s6 = inlined_call_operand.vmem [shape: f32[1,4], index: 6, kind: input, shape index: {}]   ;;  %s5421_s7 = inlined_call_operand.vmem [shape: f32[2,16,16,4], index: 7, kind: output, shape index: {}]  }
   0x1   :  { %s3182_s26 = smov 0  }
   0x2 LB: > { %s29_s27 = sadd.s32 1, %s3131_s25  ;;  %p3002_p0 = scmp.ge.s32.totalorder %s3135_s26, 1  ;;  %s3135_s26 = sphi %s3182_s26, %s17_s26   ;;  %s3131_s25 = sphi %s3180_s25, %s5895_s25   ;;  %s3127_s24 = sphi %s3178_s24, %s5894_s24  }
   0x3   : > { %p31_p1 = scmp.ge.s32.totalorder %s29_s27, 2  ;;  %p251_p2 = scmp.lt.s32.totalorder %s3135_s26, 3 }
   0x5   : > { %s5897_s27 = smov (%p31_p1, %s29_s27), 0  ;;  %p252_p3 = pnand %p3002_p0, %p251_p2 }
   0x7   : > { %255 = sbr.rel (%p252_p3) target bundleno = 680 (0x2a8), region = 48 }
   0xc   : > { %v372_v0 = vld [vmem:[%s5415_s1] sm:$0x3]  ;;  %vm432_vm0 = vcmask 1041408   ;;  %p288_p4 = scmp.lt.s32.totalorder %s3127_s24, 1  ;;  %vm377_vm1 = vcmask 31744   ;;  %v3137_v52 = vmov 0.0  }
   0xd   : > { %v434_v1 = vsel %vm432_vm0, %v372_v0, 0  ;;  %v932_v51 = vld [vmem:[%s5417_s3] sm:$0x7]  ;;  %v3261_v53 = vrot.slane %v3137_v52, 7  ;;  %vm787_vm2 = vcmask 1040384   ;;  %vm1097_vm3 = vcmask 1046528  }
   0xe   : > { %443 = vmatpush.bf16.msra.mxu0 %v434_v1  ;;  %3047 = vmatpush.bf16.msra.mxu2 %v434_v1  ;;  %s5899_s24 = smov (!%p288_p4, %s3127_s24), 1  ;;  %v3266_v54 = vld [vmem:[%s5416_s2] ss:$0 sm:$0xff]  ;;  %v3268_v55 = vperm.slane %v932_v51, 1  ;;  %v3283_v0 = vperm.slane %v932_v51, 2  ;;  %vm1339_vm4 = vcmask 1045504  }
   0xf   : > { %s3045_s30 = sshll.u32 %s5899_s24, 8  ;;  %5545 = vst [vmem:[#allocation2_spill] sm:$0xff] %v3261_v53  ;;  %v3272_v57 = vsel %vm787_vm2, 0.0, %v3261_v53  ;;  %v3277_v60 = vsel %vm787_vm2, %v3261_v53, 0.0  ;;  %vm2748_vm5 = vcmask 1043456   ;;  %vm2699_vm6 = vcmask 64512  }
  0x10   : > { %s3207_s10 = scalar_lea.vmem %s5414_s0, %s3045_s30  ;;  %5546 = vst [vmem:[#allocation3_spill] sm:$0xff] %v3272_v57  ;;  %v1001_v62 = vmul.f32 %v3268_v55, %v3272_v57  ;;  %v1002_v63 = vmul.f32 %v3268_v55, %v3261_v53  ;;  %v1003_v1 = vmul.f32 %v3268_v55, %v3277_v60  ;;  %s5207_s16 = scalar_lea.vmem %s5421_s7, %s3045_s30 }
  0x11   : > { %v311_v2 = vld [vmem:[%s3207_s10] sm:$0xff]  ;;  %v312_v3 = vld [vmem:[%s3207_s10 + $0x8] sm:$0xff]  ;;  %v333_v8 = vld [vmem:[%s3207_s10 + $0x90] sm:$0xff]  ;;  %5547 = vst [vmem:[#allocation4_spill] sm:$0xff] %v3277_v60 }
  0x12   : > { %v331_v4 = vld [vmem:[%s3207_s10 + $0x80] sm:$0xff]  ;;  %v354_v5 = vpack.c.bf16 %v312_v3, %v311_v2  ;;  %v332_v6 = vld [vmem:[%s3207_s10 + $0x88] sm:$0xff]  ;;  %v334_v9 = vld [vmem:[%s3207_s10 + $0x98] sm:$0xff]  ;;  %v3287_v3 = vperm.slane %v932_v51, 0 }
  0x13   : > { %v363_v7 = vpack.c.bf16 %v332_v6, %v331_v4  ;;  %v364_v10 = vpack.c.bf16 %v334_v9, %v333_v8  ;;  %v317_v11 = vld [vmem:[%s3207_s10 + $0x10] sm:$0xff]  ;;  %v318_v12 = vld [vmem:[%s3207_s10 + $0x18] sm:$0xff]  ;;  %v335_v13 = vld [vmem:[%s3207_s10 + $0xa0] sm:$0xff]  ;;  %v1098_v4 = vrot.slane %v1001_v62, 1  ;;  %v1244_v8 = vmul.f32 %v3283_v0, %v3261_v53 }
  0x14   : > { %3009 = vmatmul.msk.bf16.vlgmr.msra.gmra.mxu0 %vm377_vm1, %v354_v5  ;;  %v336_v14 = vld [vmem:[%s3207_s10 + $0xa8] sm:$0xff]  ;;  %v356_v15 = vpack.c.bf16 %v318_v12, %v317_v11  ;;  %v319_v17 = vld [vmem:[%s3207_s10 + $0x20] sm:$0xff]  ;;  %v337_v19 = vld [vmem:[%s3207_s10 + $0xb0] sm:$0xff]  ;;  %v1101_v11 = vrot.slane %v1003_v1, 1  ;;  %v1245_v12 = vmul.f32 %v3283_v0, %v3277_v60 }
  0x15   : > { %3018 = vmatmul.msk.bf16.vlgmr.msra.gmra.mxu2 %vm377_vm1, %v363_v7  ;;  %v365_v16 = vpack.c.bf16 %v336_v14, %v335_v13  ;;  %v320_v18 = vld [vmem:[%s3207_s10 + $0x28] sm:$0xff]  ;;  %v338_v20 = vld [vmem:[%s3207_s10 + $0xb8] sm:$0xff]  ;;  %v321_v23 = vld [vmem:[%s3207_s10 + $0x30] sm:$0xff]  ;;  %v1243_v7 = vmul.f32 %v3283_v0, %v3272_v57 }
  0x16   : > { %v357_v21 = vpack.c.bf16 %v320_v18, %v319_v17  ;;  %v366_v22 = vpack.c.bf16 %v338_v20, %v337_v19  ;;  %v322_v24 = vld [vmem:[%s3207_s10 + $0x38] sm:$0xff]  ;;  %v339_v25 = vld [vmem:[%s3207_s10 + $0xc0] sm:$0xff]  ;;  %v340_v26 = vld [vmem:[%s3207_s10 + $0xc8] sm:$0xff]  ;;  %v936_v17 = vmul.f32 %v3287_v3, %v3272_v57 }
  0x17   : > { %v358_v27 = vpack.c.bf16 %v322_v24, %v321_v23  ;;  %v367_v28 = vpack.c.bf16 %v340_v26, %v339_v25  ;;  %v323_v29 = vld [vmem:[%s3207_s10 + $0x40] sm:$0xff]  ;;  %v324_v30 = vld [vmem:[%s3207_s10 + $0x48] sm:$0xff]  ;;  %v341_v31 = vld [vmem:[%s3207_s10 + $0xd0] sm:$0xff]  ;;  %v1340_v20 = vrot.slane %v1243_v7, 2  ;;  %v1343_v26 = vrot.slane %v1245_v12, 2 }
  0x18   : > { %v342_v32 = vld [vmem:[%s3207_s10 + $0xd8] sm:$0xff]  ;;  %v359_v33 = vpack.c.bf16 %v324_v30, %v323_v29  ;;  %v325_v35 = vld [vmem:[%s3207_s10 + $0x50] sm:$0xff]  ;;  %v343_v37 = vld [vmem:[%s3207_s10 + $0xe0] sm:$0xff] }
  0x19   : > { %v368_v34 = vpack.c.bf16 %v342_v32, %v341_v31  ;;  %v326_v36 = vld [vmem:[%s3207_s10 + $0x58] sm:$0xff]  ;;  %v344_v38 = vld [vmem:[%s3207_s10 + $0xe8] sm:$0xff]  ;;  %v327_v41 = vld [vmem:[%s3207_s10 + $0x60] sm:$0xff] }
  0x1a   : > { %v360_v39 = vpack.c.bf16 %v326_v36, %v325_v35  ;;  %v369_v40 = vpack.c.bf16 %v344_v38, %v343_v37  ;;  %v328_v42 = vld [vmem:[%s3207_s10 + $0x68] sm:$0xff]  ;;  %v345_v43 = vld [vmem:[%s3207_s10 + $0xf0] sm:$0xff]  ;;  %v346_v44 = vld [vmem:[%s3207_s10 + $0xf8] sm:$0xff] }
  0x1b   : > { %v361_v45 = vpack.c.bf16 %v328_v42, %v327_v41  ;;  %v370_v46 = vpack.c.bf16 %v346_v44, %v345_v43  ;;  %v329_v47 = vld [vmem:[%s3207_s10 + $0x70] sm:$0xff]  ;;  %v330_v48 = vld [vmem:[%s3207_s10 + $0x78] sm:$0xff]  ;;  %v3308_v24 = vld [vmem:[%s5417_s3 + $0x8] sm:$0x7] }
  0x1c   : > { %v362_v49 = vpack.c.bf16 %v330_v48, %v329_v47 }
  0x24   : > { %3010 = vmatmul.msk.bf16.gmra.mxu0 %vm377_vm1, %v354_v5  ;;  %v1099_v5 = vrot.slane %v1002_v63, 1 }
  0x25   : > { %3019 = vmatmul.msk.bf16.gmra.mxu2 %vm377_vm1, %v364_v10 }
  0x26   : > { %v1100_v18 = vsel %vm1097_vm3, %v1098_v4, %v1099_v5  ;;  %v1102_v25 = vsel %vm1097_vm3, %v1099_v5, %v1101_v11 }
  0x27   : > { %v1210_v32 = vadd.f32 %v1100_v18, %v936_v17 }
  0x34   : > { %3011 = vmatmul.msk.bf16.gmra.mxu0 %vm377_vm1, %v356_v15 }
  0x35   : > { %3020 = vmatmul.msk.bf16.gmra.mxu2 %vm377_vm1, %v365_v16  ;;  %v933_v16 = vld [vmem:[%s5417_s3 + $0x4] sm:$0x7] }
  0x36   : > { %v3316_v30 = vperm.slane %v933_v16, 2  ;;  %v3365_v63 = vperm.slane %v933_v16, 0 }
  0x44   : > { %3012 = vmatmul.msk.bf16.gmra.mxu0 %vm377_vm1, %v357_v21  ;;  %v1341_v21 = vrot.slane %v1244_v8, 2 }
  0x45   : > { %3021 = vmatmul.msk.bf16.gmra.mxu2 %vm377_vm1, %v366_v22  ;;  %v937_v22 = vmul.f32 %v3287_v3, %v3261_v53 }
  0x46   : > { %v1342_v35 = vsel %vm1339_vm4, %v1340_v20, %v1341_v21  ;;  %v1344_v42 = vsel %vm1339_vm4, %v1341_v21, %v1343_v26 }
  0x47   : > { %v1211_v37 = vadd.f32 %v1102_v25, %v937_v22 }
  0x49   : > { %v1453_v5 = vadd.f32 %v1344_v42, %v1211_v37 }
  0x54   : > { %3013 = vmatmul.msk.bf16.gmra.mxu0 %vm377_vm1, %v358_v27 }
  0x55   : > { %3022 = vmatmul.msk.bf16.gmra.mxu2 %vm377_vm1, %v367_v28  ;;  %v3314_v28 = vperm.slane %v933_v16, 1 }
  0x64   : > { %3014 = vmatmul.msk.bf16.gmra.mxu0 %vm377_vm1, %v359_v33  ;;  %v3321_v33 = vperm.slane %v3308_v24, 1 }
  0x65   : > { %3023 = vmatmul.msk.bf16.gmra.mxu2 %vm377_vm1, %v368_v34  ;;  %v3324_v34 = vperm.slane %v3308_v24, 2 }
  0x74   : > { %3015 = vmatmul.msk.bf16.gmra.mxu0 %vm377_vm1, %v360_v39 }
  0x75   : > { %3024 = vmatmul.msk.bf16.gmra.mxu2 %vm377_vm1, %v369_v40 }
  0x84   : > { %3016 = vmatmul.msk.bf16.gmra.mxu0 %vm377_vm1, %v361_v45 }
  0x85   : > { %3025 = vmatmul.msk.bf16.gmra.mxu2 %vm377_vm1, %v370_v46 }
  0x91   : > { %v445_v50 = vpop.f32.mrf.mxu0 }
  0x94   : > { %3017 = vmatmul.msk.bf16.gmra.mxu0 %vm377_vm1, %v362_v49 }
  0x98   : > { %v490_v56 = vpop.f32.mrf.mxu2 }
  0x99   : > { %v491_v58 = vadd.f32 %v3266_v54, %v490_v56  ;;  %v447_v59 = vpop.f32.mrf.mxu0 }
  0x9b   : > { %v553_v61 = vmax.f32 %v491_v58, 0.0 }
  0x9d   : > { %v589_v2 = vmin.f32 %v553_v61, 6.0 }
  0x9f   : > { %v815_v13 = vrot.slane %v589_v2, 7  ;;  %v1452_v2 = vadd.f32 %v1342_v35, %v1210_v32 }
  0xa0   : > { %v492_v6 = vpop.f32.mrf.mxu2 }
  0xa1   : > { %v493_v9 = vadd.f32 %v3266_v54, %v492_v6  ;;  %v450_v10 = vpop.f32.mrf.mxu0  ;;  %v3312_v27 = vsel %vm787_vm2, 0.0, %v815_v13 }
  0xa2   : > { %v451_v14 = vadd.f32 %v3266_v54, %v450_v10  ;;  %5548 = vst [vmem:[#allocation5_spill] sm:$0xff] %v3312_v27  ;;  %v3329_v38 = vmul.f32 %v3268_v55, %v3312_v27  ;;  %v3348_v47 = vmul.f32 %v3283_v0, %v3312_v27  ;;  %v3372_v6 = vmul.f32 %v3287_v3, %v3312_v27 }
  0xa3   : > { %v554_v15 = vmax.f32 %v493_v9, 0.0 }
  0xa4   : > { %v537_v19 = vmax.f32 %v451_v14, 0.0 }
  0xa5   : > { %v590_v23 = vmin.f32 %v554_v15, 6.0 }
  0xa6   : > { %v3318_v31 = vmin.f32 %v537_v19, 6.0 }
  0xa7   : > { %v816_v29 = vrot.slane %v590_v23, 7 }
  0xa8   : > { %v495_v36 = vpop.f32.mrf.mxu2  ;;  %v791_v50 = vrot.slane %v3318_v31, 7 }
  0xa9   : > { %v3332_v39 = vsel %vm787_vm2, %v815_v13, %v816_v29  ;;  %v923_v40 = vsel %vm787_vm2, %v816_v29, 0.0  ;;  %v452_v41 = vpop.f32.mrf.mxu0  ;;  %v496_v46 = vadd.f32 %v3266_v54, %v495_v36 }
  0xaa   : > { %5549 = vst [vmem:[#allocation6_spill] sm:$0xff] %v3332_v39  ;;  %v3338_v43 = vmul.f32 %v3268_v55, %v3332_v39  ;;  %v1030_v44 = vmul.f32 %v3268_v55, %v923_v40  ;;  %v3343_v45 = vmul.f32 %v3283_v0, %v3332_v39  ;;  %v955_v48 = vmul.f32 %v3287_v3, %v3332_v39 }
  0xab   : > { %v1272_v49 = vmul.f32 %v3283_v0, %v923_v40  ;;  %v3356_v56 = vmul.f32 %v3314_v28, %v923_v40  ;;  %v3359_v58 = vmul.f32 %v3316_v30, %v923_v40  ;;  %v3363_v62 = vmul.f32 %v3321_v33, %v923_v40 }
  0xac   : > { %v5423_v51 = vrot.slane %v3338_v43, 1  ;;  %v1146_v52 = vrot.slane %v1030_v44, 1  ;;  %v5422_v59 = vrot.slane %v3343_v45, 2  ;;  %v555_v4 = vmax.f32 %v496_v46, 0.0 }
  0xad   : > { %5550 = vst [vmem:[#allocation7_spill] sm:$0xff] %v3356_v56  ;;  %v1388_v61 = vrot.slane %v1272_v49, 2  ;;  %v897_v9 = vsel %vm787_vm2, 0.0, %v791_v50  ;;  %v3380_v13 = vmul.f32 %v3324_v34, %v923_v40  ;;  %v453_v18 = vadd.f32 %v3266_v54, %v452_v41 }
  0xae   : > { %5551 = vst [vmem:[#allocation8_spill] sm:$0xff] %v3359_v58  ;;  %v1147_v1 = vsel %vm1097_vm3, %v5423_v51, %v1146_v52  ;;  %v3386_v17 = vmin.f32 %v555_v4, 6.0  ;;  %v1004_v20 = vmul.f32 %v3268_v55, %v897_v9  ;;  %v1246_v21 = vmul.f32 %v3283_v0, %v897_v9 }
  0xaf   : > { %5552 = vst [vmem:[#allocation9_spill] sm:$0xff] %v3363_v62  ;;  %v1229_v10 = vadd.f32 %v1147_v1, %v955_v48  ;;  %v1389_v15 = vsel %vm1339_vm4, %v5422_v59, %v1388_v61  ;;  %v1485_v22 = vmul.f32 %v3365_v63, %v897_v9  ;;  %v3393_v23 = vmul.f32 %v3314_v28, %v897_v9 }
  0xb0   : > { %5553 = vst [vmem:[#allocation10_spill] sm:$0xff] %v3380_v13  ;;  %v497_v14 = vpop.f32.mrf.mxu2  ;;  %v818_v25 = vrot.slane %v3386_v17, 7  ;;  %v538_v26 = vmax.f32 %v453_v18, 0.0  ;;  %v938_v36 = vmul.f32 %v3287_v3, %v897_v9  ;;  %v3403_v37 = vmul.f32 %v3316_v30, %v897_v9 }
  0xb1   : > { %v455_v19 = vpop.f32.mrf.mxu0  ;;  %v498_v29 = vadd.f32 %v3266_v54, %v497_v14  ;;  %v3398_v32 = vadd.f32 %v1389_v15, %v1229_v10  ;;  %v1103_v46 = vrot.slane %v1004_v20, 1  ;;  %v1345_v48 = vrot.slane %v1246_v21, 2 }
  0xb2   : > { %v456_v31 = vadd.f32 %v3266_v54, %v455_v19  ;;  %v3406_v40 = vsel %vm787_vm2, 0.0, %v818_v25  ;;  %v574_v41 = vmin.f32 %v538_v26, 6.0  ;;  %v3416_v61 = vadd.f32 %v1485_v22, %v1452_v2 }
  0xb3   : > { %5554 = vst [vmem:[#allocation11_spill] sm:$0xff] %v3406_v40  ;;  %v556_v42 = vmax.f32 %v498_v29, 0.0  ;;  %v3410_v49 = vmul.f32 %v3268_v55, %v3406_v40  ;;  %v3414_v52 = vmul.f32 %v3283_v0, %v3406_v40  ;;  %v3422_v14 = vmul.f32 %v3287_v3, %v3406_v40 }
  0xb4   : > { %v539_v44 = vmax.f32 %v456_v31, 0.0  ;;  %v792_v4 = vrot.slane %v574_v41, 7 }
  0xb5   : > { %5555 = vst [vmem:[#allocation12_spill] sm:$0xff] %v3410_v49  ;;  %v592_v9 = vmin.f32 %v556_v42, 6.0 }
  0xb6   : > { %5556 = vst [vmem:[#allocation13_spill] sm:$0xff] %v3414_v52  ;;  %v3425_v17 = vmin.f32 %v539_v44, 6.0  ;;  %v793_v2 = vsel %vm787_vm2, %v791_v50, %v792_v4  ;;  %v915_v20 = vsel %vm787_vm2, %v792_v4, 0.0 }
  0xb7   : > { %5557 = vst [vmem:[#allocation14_spill] sm:$0xff] %v3422_v14  ;;  %v819_v21 = vrot.slane %v592_v9, 7  ;;  %v939_v26 = vmul.f32 %v3287_v3, %v793_v2  ;;  %v1005_v29 = vmul.f32 %v3268_v55, %v793_v2  ;;  %v1006_v31 = vmul.f32 %v3268_v55, %v915_v20 }
  0xb8   : > { %v3427_v18 = vpop.f32.mrf.mxu2  ;;  %v1247_v41 = vmul.f32 %v3283_v0, %v793_v2  ;;  %v1248_v42 = vmul.f32 %v3283_v0, %v915_v20  ;;  %v1486_v44 = vmul.f32 %v3365_v63, %v793_v2  ;;  %v3439_v12 = vmul.f32 %v3314_v28, %v793_v2 }
  0xb9   : > { %v457_v22 = vpop.f32.mrf.mxu0  ;;  %v1552_v50 = vmul.f32 %v3314_v28, %v915_v20  ;;  %v1104_v4 = vrot.slane %v1005_v29, 1  ;;  %v1106_v9 = vrot.slane %v1006_v31, 1  ;;  %v3443_v35 = vmul.f32 %v3316_v30, %v793_v2 }
  0xba   : > { %v1346_v11 = vrot.slane %v1247_v41, 2  ;;  %v1348_v16 = vrot.slane %v1248_v42, 2  ;;  %v1518_v19 = vadd.f32 %v1486_v44, %v1453_v5  ;;  %v5425_v15 = vrot.slane %v3439_v12, 1 }
  0xbb   : > { %v1649_v8 = vrot.slane %v1552_v50, 1  ;;  %v1105_v59 = vsel %vm1097_vm3, %v1103_v46, %v1104_v4  ;;  %v1107_v7 = vsel %vm1097_vm3, %v1104_v4, %v1106_v9  ;;  %v1793_v51 = vmul.f32 %v3316_v30, %v915_v20 }
  0xbc   : > { %v5426_v10 = vrot.slane %v3425_v17, 7  ;;  %v3450_v1 = vadd.f32 %v1105_v59, %v938_v36  ;;  %v1213_v29 = vadd.f32 %v1107_v7, %v939_v26  ;;  %v3453_v31 = vsel %vm1339_vm4, %v1345_v48, %v1346_v11 }
  0xbd   : > { %v1650_v5 = vsel %vm1097_vm3, %v5425_v15, %v1649_v8  ;;  %v1349_v2 = vsel %vm1339_vm4, %v1346_v11, %v1348_v16  ;;  %v5424_v46 = vrot.slane %v3443_v35, 2  ;;  %v1890_v41 = vrot.slane %v1793_v51, 2 }
  0xbe   : > { %v3461_v42 = vsel %vm787_vm2, %v818_v25, %v819_v21  ;;  %v3463_v44 = vadd.f32 %v1349_v2, %v1213_v29  ;;  %v1759_v59 = vadd.f32 %v1650_v5, %v1518_v19  ;;  %v924_v7 = vsel %vm787_vm2, %v819_v21, 0.0 }
  0xbf   : > { %5558 = vst [vmem:[#allocation15_spill] sm:$0xff] %v3461_v42  ;;  %v3468_v36 = vmul.f32 %v3268_v55, %v3461_v42  ;;  %v957_v8 = vmul.f32 %v3287_v3, %v3461_v42  ;;  %v1033_v11 = vmul.f32 %v3268_v55, %v924_v7  ;;  %v3475_v51 = vmul.f32 %v3283_v0, %v3461_v42 }
  0xc0   : > { %v502_v20 = vpop.f32.mrf.mxu2  ;;  %v1275_v16 = vmul.f32 %v3283_v0, %v924_v7  ;;  %v1891_v25 = vsel %vm1339_vm4, %v5424_v46, %v1890_v41  ;;  %v3483_v21 = vmul.f32 %v3314_v28, %v924_v7  ;;  %v3486_v26 = vmul.f32 %v3316_v30, %v924_v7 }
  0xc1   : > { %5559 = vst [vmem:[#allocation16_spill] sm:$0xff] %v3468_v36  ;;  %v460_v48 = vpop.f32.mrf.mxu0  ;;  %v5428_v19 = vrot.slane %v3468_v36, 1  ;;  %v1151_v50 = vrot.slane %v1033_v11, 1  ;;  %v5427_v4 = vrot.slane %v3475_v51, 2  ;;  %v3490_v29 = vmul.f32 %v3321_v33, %v924_v7 }
  0xc2   : > { %5560 = vst [vmem:[#allocation17_spill] sm:$0xff] %v3475_v51  ;;  %v1393_v9 = vrot.slane %v1275_v16, 2  ;;  %v3492_v5 = vadd.f32 %v1891_v25, %v1759_v59  ;;  %v3496_v41 = vmul.f32 %v3324_v34, %v924_v7  ;;  %v3501_v46 = vsel %vm787_vm2, 0.0, %v5426_v10 }
  0xc3   : > { %5561 = vst [vmem:[#allocation18_spill] sm:$0xff] %v3490_v29  ;;  %v1152_v11 = vsel %vm1097_vm3, %v5428_v19, %v1151_v50  ;;  %v3514_v15 = vmul.f32 %v3287_v3, %v3501_v46  ;;  %v3518_v10 = vmul.f32 %v3268_v55, %v3501_v46  ;;  %v501_v50 = vadd.f32 %v3266_v54, %v3427_v18 }
  0xc4   : > { %5562 = vst [vmem:[#allocation19_spill] sm:$0xff] %v3496_v41  ;;  %v1394_v16 = vsel %vm1339_vm4, %v5427_v4, %v1393_v9  ;;  %v1231_v2 = vadd.f32 %v1152_v11, %v957_v8  ;;  %v458_v9 = vadd.f32 %v3266_v54, %v457_v22  ;;  %v503_v4 = vadd.f32 %v3266_v54, %v502_v20  ;;  %v2694_v20 = vld [vmem:[%s5419_s5] sm:$0xf] }
  0xc5   : > { %5563 = vst [vmem:[#allocation20_spill] sm:$0xff] %v3514_v15  ;;  %v461_v25 = vadd.f32 %v3266_v54, %v460_v48  ;;  %v3530_v19 = vmul.f32 %v3283_v0, %v3501_v46  ;;  %v557_v29 = vmax.f32 %v501_v50, 0.0  ;;  %v5568_v7 = vrot.slane %v3393_v23, 1 }
  0xc6   : > { %5564 = vst [vmem:[#allocation21_spill] sm:$0xff] %v3518_v10  ;;  %v3525_v11 = vadd.f32 %v1394_v16, %v1231_v2  ;;  %v540_v18 = vmax.f32 %v458_v9, 0.0  ;;  %v558_v58 = vmax.f32 %v503_v4, 0.0  ;;  %v5567_v16 = vrot.slane %v3439_v12, 1 }
  0xc7   : > { %5566 = vst [vmem:[#allocation23_spill] sm:$0xff] %v3530_v19  ;;  %v541_v22 = vmax.f32 %v461_v25, 0.0 }
  0xc8   : > { %v505_v8 = vpop.f32.mrf.mxu2  ;;  %5565 = vst [vmem:[#allocation22_spill] sm:$0xff] %v3525_v11  ;;  %v1648_v56 = vsel %vm1097_vm3, %v5568_v7, %v5567_v16  ;;  %v576_v13 = vmin.f32 %v540_v18, 6.0  ;;  %v594_v50 = vmin.f32 %v558_v58, 6.0  ;;  %v5569_v7 = vrot.slane %v3443_v35, 2 }
  0xc9   : > { %v506_v59 = vadd.f32 %v3266_v54, %v505_v8  ;;  %v462_v41 = vpop.f32.mrf.mxu0  ;;  %v593_v8 = vmin.f32 %v557_v29, 6.0  ;;  %v3542_v9 = vmin.f32 %v541_v22, 6.0  ;;  %v3548_v12 = vadd.f32 %v1648_v56, %v3416_v61 }
  0xca   : > { %v463_v2 = vadd.f32 %v3266_v54, %v462_v41  ;;  %v795_v41 = vrot.slane %v576_v13, 7  ;;  %v822_v27 = vrot.slane %v594_v50, 7  ;;  %v5570_v18 = vrot.slane %v3403_v37, 2 }
  0xcb   : > { %v559_v48 = vmax.f32 %v506_v59, 0.0  ;;  %v2750_v59 = vsel %vm2748_vm5, %v2694_v20, 0  ;;  %v821_v39 = vrot.slane %v593_v8, 7  ;;  %v5571_v56 = vrot.slane %v3425_v17, 7 }
  0xcc   : > { %v542_v62 = vmax.f32 %v463_v2, 0.0  ;;  %2759 = vmatpush.bf16.msra.mxu1 %v2750_v59  ;;  %3048 = vmatpush.bf16.msra.mxu3 %v2750_v59  ;;  %v3559_v22 = vsel %vm1339_vm4, %v5570_v18, %v5569_v7  ;;  %v916_v20 = vsel %vm787_vm2, %v795_v41, 0.0  ;;  %v925_v58 = vsel %vm787_vm2, %v822_v27, 0.0 }
  0xcd   : > { %v3545_v25 = vmin.f32 %v559_v48, 6.0  ;;  %v3562_v13 = vsel %vm787_vm2, 0.0, %v821_v39  ;;  %v3567_v61 = vsel %vm787_vm2, %v5571_v56, %v795_v41  ;;  %v3586_v17 = vsel %vm787_vm2, %v821_v39, %v822_v27 }
  0xce   : > { %v3552_v29 = vmin.f32 %v542_v62, 6.0  ;;  %v3571_v62 = vperm.slane %v3308_v24, 0  ;;  %v3575_v35 = vmul.f32 %v3287_v3, %v3562_v13  ;;  %v3579_v37 = vmul.f32 %v3268_v55, %v3562_v13 }
  0xcf   : > { %v3583_v48 = vmul.f32 %v3283_v0, %v3562_v13  ;;  %v3590_v2 = vmul.f32 %v3268_v55, %v3567_v61  ;;  %v1009_v24 = vmul.f32 %v3268_v55, %v916_v20  ;;  %v3595_v16 = vmul.f32 %v3283_v0, %v3567_v61 }
  0xd0   : > { %5572 = vst [vmem:[#allocation24_spill] sm:$0xff] %v3575_v35  ;;  %v1251_v8 = vmul.f32 %v3283_v0, %v916_v20  ;;  %v941_v59 = vmul.f32 %v3287_v3, %v3567_v61  ;;  %v3602_v39 = vmul.f32 %v3314_v28, %v916_v20  ;;  %v3605_v41 = vmul.f32 %v3316_v30, %v916_v20 }
  0xd1   : > { %5573 = vst [vmem:[#allocation25_spill] sm:$0xff] %v3579_v37  ;;  %v5445_v7 = vrot.slane %v3590_v2, 1  ;;  %v1111_v18 = vrot.slane %v1009_v24, 1  ;;  %v5446_v56 = vrot.slane %v3595_v16, 2  ;;  %v3612_v50 = vmul.f32 %v3321_v33, %v916_v20 }
  0xd2   : > { %5574 = vst [vmem:[#allocation26_spill] sm:$0xff] %v3583_v48  ;;  %v1353_v4 = vrot.slane %v1251_v8, 2  ;;  %v3615_v60 = vmul.f32 %v3324_v34, %v916_v20  ;;  %v959_v35 = vmul.f32 %v3287_v3, %v3586_v17  ;;  %v3630_v20 = vmul.f32 %v3268_v55, %v3586_v17 }
  0xd3   : > { %5575 = vst [vmem:[#allocation27_spill] sm:$0xff] %v3590_v2  ;;  %v1112_v53 = vsel %vm1097_vm3, %v5445_v7, %v1111_v18  ;;  %v1036_v18 = vmul.f32 %v3268_v55, %v925_v58  ;;  %v3635_v7 = vmul.f32 %v3283_v0, %v3586_v17  ;;  %v3639_v27 = vmul.f32 %v3314_v28, %v925_v58 }
  0xd4   : > { %5576 = vst [vmem:[#allocation28_spill] sm:$0xff] %v3595_v16  ;;  %v1354_v24 = vsel %vm1339_vm4, %v5446_v56, %v1353_v4  ;;  %v1215_v57 = vadd.f32 %v1112_v53, %v941_v59  ;;  %v1278_v4 = vmul.f32 %v3283_v0, %v925_v58  ;;  %v3644_v56 = vmul.f32 %v3316_v30, %v925_v58 }
  0xd5   : > { %5577 = vst [vmem:[#allocation29_spill] sm:$0xff] %v3630_v20  ;;  %v3647_v8 = vmul.f32 %v3321_v33, %v925_v58  ;;  %v1156_v48 = vrot.slane %v1036_v18, 1  ;;  %v5453_v37 = vrot.slane %v3635_v7, 2  ;;  %v3655_v53 = vmul.f32 %v3324_v34, %v925_v58  ;;  %v507_v58 = vpop.f32.mrf.mxu2 }
  0xd6   : > { %5578 = vst [vmem:[#allocation30_spill] sm:$0xff] %v3635_v7  ;;  %v3649_v23 = vadd.f32 %v1354_v24, %v1215_v57  ;;  %v1398_v15 = vrot.slane %v1278_v4, 2  ;;  %v5582_v59 = vrot.slane %v3542_v9, 7  ;;  %v5583_v2 = vrot.slane %v3630_v20, 1 }
  0xd7   : > { %5579 = vst [vmem:[#allocation31_spill] sm:$0xff] %v3639_v27 }
  0xd8   : > { %5580 = vst [vmem:[#allocation32_spill] sm:$0xff] %v3644_v56  ;;  %v3660_v10 = vsel %vm787_vm2, 0.0, %v5582_v59  ;;  %v1157_v57 = vsel %vm1097_vm3, %v5583_v2, %v1156_v48  ;;  %v1399_v24 = vsel %vm1339_vm4, %v5453_v37, %v1398_v15  ;;  %v5587_v48 = vrot.slane %v3545_v25, 7  ;;  %v465_v2 = vpop.f32.mrf.mxu0 }
  0xd9   : > { %5581 = vst [vmem:[#allocation33_spill] sm:$0xff] %v3649_v23  ;;  %v3671_v4 = vmul.f32 %v3268_v55, %v3660_v10  ;;  %v1233_v16 = vadd.f32 %v1157_v57, %v959_v35  ;;  %v3675_v59 = vmul.f32 %v3287_v3, %v3660_v10  ;;  %v3679_v19 = vmul.f32 %v3283_v0, %v3660_v10 }
  0xda   : > { %v3684_v15 = vsel %vm787_vm2, 0.0, %v5587_v48  ;;  %v798_v48 = vrot.slane %v3552_v29, 7  ;;  %v508_v37 = vadd.f32 %v3266_v54, %v507_v58  ;;  %v466_v23 = vadd.f32 %v3266_v54, %v465_v2 }
  0xdb   : > { %5584 = vst [vmem:[#allocation34_spill] sm:$0xff] %v3671_v4  ;;  %v3690_v35 = vmul.f32 %v3268_v55, %v3684_v15  ;;  %v3694_v57 = vmul.f32 %v3283_v0, %v3684_v15  ;;  %v3700_v7 = vmul.f32 %v3287_v3, %v3684_v15  ;;  %v5593_v56 = vrot.slane %v3542_v9, 7 }
  0xdc   : > { %5585 = vst [vmem:[#allocation35_spill] sm:$0xff] %v3675_v59  ;;  %v3696_v59 = vadd.f32 %v1399_v24, %v1233_v16  ;;  %v917_v24 = vsel %vm787_vm2, %v798_v48, 0.0  ;;  %v1999_v29 = vadd.f32 %v3559_v22, %v3548_v12  ;;  %v2032_v9 = vmul.f32 %v3571_v62, %v3501_v46 }
  0xdd   : > { %5586 = vst [vmem:[#allocation36_spill] sm:$0xff] %v3679_v19  ;;  %v3711_v16 = vsel %vm787_vm2, %v5593_v56, %v798_v48  ;;  %v1012_v4 = vmul.f32 %v3268_v55, %v917_v24  ;;  %v1254_v56 = vmul.f32 %v3283_v0, %v917_v24  ;;  %v3732_v12 = vmul.f32 %v3316_v30, %v917_v24 }
  0xde   : > { %5588 = vst [vmem:[#allocation37_spill] sm:$0xff] %v3684_v15  ;;  %v3718_v58 = vmul.f32 %v3268_v55, %v3711_v16  ;;  %v3723_v2 = vmul.f32 %v3283_v0, %v3711_v16  ;;  %v3735_v22 = vmul.f32 %v3321_v33, %v917_v24  ;;  %v543_v14 = vmax.f32 %v466_v23, 0.0 }
  0xdf   : > { %5589 = vst [vmem:[#allocation38_spill] sm:$0xff] %v3690_v35  ;;  %v1116_v20 = vrot.slane %v1012_v4, 1  ;;  %v943_v35 = vmul.f32 %v3287_v3, %v3711_v16  ;;  %v1358_v19 = vrot.slane %v1254_v56, 2  ;;  %v2033_v56 = vmul.f32 %v3571_v62, %v3567_v61 }
  0xe0   : > { %5590 = vst [vmem:[#allocation39_spill] sm:$0xff] %v3694_v57  ;;  %v5467_v48 = vrot.slane %v3718_v58, 1  ;;  %v3740_v57 = vmul.f32 %v3324_v34, %v917_v24  ;;  %v3756_v15 = vmin.f32 %v543_v14, 6.0 }
  0xe1   : > { %5591 = vst [vmem:[#allocation40_spill] sm:$0xff] %v3696_v59  ;;  %v2065_v23 = vadd.f32 %v2033_v56, %v3492_v5 }
  0xe2   : > { %5592 = vst [vmem:[#allocation41_spill] sm:$0xff] %v3700_v7  ;;  %v560_v7 = vmax.f32 %v508_v37, 0.0  ;;  %v3729_v37 = vmul.f32 %v3314_v28, %v917_v24  ;;  %v1117_v27 = vsel %vm1097_vm3, %v5467_v48, %v1116_v20  ;;  %v5598_v24 = vrot.slane %v3723_v2, 2 }
  0xe3   : > { %5594 = vst [vmem:[#allocation42_spill] sm:$0xff] %v3718_v58  ;;  %v1217_v18 = vadd.f32 %v1117_v27, %v943_v35  ;;  %v2064_v58 = vadd.f32 %v2032_v9, %v1999_v29  ;;  %v2097_v20 = vmul.f32 %v3321_v33, %v3501_v46  ;;  %v5600_v27 = vrot.slane %v3545_v25, 7 }
  0xe4   : > { %5595 = vst [vmem:[#allocation43_spill] sm:$0xff] %v3723_v2  ;;  %v596_v4 = vmin.f32 %v560_v7, 6.0  ;;  %v1359_v52 = vsel %vm1339_vm4, %v5598_v24, %v1358_v19  ;;  %v2098_v7 = vmul.f32 %v3321_v33, %v3567_v61  ;;  %v2338_v19 = vmul.f32 %v3324_v34, %v3501_v46 }
  0xe5   : > { %5596 = vst [vmem:[#allocation44_spill] sm:$0xff] %v3729_v37  ;;  %v3760_v48 = vadd.f32 %v1359_v52, %v1217_v18  ;;  %v2339_v52 = vmul.f32 %v3324_v34, %v3567_v61  ;;  %v2193_v37 = vrot.slane %v2097_v20, 1  ;;  %v5606_v36 = vrot.slane %v3756_v15, 7 }
  0xe6   : > { %5597 = vst [vmem:[#allocation45_spill] sm:$0xff] %v3732_v12  ;;  %v825_v59 = vrot.slane %v596_v4, 7  ;;  %v2194_v11 = vrot.slane %v2098_v7, 1 }
  0xe7   : > { %5599 = vst [vmem:[#allocation46_spill] sm:$0xff] %v3760_v48 }
  0xe8   : > { %v3770_v35 = vsel %vm787_vm2, %v5600_v27, %v825_v59  ;;  %v926_v14 = vsel %vm787_vm2, %v825_v59, 0.0  ;;  %v2195_v7 = vsel %vm1097_vm3, %v2193_v37, %v2194_v11  ;;  %v3841_v37 = vld [vmem:[%s5418_s4] ss:$0 sm:$0xff] }
  0xe9   : > { %5601 = vst [vmem:[#allocation47_spill] sm:$0xff] %v3770_v35  ;;  %v961_v5 = vmul.f32 %v3287_v3, %v3770_v35  ;;  %v3780_v18 = vmul.f32 %v3268_v55, %v3770_v35  ;;  %v1039_v9 = vmul.f32 %v3268_v55, %v926_v14  ;;  %v3785_v25 = vmul.f32 %v3283_v0, %v3770_v35 }
  0xea   : > { %v1281_v59 = vmul.f32 %v3283_v0, %v926_v14  ;;  %v3789_v4 = vmul.f32 %v3314_v28, %v926_v14  ;;  %v3792_v24 = vmul.f32 %v3316_v30, %v926_v14  ;;  %v3795_v56 = vmul.f32 %v3321_v33, %v926_v14 }
  0xeb   : > { %5602 = vst [vmem:[#allocation48_spill] sm:$0xff] %v3780_v18  ;;  %v5475_v27 = vrot.slane %v3780_v18, 1  ;;  %v1161_v51 = vrot.slane %v1039_v9, 1  ;;  %v3800_v29 = vmul.f32 %v3324_v34, %v926_v14  ;;  %v3811_v9 = vsel %vm787_vm2, 0.0, %v5606_v36 }
  0xec   : > { %5603 = vst [vmem:[#allocation49_spill] sm:$0xff] %v3785_v25  ;;  %v1403_v48 = vrot.slane %v1281_v59, 2  ;;  %v5607_v59 = vrot.slane %v3785_v25, 2  ;;  %v3819_v20 = vmul.f32 %v3268_v55, %v3811_v9  ;;  %v3827_v36 = vmul.f32 %v3283_v0, %v3811_v9 }
  0xed   : > { %5604 = vst [vmem:[#allocation50_spill] sm:$0xff] %v3789_v4  ;;  %v1162_v35 = vsel %vm1097_vm3, %v5475_v27, %v1161_v51  ;;  %v510_v51 = vpop.f32.mrf.mxu2  ;;  %v3823_v27 = vmul.f32 %v3287_v3, %v3811_v9  ;;  %v2305_v12 = vadd.f32 %v2195_v7, %v2064_v58  ;;  %v2434_v25 = vrot.slane %v2338_v19, 2 }
  0xee   : > { %5605 = vst [vmem:[#allocation51_spill] sm:$0xff] %v3792_v24  ;;  %v1235_v14 = vadd.f32 %v1162_v35, %v961_v5  ;;  %v1404_v2 = vsel %vm1339_vm4, %v5607_v59, %v1403_v48  ;;  %v5611_v35 = vrot.slane %v3612_v50, 1  ;;  %v467_v5 = vpop.f32.mrf.mxu0  ;;  %v2435_v24 = vrot.slane %v2339_v52, 2 }
  0xef   : > { %5608 = vst [vmem:[#allocation52_spill] sm:$0xff] %v3819_v20  ;;  %v511_v4 = vadd.f32 %v3266_v54, %v510_v51  ;;  %v5613_v50 = vrot.slane %v3338_v43, 1  ;;  %v5614_v58 = vrot.slane %v3329_v38, 1  ;;  %v5616_v19 = vrot.slane %v3348_v47, 2 }
  0xf0   : > { %5609 = vst [vmem:[#allocation53_spill] sm:$0xff] %v3823_v27  ;;  %v2197_v48 = vsel %vm1097_vm3, %v2194_v11, %v5611_v35  ;;  %v3833_v59 = vadd.f32 %v1404_v2, %v1235_v14  ;;  %v468_v11 = vadd.f32 %v3266_v54, %v467_v5  ;;  %v1503_v14 = vmul.f32 %v3365_v63, %v3406_v40 }
  0xf1   : > { %5610 = vst [vmem:[#allocation54_spill] sm:$0xff] %v3827_v36  ;;  %v2306_v49 = vadd.f32 %v2197_v48, %v2065_v23  ;;  %v1145_v2 = vsel %vm1097_vm3, %v5614_v58, %v5613_v50  ;;  %v5615_v23 = vrot.slane %v3343_v45, 2  ;;  %v2436_v51 = vsel %vm1339_vm4, %v2434_v25, %v2435_v24 }
  0xf2   : > { %5612 = vst [vmem:[#allocation55_spill] sm:$0xff] %v3833_v59  ;;  %v5617_v7 = vrot.slane %v3615_v60, 2  ;;  %v561_v43 = vmax.f32 %v511_v4, 0.0  ;;  %v1228_v38 = vadd.f32 %v1145_v2, %v3372_v6  ;;  %v2546_v48 = vadd.f32 %v2436_v51, %v2305_v12 }
  0xf3   : > { %v1387_v52 = vsel %vm1339_vm4, %v5616_v19, %v5615_v23  ;;  %v544_v45 = vmax.f32 %v468_v11, 0.0  ;;  %v1504_v47 = vmul.f32 %v3365_v63, %v3461_v42  ;;  %v1577_v25 = vmul.f32 %v3314_v28, %v3406_v40 }
  0xf4   : > { %v2438_v35 = vsel %vm1339_vm4, %v2435_v24, %v5617_v7  ;;  %v3863_v50 = vmin.f32 %v561_v43, 6.0  ;;  %v1470_v58 = vadd.f32 %v1387_v52, %v1228_v38  ;;  %v1578_v60 = vmul.f32 %v3314_v28, %v3461_v42 }
  0xf5   : > { %v2547_v5 = vadd.f32 %v2438_v35, %v2306_v49  ;;  %v2582_v24 = vadd.f32 %v3841_v37, %v2546_v48  ;;  %v580_v6 = vmin.f32 %v544_v45, 6.0  ;;  %v1536_v49 = vadd.f32 %v1504_v47, %v3398_v32 }
  0xf6   : > { %v5480_v12 = vrot.slane %v3863_v50, 7  ;;  %v1535_v11 = vadd.f32 %v1503_v14, %v1470_v58  ;;  %v1691_v2 = vrot.slane %v1577_v25, 1  ;;  %v1692_v23 = vrot.slane %v1578_v60, 1 }
  0xf7   : > { %v2583_v4 = vadd.f32 %v3841_v37, %v2547_v5  ;;  %v2614_v19 = vmax.f32 %v2582_v24, 0.0  ;;  %v801_v51 = vrot.slane %v580_v6, 7  ;;  %v1818_v7 = vmul.f32 %v3316_v30, %v3406_v40 }
  0xf8   : > { %v3878_v35 = vsel %vm787_vm2, 0.0, %v5480_v12  ;;  %v1693_v43 = vsel %vm1097_vm3, %v1691_v2, %v1692_v23  ;;  %v5618_v32 = vrot.slane %v3483_v21, 1  ;;  %v1819_v14 = vmul.f32 %v3316_v30, %v3461_v42 }
  0xf9   : > { %v2615_v52 = vmax.f32 %v2583_v4, 0.0  ;;  %v2646_v48 = vmin.f32 %v2614_v19, 6.0  ;;  %v3888_v45 = vmul.f32 %v3287_v3, %v3878_v35  ;;  %v3892_v47 = vmul.f32 %v3268_v55, %v3878_v35 }
  0xfa   : > { %v1695_v38 = vsel %vm1097_vm3, %v1692_v23, %v5618_v32  ;;  %v3896_v58 = vmul.f32 %v3283_v0, %v3878_v35  ;;  %v5622_v21 = vrot.slane %v3756_v15, 7  ;;  %v918_v60 = vsel %vm787_vm2, %v801_v51, 0.0 }
  0xfb   : > { %v2647_v5 = vmin.f32 %v2615_v52, 6.0  ;;  %5619 = vst [vmem:[#allocation56_spill] sm:$0xff] %v3888_v45  ;;  %v1776_v24 = vadd.f32 %v1693_v43, %v1535_v11  ;;  %v1015_v15 = vmul.f32 %v3268_v55, %v918_v60  ;;  %v1257_v11 = vmul.f32 %v3283_v0, %v918_v60 }
  0xfc   : > { %5620 = vst [vmem:[#allocation57_spill] sm:$0xff] %v3892_v47  ;;  %v3901_v25 = vsel %vm787_vm2, %v5622_v21, %v801_v51  ;;  %v3921_v43 = vmul.f32 %v3314_v28, %v918_v60  ;;  %v3924_v32 = vmul.f32 %v3316_v30, %v918_v60  ;;  %v3931_v6 = vmul.f32 %v3324_v34, %v918_v60 }
  0xfd   : > { %5621 = vst [vmem:[#allocation58_spill] sm:$0xff] %v3896_v58  ;;  %v2678_v4 = vpack.c.bf16 %v2647_v5, %v2646_v48  ;;  %v945_v2 = vmul.f32 %v3287_v3, %v3901_v25  ;;  %v3909_v23 = vmul.f32 %v3268_v55, %v3901_v25  ;;  %v3915_v52 = vmul.f32 %v3283_v0, %v3901_v25 }
  0xfe   : > { %5625 = vst [vmem:[#allocation61_spill] sm:$0xff] %v3924_v32  ;;  %v3927_v48 = vmul.f32 %v3321_v33, %v918_v60  ;;  %v1121_v5 = vrot.slane %v1015_v15, 1  ;;  %v1363_v19 = vrot.slane %v1257_v11, 2  ;;  %v1777_v12 = vadd.f32 %v1695_v38, %v1536_v49  ;;  %v512_v60 = vpop.f32.mrf.mxu2 }
  0xff   : > { %5623 = vst [vmem:[#allocation59_spill] sm:$0xff] %v3909_v23  ;;  %3027 = vmatmul.msk.bf16.vlgmr.msra.gmra.mxu1 %vm2699_vm6, %v2678_v4  ;;  %v5487_v51 = vrot.slane %v3909_v23, 1  ;;  %v5486_v21 = vrot.slane %v3915_v52, 2  ;;  %v1932_v40 = vrot.slane %v1818_v7, 2  ;;  %v1933_v45 = vrot.slane %v1819_v14, 2 }
 0x100   : > { %5624 = vst [vmem:[#allocation60_spill] sm:$0xff] %v3915_v52  ;;  %v2050_v27 = vmul.f32 %v3571_v62, %v3562_v13  ;;  %v2051_v49 = vmul.f32 %v3571_v62, %v3586_v17  ;;  %v2124_v38 = vmul.f32 %v3321_v33, %v3562_v13  ;;  %v2366_v7 = vmul.f32 %v3324_v34, %v3586_v17 }
 0x101   : > { %v1122_v42 = vsel %vm1097_vm3, %v5487_v51, %v1121_v5  ;;  %v1364_v15 = vsel %vm1339_vm4, %v5486_v21, %v1363_v19  ;;  %v2125_v5 = vmul.f32 %v3321_v33, %v3586_v17  ;;  %v2365_v19 = vmul.f32 %v3324_v34, %v3562_v13 }
 0x102   : > { %v1219_v58 = vadd.f32 %v1122_v42, %v945_v2  ;;  %v470_v42 = vpop.f32.mrf.mxu0  ;;  %v1934_v2 = vsel %vm1339_vm4, %v1932_v40, %v1933_v45  ;;  %v5626_v21 = vrot.slane %v3486_v26, 2  ;;  %v513_v4 = vadd.f32 %v3266_v54, %v512_v60 }
 0x103   : > { %v2017_v11 = vadd.f32 %v1934_v2, %v1776_v24  ;;  %v2238_v47 = vrot.slane %v2124_v38, 1  ;;  %v2239_v36 = vrot.slane %v2125_v5, 1  ;;  %v2479_v52 = vrot.slane %v2365_v19, 2 }
 0x104   : > { %v3955_v14 = vadd.f32 %v1364_v15, %v1219_v58  ;;  %v1936_v51 = vsel %vm1339_vm4, %v1933_v45, %v5626_v21  ;;  %v2480_v20 = vrot.slane %v2366_v7, 2  ;;  %v562_v23 = vmax.f32 %v513_v4, 0.0 }
 0x105   : > { %v2018_v18 = vadd.f32 %v1936_v51, %v1777_v12  ;;  %v471_v59 = vadd.f32 %v3266_v54, %v470_v42  ;;  %v2082_v32 = vadd.f32 %v2050_v27, %v2017_v11  ;;  %v2240_v15 = vsel %vm1097_vm3, %v2238_v47, %v2239_v36 }
 0x106   : > { %v5627_v40 = vrot.slane %v3647_v8, 1  ;;  %v2481_v45 = vsel %vm1339_vm4, %v2479_v52, %v2480_v20  ;;  %v5628_v24 = vrot.slane %v3655_v53, 2  ;;  %v598_v51 = vmin.f32 %v562_v23, 6.0 }
 0x107   : > { %v2083_v58 = vadd.f32 %v2051_v49, %v2018_v18  ;;  %v545_v21 = vmax.f32 %v471_v59, 0.0  ;;  %v2323_v60 = vadd.f32 %v2240_v15, %v2082_v32  ;;  %v1454_v54 = vadd.f32 %v3453_v31, %v3450_v1 }
 0x108   : > { %v2242_v26 = vsel %vm1097_vm3, %v2239_v36, %v5627_v40  ;;  %v2483_v12 = vsel %vm1339_vm4, %v2480_v20, %v5628_v24  ;;  %v1487_v18 = vmul.f32 %v3365_v63, %v3501_v46  ;;  %v828_v27 = vrot.slane %v598_v51, 7 }
 0x109   : > { %v2324_v4 = vadd.f32 %v2242_v26, %v2083_v58  ;;  %v3975_v8 = vmin.f32 %v545_v21, 6.0  ;;  %v1488_v36 = vmul.f32 %v3365_v63, %v3567_v61  ;;  %v1553_v53 = vmul.f32 %v3314_v28, %v3501_v46 }
 0x10a   : > { %v2564_v20 = vadd.f32 %v2481_v45, %v2323_v60  ;;  %v1519_v59 = vadd.f32 %v1487_v18, %v1454_v54  ;;  %v1554_v23 = vmul.f32 %v3314_v28, %v3567_v61  ;;  %v5629_v1 = vrot.slane %v3863_v50, 7 }
 0x10b   : > { %v2565_v47 = vadd.f32 %v2483_v12, %v2324_v4  ;;  %v927_v52 = vsel %vm787_vm2, %v828_v27, 0.0  ;;  %v803_v32 = vrot.slane %v3975_v8, 7  ;;  %v1520_v11 = vadd.f32 %v1488_v36, %v3463_v44 }
 0x10c   : > { %v3986_v31 = vsel %vm787_vm2, %v5629_v1, %v828_v27  ;;  %v2600_v49 = vadd.f32 %v3841_v37, %v2564_v20  ;;  %v1042_v50 = vmul.f32 %v3268_v55, %v927_v52  ;;  %v1284_v42 = vmul.f32 %v3283_v0, %v927_v52  ;;  %v5640_v1 = vld [vmem:[#allocation16_spill] sm:$0xff] }
 0x10d   : > { %v2601_v38 = vadd.f32 %v3841_v37, %v2565_v47  ;;  %v963_v5 = vmul.f32 %v3287_v3, %v3986_v31  ;;  %v3997_v19 = vmul.f32 %v3268_v55, %v3986_v31  ;;  %v4002_v7 = vmul.f32 %v3283_v0, %v3986_v31 }
 0x10e   : > { %v4006_v44 = vmul.f32 %v3314_v28, %v927_v52  ;;  %v2632_v2 = vmax.f32 %v2600_v49, 0.0  ;;  %v4010_v40 = vmul.f32 %v3316_v30, %v927_v52  ;;  %v1166_v26 = vrot.slane %v1042_v50, 1 }
 0x10f   : > { %5630 = vst [vmem:[#allocation62_spill] sm:$0xff] %v3997_v19  ;;  %v2633_v58 = vmax.f32 %v2601_v38, 0.0  ;;  %v5495_v15 = vrot.slane %v3997_v19, 1  ;;  %v5494_v45 = vrot.slane %v4002_v7, 2  ;;  %v1408_v24 = vrot.slane %v1284_v42, 2 }
 0x110   : > { %5631 = vst [vmem:[#allocation63_spill] sm:$0xff] %v4002_v7  ;;  %v2664_v51 = vmin.f32 %v2632_v2, 6.0  ;;  %v4016_v4 = vmul.f32 %v3321_v33, %v927_v52  ;;  %v4025_v27 = vmul.f32 %v3324_v34, %v927_v52  ;;  %v4030_v36 = vsel %vm787_vm2, 0.0, %v803_v32 }
 0x111   : > { %v2665_v21 = vmin.f32 %v2633_v58, 6.0  ;;  %v1167_v54 = vsel %vm1097_vm3, %v5495_v15, %v1166_v26  ;;  %v1409_v18 = vsel %vm1339_vm4, %v5494_v45, %v1408_v24  ;;  %v4035_v49 = vmul.f32 %v3287_v3, %v4030_v36  ;;  %v515_v45 = vpop.f32.mrf.mxu2  ;;  %v472_v15 = vpop.f32.mrf.mxu0 }
 0x112   : > { %v1237_v47 = vadd.f32 %v1167_v54, %v963_v5  ;;  %v4040_v50 = vmul.f32 %v3268_v55, %v4030_v36  ;;  %v4044_v52 = vmul.f32 %v3283_v0, %v4030_v36  ;;  %v1651_v42 = vrot.slane %v1553_v53, 1 }
 0x113   : > { %v2687_v20 = vpack.c.bf16 %v2665_v21, %v2664_v51  ;;  %5632 = vst [vmem:[#allocation64_spill] sm:$0xff] %v4035_v49  ;;  %v1652_v2 = vrot.slane %v1554_v23, 1  ;;  %v1794_v58 = vmul.f32 %v3316_v30, %v3501_v46  ;;  %v1795_v26 = vmul.f32 %v3316_v30, %v3567_v61 }
 0x114   : > { %5633 = vst [vmem:[#allocation65_spill] sm:$0xff] %v4040_v50  ;;  %v4047_v5 = vadd.f32 %v1409_v18, %v1237_v47  ;;  %v2034_v21 = vmul.f32 %v3571_v62, %v3660_v10  ;;  %v2035_v53 = vmul.f32 %v3571_v62, %v3711_v16  ;;  %v5636_v23 = vrot.slane %v3602_v39, 1 }
 0x115   : > { %5634 = vst [vmem:[#allocation66_spill] sm:$0xff] %v4044_v52  ;;  %3036 = vmatmul.msk.bf16.vlgmr.msra.gmra.mxu3 %vm2699_vm6, %v2687_v20  ;;  %v1653_v54 = vsel %vm1097_vm3, %v1651_v42, %v1652_v2  ;;  %v1892_v46 = vrot.slane %v1794_v58, 2  ;;  %v1893_v20 = vrot.slane %v1795_v26, 2  ;;  %v2100_v24 = vmul.f32 %v3321_v33, %v3660_v10 }
 0x116   : > { %5635 = vst [vmem:[#allocation67_spill] sm:$0xff] %v4047_v5  ;;  %v1655_v18 = vsel %vm1097_vm3, %v1652_v2, %v5636_v23  ;;  %v1760_v47 = vadd.f32 %v1653_v54, %v1519_v59  ;;  %v2101_v51 = vmul.f32 %v3321_v33, %v3711_v16  ;;  %v5637_v42 = vrot.slane %v3605_v41, 2 }
 0x117   : > { %v1761_v61 = vadd.f32 %v1655_v18, %v1520_v11  ;;  %v1894_v60 = vsel %vm1339_vm4, %v1892_v46, %v1893_v20  ;;  %v2341_v2 = vmul.f32 %v3324_v34, %v3660_v10  ;;  %v2342_v59 = vmul.f32 %v3324_v34, %v3711_v16  ;;  %v4078_v46 = vld [vmem:[%s5416_s2] ss:$0 sm:$0xff] }
 0x118   : > { %v1896_v39 = vsel %vm1339_vm4, %v1893_v20, %v5637_v42  ;;  %v2001_v11 = vadd.f32 %v1894_v60, %v1760_v47  ;;  %v2198_v26 = vrot.slane %v2100_v24, 1  ;;  %v2199_v54 = vrot.slane %v2101_v51, 1 }
 0x119   : > { %v2002_v58 = vadd.f32 %v1896_v39, %v1761_v61  ;;  %v2439_v23 = vrot.slane %v2341_v2, 2  ;;  %v2440_v18 = vrot.slane %v2342_v59, 2  ;;  %v516_v41 = vadd.f32 %v4078_v46, %v515_v45 }
 0x11a   : > { %v473_v20 = vadd.f32 %v4078_v46, %v472_v15  ;;  %v2066_v42 = vadd.f32 %v2034_v21, %v2001_v11  ;;  %v2200_v38 = vsel %vm1097_vm3, %v2198_v26, %v2199_v54  ;;  %v5638_v60 = vrot.slane %v3735_v22, 1  ;;  %v5642_v21 = vld [vmem:[#allocation12_spill] sm:$0xff]  ;;  %v5646_v26 = vld [vmem:[#allocation13_spill] sm:$0xff] }
 0x11b   : > { %v2067_v12 = vadd.f32 %v2035_v53, %v2002_v58  ;;  %v2441_v51 = vsel %vm1339_vm4, %v2439_v23, %v2440_v18  ;;  %v5639_v47 = vrot.slane %v3740_v57, 2  ;;  %v563_v39 = vmax.f32 %v516_v41, 0.0  ;;  %v5644_v58 = vld [vmem:[#allocation17_spill] sm:$0xff] }
 0x11c   : > { %v2202_v24 = vsel %vm1097_vm3, %v2199_v54, %v5638_v60  ;;  %v546_v2 = vmax.f32 %v473_v20, 0.0  ;;  %v2307_v59 = vadd.f32 %v2200_v38, %v2066_v42  ;;  %v5641_v15 = vrot.slane %v5640_v1, 1 }
 0x11d   : > { %v2443_v61 = vsel %vm1339_vm4, %v2440_v18, %v5639_v47  ;;  %v2308_v45 = vadd.f32 %v2202_v24, %v2067_v12  ;;  %v5643_v53 = vrot.slane %v5642_v21, 1  ;;  %v5645_v22 = vrot.slane %v5644_v58, 2  ;;  %v5648_v18 = vld [vmem:[#allocation14_spill] sm:$0xff] }
 0x11e   : > { %v5647_v54 = vrot.slane %v5646_v26, 2  ;;  %v4100_v60 = vmin.f32 %v563_v39, 6.0  ;;  %v582_v57 = vmin.f32 %v546_v2, 6.0  ;;  %v1505_v12 = vmul.f32 %v3365_v63, %v3562_v13 }
 0x11f   : > { %v1150_v11 = vsel %vm1097_vm3, %v5643_v53, %v5641_v15  ;;  %v2548_v38 = vadd.f32 %v2441_v51, %v2307_v59  ;;  %v2549_v1 = vadd.f32 %v2443_v61, %v2308_v45  ;;  %v1506_v20 = vmul.f32 %v3365_v63, %v3586_v17  ;;  %v5649_v53 = vld [vmem:[#allocation22_spill] sm:$0xff] }
 0x120   : > { %v1392_v23 = vsel %vm1339_vm4, %v5647_v54, %v5645_v22  ;;  %v1230_v41 = vadd.f32 %v1150_v11, %v5648_v18  ;;  %v1580_v42 = vmul.f32 %v3314_v28, %v3562_v13  ;;  %v5496_v24 = vrot.slane %v4100_v60, 7 }
 0x121   : > { %v804_v47 = vrot.slane %v582_v57, 7  ;;  %v1581_v39 = vmul.f32 %v3314_v28, %v3586_v17  ;;  %v2584_v2 = vadd.f32 %v3841_v37, %v2548_v38  ;;  %v2585_v21 = vadd.f32 %v3841_v37, %v2549_v1 }
 0x122   : > { %v1472_v15 = vadd.f32 %v1392_v23, %v1230_v41  ;;  %v1538_v51 = vadd.f32 %v1506_v20, %v5649_v53  ;;  %v1696_v61 = vrot.slane %v1580_v42, 1  ;;  %v4118_v59 = vsel %vm787_vm2, 0.0, %v5496_v24 }
 0x123   : > { %v4123_v45 = vsel %vm787_vm2, %v803_v32, %v804_v47  ;;  %v919_v11 = vsel %vm787_vm2, %v804_v47, 0.0  ;;  %v2616_v22 = vmax.f32 %v2584_v2, 0.0  ;;  %v2617_v26 = vmax.f32 %v2585_v21, 0.0 }
 0x124   : > { %v1537_v58 = vadd.f32 %v1505_v12, %v1472_v15  ;;  %v4128_v54 = vmul.f32 %v3287_v3, %v4118_v59  ;;  %v4132_v23 = vmul.f32 %v3268_v55, %v4118_v59  ;;  %v4136_v57 = vmul.f32 %v3283_v0, %v4118_v59 }
 0x125   : > { %v947_v8 = vmul.f32 %v3287_v3, %v4123_v45  ;;  %v4142_v32 = vmul.f32 %v3268_v55, %v4123_v45  ;;  %v1018_v18 = vmul.f32 %v3268_v55, %v919_v11  ;;  %v2648_v41 = vmin.f32 %v2616_v22, 6.0 }
 0x126   : > { %5650 = vst [vmem:[#allocation16_spill] sm:$0xff] %v4128_v54  ;;  %v2649_v12 = vmin.f32 %v2617_v26, 6.0  ;;  %v4148_v1 = vmul.f32 %v3283_v0, %v4123_v45  ;;  %v1260_v15 = vmul.f32 %v3283_v0, %v919_v11  ;;  %v4155_v53 = vmul.f32 %v3314_v28, %v919_v11 }
 0x127   : > { %5651 = vst [vmem:[#allocation12_spill] sm:$0xff] %v4132_v23  ;;  %v5498_v42 = vrot.slane %v4142_v32, 1  ;;  %v1126_v47 = vrot.slane %v1018_v18, 1  ;;  %v4158_v22 = vmul.f32 %v3316_v30, %v919_v11  ;;  %v4164_v20 = vmul.f32 %v3321_v33, %v919_v11 }
 0x128   : > { %5652 = vst [vmem:[#allocation17_spill] sm:$0xff] %v4136_v57  ;;  %v2679_v2 = vpack.c.bf16 %v2649_v12, %v2648_v41  ;;  %v1368_v38 = vrot.slane %v1260_v15, 2  ;;  %v4167_v18 = vmul.f32 %v3324_v34, %v919_v11  ;;  %v1697_v21 = vrot.slane %v1581_v39, 1  ;;  %v517_v12 = vpop.f32.mrf.mxu2  ;;  %v5660_v15 = vld [vmem:[#allocation37_spill] sm:$0xff] }
 0x129   : > { %5653 = vst [vmem:[#allocation13_spill] sm:$0xff] %v4142_v32  ;;  %v1127_v26 = vsel %vm1097_vm3, %v5498_v42, %v1126_v47  ;;  %v5656_v57 = vrot.slane %v4148_v1, 2  ;;  %v1821_v11 = vmul.f32 %v3316_v30, %v3562_v13  ;;  %v1822_v39 = vmul.f32 %v3316_v30, %v3586_v17 }
 0x12a   : > { %5654 = vst [vmem:[#allocation14_spill] sm:$0xff] %v4148_v1  ;;  %3028 = vmatmul.msk.bf16.gmra.mxu1 %vm2699_vm6, %v2679_v2  ;;  %v1221_v41 = vadd.f32 %v1127_v26, %v947_v8  ;;  %v1698_v8 = vsel %vm1097_vm3, %v1696_v61, %v1697_v21  ;;  %v5658_v2 = vld [vmem:[#allocation31_spill] sm:$0xff]  ;;  %v2052_v52 = vmul.f32 %v3571_v62, %v5660_v15  ;;  %v5664_v7 = vrot.slane %v3795_v56, 1 }
 0x12b   : > { %5655 = vst [vmem:[#allocation22_spill] sm:$0xff] %v4158_v22  ;;  %v1369_v54 = vsel %vm1339_vm4, %v5656_v57, %v1368_v38  ;;  %v5659_v26 = vrot.slane %v5658_v2, 1  ;;  %v475_v57 = vpop.f32.mrf.mxu0  ;;  %v1778_v38 = vadd.f32 %v1698_v8, %v1537_v58  ;;  %v1937_v23 = vrot.slane %v1821_v11, 2  ;;  %v5662_v8 = vld [vmem:[#allocation32_spill] sm:$0xff] }
 0x12c   : > { %v4179_v42 = vadd.f32 %v1369_v54, %v1221_v41  ;;  %v1938_v13 = vrot.slane %v1822_v39, 2  ;;  %v5661_v54 = vld [vmem:[#allocation47_spill] sm:$0xff]  ;;  %v2127_v61 = vmul.f32 %v3321_v33, %v5660_v15  ;;  %v2368_v17 = vmul.f32 %v3324_v34, %v5660_v15 }
 0x12d   : > { %v1700_v24 = vsel %vm1097_vm3, %v1697_v21, %v5659_v26  ;;  %v2053_v41 = vmul.f32 %v3571_v62, %v5661_v54  ;;  %v2128_v21 = vmul.f32 %v3321_v33, %v5661_v54  ;;  %v476_v58 = vadd.f32 %v4078_v46, %v475_v57 }
 0x12e   : > { %5657 = vst [vmem:[#allocation68_spill] sm:$0xff] %v4179_v42  ;;  %v1779_v47 = vadd.f32 %v1700_v24, %v1538_v51  ;;  %v2369_v24 = vmul.f32 %v3324_v34, %v5661_v54  ;;  %v518_v51 = vadd.f32 %v4078_v46, %v517_v12  ;;  %v1939_v11 = vsel %vm1339_vm4, %v1937_v23, %v1938_v13 }
 0x12f   : > { %v5663_v2 = vrot.slane %v5662_v8, 2  ;;  %v2243_v39 = vrot.slane %v2127_v61, 1  ;;  %v2244_v42 = vrot.slane %v2128_v21, 1  ;;  %v2019_v1 = vadd.f32 %v1939_v11, %v1778_v38  ;;  %v5666_v21 = vld [vmem:[#allocation27_spill] sm:$0xff] }
 0x130   : > { %v2484_v50 = vrot.slane %v2368_v17, 2  ;;  %v2485_v32 = vrot.slane %v2369_v24, 2  ;;  %v564_v19 = vmax.f32 %v518_v51, 0.0  ;;  %v547_v57 = vmax.f32 %v476_v58, 0.0  ;;  %v5668_v24 = vld [vmem:[#allocation21_spill] sm:$0xff]  ;;  %v5672_v51 = vld [vmem:[#allocation23_spill] sm:$0xff] }
 0x131   : > { %v1941_v26 = vsel %vm1339_vm4, %v1938_v13, %v5663_v2  ;;  %v2245_v5 = vsel %vm1097_vm3, %v2243_v39, %v2244_v42  ;;  %v2247_v12 = vsel %vm1097_vm3, %v2244_v42, %v5664_v7  ;;  %v2084_v22 = vadd.f32 %v2052_v52, %v2019_v1  ;;  %v5670_v7 = vld [vmem:[#allocation28_spill] sm:$0xff] }
 0x132   : > { %v2020_v49 = vadd.f32 %v1941_v26, %v1779_v47  ;;  %v2486_v8 = vsel %vm1339_vm4, %v2484_v50, %v2485_v32  ;;  %v5665_v13 = vrot.slane %v3800_v29, 2  ;;  %v600_v38 = vmin.f32 %v564_v19, 6.0  ;;  %v5674_v29 = vld [vmem:[#allocation20_spill] sm:$0xff] }
 0x133   : > { %v4213_v47 = vmin.f32 %v547_v57, 6.0  ;;  %v5667_v17 = vrot.slane %v5666_v21, 1  ;;  %v5669_v11 = vrot.slane %v5668_v24, 1  ;;  %v5671_v42 = vrot.slane %v5670_v7, 2  ;;  %v5676_v21 = vld [vmem:[#allocation33_spill] sm:$0xff] }
 0x134   : > { %v2085_v23 = vadd.f32 %v2053_v41, %v2020_v49  ;;  %v2488_v61 = vsel %vm1339_vm4, %v2485_v32, %v5665_v13  ;;  %v5673_v52 = vrot.slane %v5672_v51, 2  ;;  %v2325_v50 = vadd.f32 %v2245_v5, %v2084_v22 }
 0x135   : > { %v1110_v56 = vsel %vm1097_vm3, %v5669_v11, %v5667_v17  ;;  %v1489_v19 = vmul.f32 %v3365_v63, %v3660_v10  ;;  %v831_v32 = vrot.slane %v600_v38, 7  ;;  %v5509_v58 = vrot.slane %v4213_v47, 7 }
 0x136   : > { %v1352_v49 = vsel %vm1339_vm4, %v5673_v52, %v5671_v42  ;;  %v2326_v1 = vadd.f32 %v2247_v12, %v2085_v23  ;;  %v1214_v41 = vadd.f32 %v1110_v56, %v5674_v29  ;;  %v1490_v2 = vmul.f32 %v3365_v63, %v3711_v16 }
 0x137   : > { %v1556_v26 = vmul.f32 %v3314_v28, %v3660_v10  ;;  %v2566_v39 = vadd.f32 %v2486_v8, %v2325_v50  ;;  %v1557_v5 = vmul.f32 %v3314_v28, %v3711_v16  ;;  %v5675_v22 = vrot.slane %v4100_v60, 7 }
 0x138   : > { %v2567_v57 = vadd.f32 %v2488_v61, %v2326_v1  ;;  %v1456_v13 = vadd.f32 %v1352_v49, %v1214_v41  ;;  %v928_v23 = vsel %vm787_vm2, %v831_v32, 0.0  ;;  %v4244_v38 = vsel %vm787_vm2, 0.0, %v5509_v58 }
 0x139   : > { %v4238_v12 = vsel %vm787_vm2, %v5675_v22, %v831_v32  ;;  %v1522_v17 = vadd.f32 %v1490_v2, %v5676_v21  ;;  %v2602_v8 = vadd.f32 %v3841_v37, %v2566_v39  ;;  %v1045_v11 = vmul.f32 %v3268_v55, %v928_v23 }
 0x13a   : > { %v2603_v61 = vadd.f32 %v3841_v37, %v2567_v57  ;;  %v965_v24 = vmul.f32 %v3287_v3, %v4238_v12  ;;  %v4253_v60 = vmul.f32 %v3268_v55, %v4238_v12  ;;  %v4258_v56 = vmul.f32 %v3283_v0, %v4238_v12 }
 0x13b   : > { %v1287_v7 = vmul.f32 %v3283_v0, %v928_v23  ;;  %v4262_v42 = vmul.f32 %v3314_v28, %v928_v23  ;;  %v2634_v51 = vmax.f32 %v2602_v8, 0.0  ;;  %v4266_v50 = vmul.f32 %v3316_v30, %v928_v23 }
 0x13c   : > { %5677 = vst [vmem:[#allocation31_spill] sm:$0xff] %v4253_v60  ;;  %v2635_v52 = vmax.f32 %v2603_v61, 0.0  ;;  %v5508_v49 = vrot.slane %v4253_v60, 1  ;;  %v1171_v1 = vrot.slane %v1045_v11, 1  ;;  %v5507_v29 = vrot.slane %v4258_v56, 2 }
 0x13d   : > { %5678 = vst [vmem:[#allocation37_spill] sm:$0xff] %v4258_v56  ;;  %v1413_v41 = vrot.slane %v1287_v7, 2  ;;  %v2666_v2 = vmin.f32 %v2634_v51, 6.0  ;;  %v4272_v22 = vmul.f32 %v3321_v33, %v928_v23  ;;  %v4281_v61 = vmul.f32 %v3324_v34, %v928_v23 }
 0x13e   : > { %5679 = vst [vmem:[#allocation47_spill] sm:$0xff] %v4262_v42  ;;  %v2667_v39 = vmin.f32 %v2635_v52, 6.0  ;;  %v1172_v21 = vsel %vm1097_vm3, %v5508_v49, %v1171_v1  ;;  %v4285_v11 = vmul.f32 %v3287_v3, %v4244_v38  ;;  %v4290_v57 = vmul.f32 %v3268_v55, %v4244_v38 }
 0x13f   : > { %5680 = vst [vmem:[#allocation32_spill] sm:$0xff] %v4266_v50  ;;  %v1414_v8 = vsel %vm1339_vm4, %v5507_v29, %v1413_v41  ;;  %v1239_v51 = vadd.f32 %v1172_v21, %v965_v24  ;;  %v4295_v41 = vmul.f32 %v3283_v0, %v4244_v38  ;;  %v1521_v23 = vadd.f32 %v1489_v19, %v1456_v13  ;;  %v477_v21 = vpop.f32.mrf.mxu0 }
 0x140   : > { %5681 = vst [vmem:[#allocation27_spill] sm:$0xff] %v4285_v11  ;;  %v2688_v7 = vpack.c.bf16 %v2667_v39, %v2666_v2  ;;  %v1656_v29 = vrot.slane %v1556_v26, 1  ;;  %v1657_v2 = vrot.slane %v1557_v5, 1  ;;  %v1797_v39 = vmul.f32 %v3316_v30, %v3660_v10  ;;  %v520_v26 = vpop.f32.mrf.mxu2 }
 0x141   : > { %5682 = vst [vmem:[#allocation21_spill] sm:$0xff] %v4290_v57  ;;  %v4298_v49 = vadd.f32 %v1414_v8, %v1239_v51  ;;  %v1798_v32 = vmul.f32 %v3316_v30, %v3711_v16  ;;  %v2036_v1 = vmul.f32 %v3571_v62, %v3811_v9  ;;  %v2037_v19 = vmul.f32 %v3571_v62, %v3901_v25  ;;  %v5685_v8 = vld [vmem:[#allocation44_spill] sm:$0xff] }
 0x142   : > { %5683 = vst [vmem:[#allocation28_spill] sm:$0xff] %v4295_v41  ;;  %3037 = vmatmul.msk.bf16.gmra.mxu3 %vm2699_vm6, %v2688_v7  ;;  %v1658_v13 = vsel %vm1097_vm3, %v1656_v29, %v1657_v2  ;;  %v5686_v7 = vrot.slane %v5685_v8, 1  ;;  %v1897_v51 = vrot.slane %v1797_v39, 2  ;;  %v2103_v10 = vmul.f32 %v3321_v33, %v3811_v9  ;;  %v5687_v8 = vld [vmem:[#allocation45_spill] sm:$0xff] }
 0x143   : > { %5684 = vst [vmem:[#allocation23_spill] sm:$0xff] %v4298_v49  ;;  %v1762_v24 = vadd.f32 %v1658_v13, %v1521_v23  ;;  %v1898_v52 = vrot.slane %v1798_v32, 2  ;;  %v2104_v58 = vmul.f32 %v3321_v33, %v3901_v25  ;;  %v2344_v41 = vmul.f32 %v3324_v34, %v3811_v9 }
 0x144   : > { %v1660_v5 = vsel %vm1097_vm3, %v1657_v2, %v5686_v7  ;;  %v2203_v11 = vrot.slane %v2103_v10, 1  ;;  %v2345_v29 = vmul.f32 %v3324_v34, %v3901_v25  ;;  %v521_v2 = vadd.f32 %v4078_v46, %v520_v26 }
 0x145   : > { %v1763_v16 = vadd.f32 %v1660_v5, %v1522_v17  ;;  %v1899_v39 = vsel %vm1339_vm4, %v1897_v51, %v1898_v52  ;;  %v5688_v7 = vrot.slane %v5687_v8, 2  ;;  %v2204_v17 = vrot.slane %v2104_v58, 1 }
 0x146   : > { %v478_v32 = vadd.f32 %v4078_v46, %v477_v21  ;;  %v2003_v13 = vadd.f32 %v1899_v39, %v1762_v24  ;;  %v2444_v10 = vrot.slane %v2344_v41, 2  ;;  %v2445_v57 = vrot.slane %v2345_v29, 2  ;;  %v5691_v21 = vld [vmem:[#allocation29_spill] sm:$0xff]  ;;  %v5697_v39 = vld [vmem:[#allocation26_spill] sm:$0xff] }
 0x147   : > { %v1901_v23 = vsel %vm1339_vm4, %v1898_v52, %v5688_v7  ;;  %v2205_v49 = vsel %vm1097_vm3, %v2203_v11, %v2204_v17  ;;  %v5689_v56 = vrot.slane %v3927_v48, 1  ;;  %v565_v26 = vmax.f32 %v521_v2, 0.0  ;;  %v5693_v11 = vld [vmem:[#allocation25_spill] sm:$0xff] }
 0x148   : > { %v2004_v5 = vadd.f32 %v1901_v23, %v1763_v16  ;;  %v548_v50 = vmax.f32 %v478_v32, 0.0  ;;  %v2068_v51 = vadd.f32 %v2036_v1, %v2003_v13  ;;  %v2446_v8 = vsel %vm1339_vm4, %v2444_v10, %v2445_v57 }
 0x149   : > { %v2207_v60 = vsel %vm1097_vm3, %v2204_v17, %v5689_v56  ;;  %v5690_v58 = vrot.slane %v3931_v6, 2  ;;  %v4336_v24 = vmin.f32 %v565_v26, 6.0  ;;  %v5692_v16 = vrot.slane %v5691_v21, 1  ;;  %v5695_v56 = vld [vmem:[#allocation30_spill] sm:$0xff]  ;;  %v5699_v6 = vld [vmem:[#allocation24_spill] sm:$0xff] }
 0x14a   : > { %v2069_v42 = vadd.f32 %v2037_v19, %v2004_v5  ;;  %v584_v41 = vmin.f32 %v548_v50, 6.0  ;;  %v5694_v29 = vrot.slane %v5693_v11, 1  ;;  %v5696_v2 = vrot.slane %v5695_v56, 2  ;;  %v5701_v21 = vld [vmem:[#allocation40_spill] sm:$0xff] }
 0x14b   : > { %v2448_v52 = vsel %vm1339_vm4, %v2445_v57, %v5690_v58  ;;  %v5698_v1 = vrot.slane %v5697_v39, 2  ;;  %v2309_v7 = vadd.f32 %v2205_v49, %v2068_v51  ;;  %v1507_v57 = vmul.f32 %v3365_v63, %v5660_v15 }
 0x14c   : > { %v1155_v48 = vsel %vm1097_vm3, %v5694_v29, %v5692_v16  ;;  %v2310_v23 = vadd.f32 %v2207_v60, %v2069_v42  ;;  %v5516_v50 = vrot.slane %v4336_v24, 7  ;;  %v807_v32 = vrot.slane %v584_v41, 7 }
 0x14d   : > { %v1397_v19 = vsel %vm1339_vm4, %v5698_v1, %v5696_v2  ;;  %v1232_v17 = vadd.f32 %v1155_v48, %v5699_v6  ;;  %v1508_v13 = vmul.f32 %v3365_v63, %v5661_v54  ;;  %v1583_v5 = vmul.f32 %v3314_v28, %v5660_v15 }
 0x14e   : > { %v2550_v10 = vadd.f32 %v2446_v8, %v2309_v7  ;;  %v2551_v26 = vadd.f32 %v2448_v52, %v2310_v23  ;;  %v1584_v60 = vmul.f32 %v3314_v28, %v5661_v54  ;;  %v4361_v42 = vsel %vm787_vm2, 0.0, %v5516_v50 }
 0x14f   : > { %v1474_v58 = vadd.f32 %v1397_v19, %v1232_v17  ;;  %v5700_v49 = vrot.slane %v4213_v47, 7  ;;  %v920_v41 = vsel %vm787_vm2, %v807_v32, 0.0  ;;  %v1540_v16 = vadd.f32 %v1508_v13, %v5701_v21 }
 0x150   : > { %v2586_v8 = vadd.f32 %v3841_v37, %v2550_v10  ;;  %v2587_v52 = vadd.f32 %v3841_v37, %v2551_v26  ;;  %v4374_v11 = vmul.f32 %v3268_v55, %v4361_v42  ;;  %v1021_v48 = vmul.f32 %v3268_v55, %v920_v41 }
 0x151   : > { %v4366_v51 = vsel %vm787_vm2, %v5700_v49, %v807_v32  ;;  %v1263_v2 = vmul.f32 %v3283_v0, %v920_v41  ;;  %v4389_v19 = vmul.f32 %v3314_v28, %v920_v41  ;;  %v4392_v7 = vmul.f32 %v3316_v30, %v920_v41 }
 0x152   : > { %v949_v29 = vmul.f32 %v3287_v3, %v4366_v51  ;;  %v4380_v47 = vmul.f32 %v3268_v55, %v4366_v51  ;;  %v4385_v56 = vmul.f32 %v3283_v0, %v4366_v51  ;;  %v2618_v39 = vmax.f32 %v2586_v8, 0.0 }
 0x153   : > { %v2619_v1 = vmax.f32 %v2587_v52, 0.0  ;;  %5704 = vst [vmem:[#allocation44_spill] sm:$0xff] %v4389_v19  ;;  %v1131_v6 = vrot.slane %v1021_v48, 1  ;;  %v1373_v32 = vrot.slane %v1263_v2, 2  ;;  %v4405_v52 = vmul.f32 %v3321_v33, %v920_v41 }
 0x154   : > { %5702 = vst [vmem:[#allocation20_spill] sm:$0xff] %v4380_v47  ;;  %v5519_v23 = vrot.slane %v4380_v47, 1  ;;  %v5518_v17 = vrot.slane %v4385_v56, 2  ;;  %v2650_v13 = vmin.f32 %v2618_v39, 6.0  ;;  %v4408_v48 = vmul.f32 %v3324_v34, %v920_v41 }
 0x155   : > { %5703 = vst [vmem:[#allocation33_spill] sm:$0xff] %v4385_v56  ;;  %v2651_v10 = vmin.f32 %v2619_v1, 6.0  ;;  %v1539_v1 = vadd.f32 %v1507_v57, %v1474_v58  ;;  %v1701_v26 = vrot.slane %v1583_v5, 1  ;;  %v1702_v47 = vrot.slane %v1584_v60, 1  ;;  %v522_v5 = vpop.f32.mrf.mxu2  ;;  %v5708_v60 = vld [vmem:[#allocation50_spill] sm:$0xff] }
 0x156   : > { %5705 = vst [vmem:[#allocation45_spill] sm:$0xff] %v4392_v7  ;;  %v1132_v21 = vsel %vm1097_vm3, %v5519_v23, %v1131_v6  ;;  %v1374_v8 = vsel %vm1339_vm4, %v5518_v17, %v1373_v32  ;;  %v1824_v6 = vmul.f32 %v3316_v30, %v5660_v15  ;;  %v1825_v41 = vmul.f32 %v3316_v30, %v5661_v54 }
 0x157   : > { %5706 = vst [vmem:[#allocation29_spill] sm:$0xff] %v4408_v48  ;;  %v2680_v2 = vpack.c.bf16 %v2651_v10, %v2650_v13  ;;  %v1223_v39 = vadd.f32 %v1132_v21, %v949_v29  ;;  %v2054_v29 = vmul.f32 %v3571_v62, %v3878_v35  ;;  %v2055_v57 = vmul.f32 %v3571_v62, %v3986_v31 }
 0x158   : > { %v1703_v58 = vsel %vm1097_vm3, %v1701_v26, %v1702_v47  ;;  %v5709_v13 = vrot.slane %v5708_v60, 1  ;;  %v1942_v10 = vrot.slane %v1824_v6, 2  ;;  %v2130_v21 = vmul.f32 %v3321_v33, %v3878_v35  ;;  %v5710_v60 = vld [vmem:[#allocation51_spill] sm:$0xff] }
 0x159   : > { %3029 = vmatmul.msk.bf16.gmra.mxu1 %vm2699_vm6, %v2680_v2  ;;  %v4415_v32 = vadd.f32 %v1374_v8, %v1223_v39  ;;  %v480_v8 = vpop.f32.mrf.mxu0  ;;  %v1780_v2 = vadd.f32 %v1703_v58, %v1539_v1  ;;  %v1943_v39 = vrot.slane %v1825_v41, 2  ;;  %v2131_v17 = vmul.f32 %v3321_v33, %v3986_v31 }
 0x15a   : > { %v1705_v15 = vsel %vm1097_vm3, %v1702_v47, %v5709_v13  ;;  %v2248_v23 = vrot.slane %v2130_v21, 1  ;;  %v2371_v50 = vmul.f32 %v3324_v34, %v3878_v35  ;;  %v2372_v26 = vmul.f32 %v3324_v34, %v3986_v31 }
 0x15b   : > { %5707 = vst [vmem:[#allocation25_spill] sm:$0xff] %v4415_v32  ;;  %v1781_v54 = vadd.f32 %v1705_v15, %v1540_v16  ;;  %v523_v47 = vadd.f32 %v4078_v46, %v522_v5  ;;  %v1944_v6 = vsel %vm1339_vm4, %v1942_v10, %v1943_v39  ;;  %v5711_v13 = vrot.slane %v5710_v60, 2 }
 0x15c   : > { %v2249_v16 = vrot.slane %v2131_v17, 1  ;;  %v481_v41 = vadd.f32 %v4078_v46, %v480_v8  ;;  %v2021_v58 = vadd.f32 %v1944_v6, %v1780_v2  ;;  %v2489_v21 = vrot.slane %v2371_v50, 2  ;;  %v5714_v50 = vld [vmem:[#allocation42_spill] sm:$0xff]  ;;  %v5720_v6 = vld [vmem:[#allocation36_spill] sm:$0xff] }
 0x15d   : > { %v1946_v1 = vsel %vm1339_vm4, %v1943_v39, %v5711_v13  ;;  %v2490_v49 = vrot.slane %v2372_v26, 2  ;;  %v5712_v56 = vrot.slane %v4016_v4, 1  ;;  %v566_v5 = vmax.f32 %v523_v47, 0.0 }
 0x15e   : > { %v2022_v15 = vadd.f32 %v1946_v1, %v1781_v54  ;;  %v2250_v32 = vsel %vm1097_vm3, %v2248_v23, %v2249_v16  ;;  %v549_v19 = vmax.f32 %v481_v41, 0.0  ;;  %v2086_v10 = vadd.f32 %v2054_v29, %v2021_v58  ;;  %v5716_v23 = vld [vmem:[#allocation34_spill] sm:$0xff] }
 0x15f   : > { %v2252_v7 = vsel %vm1097_vm3, %v2249_v16, %v5712_v56  ;;  %v2491_v60 = vsel %vm1339_vm4, %v2489_v21, %v2490_v49  ;;  %v5713_v17 = vrot.slane %v4025_v27, 2  ;;  %v602_v2 = vmin.f32 %v566_v5, 6.0  ;;  %v5718_v56 = vld [vmem:[#allocation43_spill] sm:$0xff] }
 0x160   : > { %v2087_v48 = vadd.f32 %v2055_v57, %v2022_v15  ;;  %v4449_v54 = vmin.f32 %v549_v19, 6.0  ;;  %v5715_v39 = vrot.slane %v5714_v50, 1  ;;  %v5717_v26 = vrot.slane %v5716_v23, 1  ;;  %v5722_v27 = vld [vmem:[#allocation35_spill] sm:$0xff]  ;;  %v5724_v50 = vld [vmem:[#allocation46_spill] sm:$0xff] }
 0x161   : > { %v2493_v8 = vsel %vm1339_vm4, %v2490_v49, %v5713_v17  ;;  %v5719_v47 = vrot.slane %v5718_v56, 2  ;;  %v5721_v29 = vrot.slane %v5720_v6, 2  ;;  %v2327_v13 = vadd.f32 %v2250_v32, %v2086_v10 }
 0x162   : > { %v1115_v4 = vsel %vm1097_vm3, %v5717_v26, %v5715_v39  ;;  %v2328_v1 = vadd.f32 %v2252_v7, %v2087_v48  ;;  %v1491_v19 = vmul.f32 %v3365_v63, %v3811_v9  ;;  %v834_v49 = vrot.slane %v602_v2, 7 }
 0x163   : > { %v1357_v57 = vsel %vm1339_vm4, %v5721_v29, %v5719_v47  ;;  %v1216_v16 = vadd.f32 %v1115_v4, %v5722_v27  ;;  %v5524_v41 = vrot.slane %v4449_v54, 7  ;;  %v1492_v58 = vmul.f32 %v3365_v63, %v3901_v25 }
 0x164   : > { %v1559_v15 = vmul.f32 %v3314_v28, %v3811_v9  ;;  %v2568_v21 = vadd.f32 %v2491_v60, %v2327_v13  ;;  %v2569_v5 = vadd.f32 %v2493_v8, %v2328_v1  ;;  %v1560_v7 = vmul.f32 %v3314_v28, %v3901_v25 }
 0x165   : > { %v1458_v17 = vadd.f32 %v1357_v57, %v1216_v16  ;;  %v5723_v48 = vrot.slane %v4336_v24, 7  ;;  %v929_v10 = vsel %vm787_vm2, %v834_v49, 0.0  ;;  %v4480_v2 = vsel %vm787_vm2, 0.0, %v5524_v41 }
 0x166   : > { %v1524_v39 = vadd.f32 %v1492_v58, %v5724_v50  ;;  %v2604_v60 = vadd.f32 %v3841_v37, %v2568_v21  ;;  %v2605_v8 = vadd.f32 %v3841_v37, %v2569_v5  ;;  %v1048_v26 = vmul.f32 %v3268_v55, %v929_v10 }
 0x167   : > { %v4474_v32 = vsel %vm787_vm2, %v5723_v48, %v834_v49  ;;  %v1290_v56 = vmul.f32 %v3283_v0, %v929_v10  ;;  %v4498_v47 = vmul.f32 %v3314_v28, %v929_v10  ;;  %v4502_v57 = vmul.f32 %v3316_v30, %v929_v10 }
 0x168   : > { %v967_v23 = vmul.f32 %v3287_v3, %v4474_v32  ;;  %v4489_v24 = vmul.f32 %v3268_v55, %v4474_v32  ;;  %v4494_v4 = vmul.f32 %v3283_v0, %v4474_v32  ;;  %v2636_v6 = vmax.f32 %v2604_v60, 0.0 }
 0x169   : > { %v2637_v37 = vmax.f32 %v2605_v8, 0.0  ;;  %v1176_v13 = vrot.slane %v1048_v26, 1  ;;  %v1418_v27 = vrot.slane %v1290_v56, 2  ;;  %v4508_v5 = vmul.f32 %v3321_v33, %v929_v10 }
 0x16a   : > { %v1174_v29 = vrot.slane %v4489_v24, 1  ;;  %v5525_v1 = vrot.slane %v4494_v4, 2  ;;  %v2668_v49 = vmin.f32 %v2636_v6, 6.0  ;;  %v4517_v60 = vmul.f32 %v3324_v34, %v929_v10 }
 0x16b   : > { %v2669_v58 = vmin.f32 %v2637_v37, 6.0  ;;  %v4521_v8 = vmul.f32 %v3287_v3, %v4480_v2  ;;  %v4528_v6 = vmul.f32 %v3268_v55, %v4480_v2  ;;  %v1523_v10 = vadd.f32 %v1491_v19, %v1458_v17 }
 0x16c   : > { %v1177_v48 = vsel %vm1097_vm3, %v1174_v29, %v1176_v13  ;;  %v4514_v50 = vsel %vm1339_vm4, %v5525_v1, %v1418_v27  ;;  %v4533_v13 = vmul.f32 %v3283_v0, %v4480_v2  ;;  %v1661_v27 = vrot.slane %v1559_v15, 1 }
 0x16d   : > { %5725 = vst [vmem:[#allocation30_spill] sm:$0xff] %v4521_v8  ;;  %v2689_v24 = vpack.c.bf16 %v2669_v58, %v2668_v49  ;;  %v4523_v26 = vadd.f32 %v1177_v48, %v967_v23  ;;  %v1662_v23 = vrot.slane %v1560_v7, 1  ;;  %v1800_v58 = vmul.f32 %v3316_v30, %v3811_v9 }
 0x16e   : > { %5726 = vst [vmem:[#allocation26_spill] sm:$0xff] %v4528_v6  ;;  %v1801_v48 = vmul.f32 %v3316_v30, %v3901_v25  ;;  %v2038_v16 = vmul.f32 %v3571_v62, %v4030_v36  ;;  %v2039_v19 = vmul.f32 %v3571_v62, %v4123_v45  ;;  %v2106_v15 = vmul.f32 %v3321_v33, %v4030_v36  ;;  %v525_v25 = vpop.f32.mrf.mxu2 }
 0x16f   : > { %5727 = vst [vmem:[#allocation24_spill] sm:$0xff] %v4533_v13  ;;  %3038 = vmatmul.msk.bf16.gmra.mxu3 %vm2699_vm6, %v2689_v24  ;;  %v1663_v17 = vsel %vm1097_vm3, %v1661_v27, %v1662_v23  ;;  %v5728_v7 = vrot.slane %v3921_v43, 1  ;;  %v1902_v24 = vrot.slane %v1800_v58, 2  ;;  %v2107_v56 = vmul.f32 %v3321_v33, %v4123_v45  ;;  %v5729_v13 = vld [vmem:[#allocation61_spill] sm:$0xff] }
 0x170   : > { %v1903_v49 = vrot.slane %v1801_v48, 2  ;;  %v1764_v37 = vadd.f32 %v1663_v17, %v1523_v10  ;;  %v2208_v41 = vrot.slane %v2106_v15, 1  ;;  %v5730_v8 = vrot.slane %v5729_v13, 2 }
 0x171   : > { %v1665_v9 = vsel %vm1097_vm3, %v1662_v23, %v5728_v7  ;;  %v2347_v43 = vmul.f32 %v3324_v34, %v4030_v36  ;;  %v2348_v27 = vmul.f32 %v3324_v34, %v4123_v45  ;;  %v2209_v10 = vrot.slane %v2107_v56, 1 }
 0x172   : > { %v1765_v21 = vadd.f32 %v1665_v9, %v1524_v39  ;;  %v1904_v1 = vsel %vm1339_vm4, %v1902_v24, %v1903_v49  ;;  %v1906_v6 = vsel %vm1339_vm4, %v1903_v49, %v5730_v8  ;;  %v526_v39 = vadd.f32 %v4078_v46, %v525_v25 }
 0x173   : > { %v2005_v23 = vadd.f32 %v1904_v1, %v1764_v37  ;;  %v2449_v48 = vrot.slane %v2347_v43, 2  ;;  %v2450_v17 = vrot.slane %v2348_v27, 2  ;;  %v966_v15 = vmul.f32 %v3287_v3, %v4361_v42  ;;  %v482_v1 = vpop.f32.mrf.mxu0  ;;  %v5733_v27 = vld [vmem:[#allocation48_spill] sm:$0xff] }
 0x174   : > { %v2006_v58 = vadd.f32 %v1906_v6, %v1765_v21  ;;  %v1173_v13 = vrot.slane %v4374_v11, 1  ;;  %v2210_v49 = vsel %vm1097_vm3, %v2208_v41, %v2209_v10  ;;  %v5731_v9 = vrot.slane %v4164_v20, 1 }
 0x175   : > { %v2070_v7 = vadd.f32 %v2038_v16, %v2005_v23  ;;  %v2451_v21 = vsel %vm1339_vm4, %v2449_v48, %v2450_v17  ;;  %v5732_v56 = vrot.slane %v4167_v18, 2  ;;  %v567_v37 = vmax.f32 %v526_v39, 0.0  ;;  %v5737_v48 = vld [vmem:[#allocation49_spill] sm:$0xff] }
 0x176   : > { %v2071_v8 = vadd.f32 %v2039_v19, %v2006_v58  ;;  %v2212_v24 = vsel %vm1097_vm3, %v2209_v10, %v5731_v9  ;;  %v1175_v25 = vsel %vm1097_vm3, %v1173_v13, %v1174_v29  ;;  %v1288_v41 = vmul.f32 %v3283_v0, %v4361_v42  ;;  %v5735_v58 = vld [vmem:[#allocation38_spill] sm:$0xff] }
 0x177   : > { %v2453_v6 = vsel %vm1339_vm4, %v2450_v17, %v5732_v56  ;;  %v2311_v43 = vadd.f32 %v2210_v49, %v2070_v7  ;;  %v1240_v16 = vadd.f32 %v1175_v25, %v966_v15  ;;  %v4577_v19 = vmin.f32 %v567_v37, 6.0  ;;  %v5739_v17 = vld [vmem:[#allocation39_spill] sm:$0xff]  ;;  %v5741_v49 = vld [vmem:[#allocation41_spill] sm:$0xff]  ;;  %v4599_v25 = vld [vmem:[%s5418_s4] ss:$0 sm:$0xff] }
 0x178   : > { %v2312_v11 = vadd.f32 %v2212_v24, %v2071_v8  ;;  %v483_v20 = vadd.f32 %v4078_v46, %v482_v1  ;;  %v5734_v23 = vrot.slane %v5733_v27, 1  ;;  %v5736_v10 = vrot.slane %v5735_v58, 1  ;;  %v5743_v58 = vld [vmem:[#allocation55_spill] sm:$0xff] }
 0x179   : > { %v5738_v39 = vrot.slane %v5737_v48, 2  ;;  %v5740_v29 = vrot.slane %v5739_v17, 2  ;;  %v2552_v15 = vadd.f32 %v2451_v21, %v2311_v43  ;;  %v1415_v8 = vrot.slane %v1288_v41, 2 }
 0x17a   : > { %v1160_v18 = vsel %vm1097_vm3, %v5736_v10, %v5734_v23  ;;  %v2553_v7 = vadd.f32 %v2453_v6, %v2312_v11  ;;  %v5528_v24 = vrot.slane %v4577_v19, 7  ;;  %v550_v1 = vmax.f32 %v483_v20, 0.0 }
 0x17b   : > { %v1402_v13 = vsel %vm1339_vm4, %v5740_v29, %v5738_v39  ;;  %v1234_v9 = vadd.f32 %v1160_v18, %v5741_v49  ;;  %v1509_v56 = vmul.f32 %v3365_v63, %v3878_v35  ;;  %v1510_v37 = vmul.f32 %v3365_v63, %v3986_v31 }
 0x17c   : > { %v2588_v21 = vadd.f32 %v4599_v25, %v2552_v15  ;;  %v2589_v6 = vadd.f32 %v4599_v25, %v2553_v7  ;;  %v5742_v43 = vrot.slane %v4494_v4, 2  ;;  %v912_v20 = vsel %vm787_vm2, 0.0, %v5528_v24 }
 0x17d   : > { %v1476_v41 = vadd.f32 %v1402_v13, %v1234_v9  ;;  %v586_v23 = vmin.f32 %v550_v1, 6.0  ;;  %v1542_v10 = vadd.f32 %v1510_v37, %v5743_v58  ;;  %v1515_v39 = vmul.f32 %v3365_v63, %v912_v20 }
 0x17e   : > { %v1417_v11 = vsel %vm1339_vm4, %v1415_v8, %v5742_v43  ;;  %v2620_v18 = vmax.f32 %v2588_v21, 0.0  ;;  %v2621_v48 = vmax.f32 %v2589_v6, 0.0  ;;  %v4612_v17 = vmul.f32 %v3314_v28, %v912_v20 }
 0x17f   : > { %v1482_v27 = vadd.f32 %v1417_v11, %v1240_v16  ;;  %v4615_v4 = vmul.f32 %v3316_v30, %v912_v20  ;;  %v4618_v29 = vmul.f32 %v3571_v62, %v912_v20  ;;  %v4621_v13 = vmul.f32 %v3321_v33, %v912_v20 }
 0x180   : > { %5744 = vst [vmem:[#allocation40_spill] sm:$0xff] %v4612_v17  ;;  %v4624_v16 = vmul.f32 %v3324_v34, %v912_v20  ;;  %v2652_v15 = vmin.f32 %v2620_v18, 6.0  ;;  %v2653_v7 = vmin.f32 %v2621_v48, 6.0  ;;  %v810_v21 = vrot.slane %v586_v23, 7 }
 0x181   : > { %5745 = vst [vmem:[#allocation50_spill] sm:$0xff] %v4615_v4  ;;  %v4626_v8 = vadd.f32 %v1515_v39, %v1482_v27  ;;  %v1541_v43 = vadd.f32 %v1509_v56, %v1476_v41  ;;  %v1586_v11 = vmul.f32 %v3314_v28, %v3878_v35  ;;  %v1587_v20 = vmul.f32 %v3314_v28, %v3986_v31 }
 0x182   : > { %5746 = vst [vmem:[#allocation51_spill] sm:$0xff] %v4618_v29  ;;  %v2681_v6 = vpack.c.bf16 %v2653_v7, %v2652_v15  ;;  %v5749_v27 = vrot.slane %v4449_v54, 7  ;;  %v921_v18 = vsel %vm787_vm2, %v810_v21, 0.0  ;;  %v1827_v48 = vmul.f32 %v3316_v30, %v3878_v35 }
 0x183   : > { %5747 = vst [vmem:[#allocation42_spill] sm:$0xff] %v4624_v16  ;;  %v1828_v23 = vmul.f32 %v3316_v30, %v3986_v31  ;;  %v1024_v54 = vmul.f32 %v3268_v55, %v921_v18  ;;  %v1266_v35 = vmul.f32 %v3283_v0, %v921_v18  ;;  %v4660_v15 = vmul.f32 %v3314_v28, %v921_v18 }
 0x184   : > { %5748 = vst [vmem:[#allocation34_spill] sm:$0xff] %v4626_v8  ;;  %v4639_v58 = vsel %vm787_vm2, %v5749_v27, %v810_v21  ;;  %3030 = vmatmul.msk.bf16.gmra.mxu1 %vm2699_vm6, %v2681_v6  ;;  %v4663_v31 = vmul.f32 %v3316_v30, %v921_v18  ;;  %v4666_v7 = vmul.f32 %v3321_v33, %v921_v18  ;;  %v1706_v17 = vrot.slane %v1586_v11, 1 }
 0x185   : > { %v951_v56 = vmul.f32 %v3287_v3, %v4639_v58  ;;  %v4651_v41 = vmul.f32 %v3268_v55, %v4639_v58  ;;  %v4656_v39 = vmul.f32 %v3283_v0, %v4639_v58  ;;  %v1136_v6 = vrot.slane %v1024_v54, 1 }
 0x186   : > { %v4671_v9 = vmul.f32 %v3324_v34, %v921_v18  ;;  %v1378_v49 = vrot.slane %v1266_v35, 2  ;;  %v1707_v54 = vrot.slane %v1587_v20, 1  ;;  %v1947_v35 = vrot.slane %v1827_v48, 2  ;;  %v527_v20 = vpop.f32.mrf.mxu2 }
 0x187   : > { %5750 = vst [vmem:[#allocation43_spill] sm:$0xff] %v4651_v41  ;;  %v5532_v21 = vrot.slane %v4651_v41, 1  ;;  %v5533_v27 = vrot.slane %v4656_v39, 2  ;;  %v1948_v29 = vrot.slane %v1828_v23, 2  ;;  %v5752_v1 = vrot.slane %v4006_v44, 1 }
 0x188   : > { %5751 = vst [vmem:[#allocation36_spill] sm:$0xff] %v4656_v39  ;;  %v1708_v37 = vsel %vm1097_vm3, %v1706_v17, %v1707_v54  ;;  %v2057_v11 = vmul.f32 %v3571_v62, %v4238_v12  ;;  %v5754_v48 = vrot.slane %v4010_v40, 2  ;;  %v2133_v44 = vmul.f32 %v3321_v33, %v4118_v59 }
 0x189   : > { %v1137_v4 = vsel %vm1097_vm3, %v5532_v21, %v1136_v6  ;;  %v1379_v18 = vsel %vm1339_vm4, %v5533_v27, %v1378_v49  ;;  %v1710_v24 = vsel %vm1097_vm3, %v1707_v54, %v5752_v1  ;;  %v2056_v6 = vmul.f32 %v3571_v62, %v4118_v59 }
 0x18a   : > { %v1225_v16 = vadd.f32 %v1137_v4, %v951_v56  ;;  %v1782_v56 = vadd.f32 %v1708_v37, %v1541_v43  ;;  %v1783_v21 = vadd.f32 %v1710_v24, %v1542_v10  ;;  %v1949_v49 = vsel %vm1339_vm4, %v1947_v35, %v1948_v29  ;;  %v485_v37 = vpop.f32.mrf.mxu0 }
 0x18b   : > { %v1951_v17 = vsel %vm1339_vm4, %v1948_v29, %v5754_v48  ;;  %v2134_v1 = vmul.f32 %v3321_v33, %v4238_v12  ;;  %v2374_v23 = vmul.f32 %v3324_v34, %v4118_v59  ;;  %v2375_v24 = vmul.f32 %v3324_v34, %v4238_v12 }
 0x18c   : > { %v4691_v4 = vadd.f32 %v1379_v18, %v1225_v16  ;;  %v2023_v54 = vadd.f32 %v1949_v49, %v1782_v56  ;;  %v2024_v16 = vadd.f32 %v1951_v17, %v1783_v21  ;;  %v528_v10 = vadd.f32 %v4078_v46, %v527_v20  ;;  %v5756_v20 = vld [vmem:[#allocation59_spill] sm:$0xff] }
 0x18d   : > { %v2253_v40 = vrot.slane %v2133_v44, 1  ;;  %v2254_v43 = vrot.slane %v2134_v1, 1  ;;  %v2494_v29 = vrot.slane %v2374_v23, 2  ;;  %v1483_v18 = vadd.f32 %v4514_v50, %v4523_v26  ;;  %v5758_v44 = vld [vmem:[#allocation52_spill] sm:$0xff] }
 0x18e   : > { %5753 = vst [vmem:[#allocation35_spill] sm:$0xff] %v4691_v4  ;;  %v2088_v35 = vadd.f32 %v2056_v6, %v2023_v54  ;;  %v2089_v48 = vadd.f32 %v2057_v11, %v2024_v16  ;;  %v2495_v27 = vrot.slane %v2375_v24, 2  ;;  %v568_v8 = vmax.f32 %v528_v10, 0.0  ;;  %v5761_v16 = vld [vmem:[#allocation53_spill] sm:$0xff]  ;;  %v5762_v10 = vld [vmem:[#allocation60_spill] sm:$0xff] }
 0x18f   : > { %v2255_v4 = vsel %vm1097_vm3, %v2253_v40, %v2254_v43  ;;  %v5755_v21 = vrot.slane %v4272_v22, 1  ;;  %v486_v49 = vadd.f32 %v4078_v46, %v485_v37  ;;  %v5757_v17 = vrot.slane %v5756_v20, 1  ;;  %v5764_v37 = vld [vmem:[#allocation54_spill] sm:$0xff] }
 0x190   : > { %v5759_v1 = vrot.slane %v5758_v44, 1  ;;  %v2329_v39 = vadd.f32 %v2255_v4, %v2088_v35  ;;  %v2496_v26 = vsel %vm1339_vm4, %v2494_v29, %v2495_v27  ;;  %v5760_v6 = vrot.slane %v4281_v61, 2 }
 0x191   : > { %v2257_v56 = vsel %vm1097_vm3, %v2254_v43, %v5755_v21  ;;  %v604_v54 = vmin.f32 %v568_v8, 6.0  ;;  %v551_v22 = vmax.f32 %v486_v49, 0.0  ;;  %v5763_v46 = vrot.slane %v5762_v10, 2 }
 0x192   : > { %v1120_v23 = vsel %vm1097_vm3, %v5759_v1, %v5757_v17  ;;  %v2330_v50 = vadd.f32 %v2257_v56, %v2089_v48  ;;  %v2498_v11 = vsel %vm1339_vm4, %v2495_v27, %v5760_v6  ;;  %v5765_v40 = vrot.slane %v5764_v37, 2 }
 0x193   : > { %v1218_v24 = vadd.f32 %v1120_v23, %v5761_v16  ;;  %v2570_v21 = vadd.f32 %v2496_v26, %v2329_v39  ;;  %v1493_v4 = vmul.f32 %v3365_v63, %v4030_v36  ;;  %v1494_v61 = vmul.f32 %v3365_v63, %v4123_v45 }
 0x194   : > { %v1362_v43 = vsel %vm1339_vm4, %v5765_v40, %v5763_v46  ;;  %v2571_v20 = vadd.f32 %v2498_v11, %v2330_v50  ;;  %v837_v29 = vrot.slane %v604_v54, 7  ;;  %v4732_v27 = vmin.f32 %v551_v22, 6.0 }
 0x195   : > { %v1460_v8 = vadd.f32 %v1362_v43, %v1218_v24  ;;  %v1562_v35 = vmul.f32 %v3314_v28, %v4030_v36  ;;  %v2606_v48 = vadd.f32 %v4599_v25, %v2570_v21  ;;  %v1526_v39 = vadd.f32 %v1494_v61, %v3955_v14 }
 0x196   : > { %v2607_v56 = vadd.f32 %v4599_v25, %v2571_v20  ;;  %v1563_v49 = vmul.f32 %v3314_v28, %v4123_v45  ;;  %v5766_v17 = vrot.slane %v4577_v19, 7  ;;  %v930_v1 = vsel %vm787_vm2, %v837_v29, 0.0 }
 0x197   : > { %v5537_v23 = vrot.slane %v4732_v27, 7  ;;  %v1525_v50 = vadd.f32 %v1493_v4, %v1460_v8  ;;  %v2638_v26 = vmax.f32 %v2606_v48, 0.0  ;;  %v1597_v54 = vmul.f32 %v3314_v28, %v930_v1 }
 0x198   : > { %v4744_v44 = vsel %vm787_vm2, %v5766_v17, %v837_v29  ;;  %v2639_v6 = vmax.f32 %v2607_v56, 0.0  ;;  %v1838_v22 = vmul.f32 %v3316_v30, %v930_v1  ;;  %v4767_v20 = vmul.f32 %v3321_v33, %v930_v1 }
 0x199   : > { %v1516_v11 = vmul.f32 %v3365_v63, %v4744_v44  ;;  %v4752_v14 = vmul.f32 %v3314_v28, %v4744_v44  ;;  %v4757_v19 = vmul.f32 %v3316_v30, %v4744_v44  ;;  %v4762_v16 = vmul.f32 %v3321_v33, %v4744_v44 }
 0x19a   : > { %v2670_v24 = vmin.f32 %v2638_v26, 6.0  ;;  %v2671_v10 = vmin.f32 %v2639_v6, 6.0  ;;  %v1724_v40 = vrot.slane %v1597_v54, 1  ;;  %v1965_v21 = vrot.slane %v1838_v22, 2 }
 0x19b   : > { %v1548_v46 = vadd.f32 %v1516_v11, %v1483_v18  ;;  %v5536_v37 = vrot.slane %v4752_v14, 1  ;;  %v5535_v43 = vrot.slane %v4757_v19, 2  ;;  %v4771_v29 = vmul.f32 %v3324_v34, %v930_v1 }
 0x19c   : > { %v2690_v4 = vpack.c.bf16 %v2671_v10, %v2670_v24  ;;  %v4776_v8 = vsel %vm787_vm2, 0.0, %v5537_v23  ;;  %v1666_v54 = vrot.slane %v1562_v35, 1  ;;  %v1667_v22 = vrot.slane %v1563_v49, 1 }
 0x19d   : > { %v1725_v18 = vsel %vm1097_vm3, %v5536_v37, %v1724_v40  ;;  %v1966_v48 = vsel %vm1339_vm4, %v5535_v43, %v1965_v21  ;;  %v4787_v17 = vmul.f32 %v3287_v3, %v4776_v8  ;;  %v4793_v6 = vmul.f32 %v3268_v55, %v4776_v8 }
 0x19e   : > { %3039 = vmatmul.msk.bf16.gmra.mxu3 %vm2699_vm6, %v2690_v4  ;;  %v1789_v1 = vadd.f32 %v1725_v18, %v1548_v46  ;;  %v4797_v11 = vmul.f32 %v3283_v0, %v4776_v8  ;;  %v1803_v24 = vmul.f32 %v3316_v30, %v4030_v36  ;;  %v1804_v10 = vmul.f32 %v3316_v30, %v4123_v45  ;;  %v5771_v46 = vld [vmem:[#allocation22_spill] sm:$0xff] }
 0x19f   : > { %5767 = vst [vmem:[#allocation46_spill] sm:$0xff] %v4787_v17  ;;  %v2040_v4 = vmul.f32 %v3571_v62, %v4244_v38  ;;  %v1668_v18 = vsel %vm1097_vm3, %v1666_v54, %v1667_v22  ;;  %v5770_v35 = vrot.slane %v4155_v53, 1  ;;  %v2041_v45 = vmul.f32 %v3571_v62, %v4366_v51 }
 0x1a0   : > { %5768 = vst [vmem:[#allocation61_spill] sm:$0xff] %v4793_v6  ;;  %v4803_v40 = vadd.f32 %v1966_v48, %v1789_v1  ;;  %v1907_v43 = vrot.slane %v1803_v24, 2  ;;  %v1908_v36 = vrot.slane %v1804_v10, 2  ;;  %v1766_v37 = vadd.f32 %v1668_v18, %v1525_v50  ;;  %v487_v1 = vpop.f32.mrf.mxu0  ;;  %v5779_v6 = vld [vmem:[#allocation63_spill] sm:$0xff] }
 0x1a1   : > { %5769 = vst [vmem:[#allocation48_spill] sm:$0xff] %v4797_v11  ;;  %v1670_v49 = vsel %vm1097_vm3, %v1667_v22, %v5770_v35  ;;  %v2109_v48 = vmul.f32 %v3321_v33, %v4244_v38  ;;  %v5772_v56 = vrot.slane %v5771_v46, 2  ;;  %v2110_v53 = vmul.f32 %v3321_v33, %v4366_v51 }
 0x1a2   : > { %v1767_v26 = vadd.f32 %v1670_v49, %v1526_v39  ;;  %v1909_v21 = vsel %vm1339_vm4, %v1907_v43, %v1908_v36  ;;  %v2350_v50 = vmul.f32 %v3324_v34, %v4244_v38  ;;  %v2351_v10 = vmul.f32 %v3324_v34, %v4366_v51  ;;  %v3079_v43 = vld [vmem:[%s5416_s2] ss:$0 sm:$0xff] }
 0x1a3   : > { %v1911_v54 = vsel %vm1339_vm4, %v1908_v36, %v5772_v56  ;;  %v2007_v39 = vadd.f32 %v1909_v21, %v1766_v37  ;;  %v2213_v24 = vrot.slane %v2109_v48, 1  ;;  %v2214_v18 = vrot.slane %v2110_v53, 1  ;;  %v5773_v56 = vld [vmem:[#allocation62_spill] sm:$0xff]  ;;  %v5775_v36 = vld [vmem:[#allocation57_spill] sm:$0xff]  ;;  %v5777_v21 = vld [vmem:[#allocation56_spill] sm:$0xff] }
 0x1a4   : > { %v2008_v22 = vadd.f32 %v1911_v54, %v1767_v26  ;;  %v2454_v35 = vrot.slane %v2350_v50, 2  ;;  %v488_v46 = vadd.f32 %v3079_v43, %v487_v1  ;;  %v5774_v49 = vrot.slane %v5773_v56, 1  ;;  %v5781_v43 = vld [vmem:[#allocation58_spill] sm:$0xff] }
 0x1a5   : > { %v5776_v61 = vrot.slane %v5775_v36, 1  ;;  %v2072_v11 = vadd.f32 %v2040_v4, %v2007_v39  ;;  %v2455_v26 = vrot.slane %v2351_v10, 2  ;;  %v2215_v54 = vsel %vm1097_vm3, %v2213_v24, %v2214_v18 }
 0x1a6   : > { %v2073_v37 = vadd.f32 %v2041_v45, %v2008_v22  ;;  %v5778_v53 = vrot.slane %v4405_v52, 1  ;;  %v552_v17 = vmax.f32 %v488_v46, 0.0  ;;  %v5780_v1 = vrot.slane %v5779_v6, 2  ;;  %v5783_v45 = vld [vmem:[#allocation29_spill] sm:$0xff] }
 0x1a7   : > { %v1165_v23 = vsel %vm1097_vm3, %v5776_v61, %v5774_v49  ;;  %v5782_v56 = vrot.slane %v5781_v43, 2  ;;  %v2313_v41 = vadd.f32 %v2215_v54, %v2072_v11  ;;  %v2456_v4 = vsel %vm1339_vm4, %v2454_v35, %v2455_v26 }
 0x1a8   : > { %v1236_v48 = vadd.f32 %v1165_v23, %v5777_v21  ;;  %v2217_v50 = vsel %vm1097_vm3, %v2214_v18, %v5778_v53  ;;  %v5784_v39 = vrot.slane %v5783_v45, 2  ;;  %v588_v22 = vmin.f32 %v552_v17, 6.0 }
 0x1a9   : > { %v1407_v36 = vsel %vm1339_vm4, %v5782_v56, %v5780_v1  ;;  %v2314_v61 = vadd.f32 %v2217_v50, %v2073_v37  ;;  %v1511_v52 = vmul.f32 %v3365_v63, %v4118_v59  ;;  %v1512_v6 = vmul.f32 %v3365_v63, %v4238_v12  ;;  %v5785_v37 = vld [vmem:[#allocation67_spill] sm:$0xff] }
 0x1aa   : > { %v2458_v23 = vsel %vm1339_vm4, %v2455_v26, %v5784_v39  ;;  %v1478_v24 = vadd.f32 %v1407_v36, %v1236_v48  ;;  %v2554_v10 = vadd.f32 %v2456_v4, %v2313_v41  ;;  %v1589_v11 = vmul.f32 %v3314_v28, %v4118_v59 }
 0x1ab   : > { %v2555_v18 = vadd.f32 %v2458_v23, %v2314_v61  ;;  %v1590_v35 = vmul.f32 %v3314_v28, %v4238_v12  ;;  %v813_v46 = vrot.slane %v588_v22, 7  ;;  %v1544_v26 = vadd.f32 %v1512_v6, %v5785_v37 }
 0x1ac   : > { %v1543_v49 = vadd.f32 %v1511_v52, %v1478_v24  ;;  %v1830_v17 = vmul.f32 %v3316_v30, %v4118_v59  ;;  %v2590_v21 = vadd.f32 %v4599_v25, %v2554_v10  ;;  %v1711_v54 = vrot.slane %v1589_v11, 1 }
 0x1ad   : > { %v2591_v48 = vadd.f32 %v4599_v25, %v2555_v18  ;;  %v1712_v41 = vrot.slane %v1590_v35, 1  ;;  %v5786_v53 = vrot.slane %v4732_v27, 7  ;;  %v922_v1 = vsel %vm787_vm2, %v813_v46, 0.0 }
 0x1ae   : > { %v1831_v43 = vmul.f32 %v3316_v30, %v4238_v12  ;;  %v1952_v56 = vrot.slane %v1830_v17, 2  ;;  %v2622_v36 = vmax.f32 %v2590_v21, 0.0  ;;  %v1027_v27 = vmul.f32 %v3268_v55, %v922_v1  ;;  %v5789_v21 = vld [vmem:[#allocation47_spill] sm:$0xff] }
 0x1af   : > { %v4865_v50 = vsel %vm787_vm2, %v5786_v53, %v813_v46  ;;  %v2623_v61 = vmax.f32 %v2591_v48, 0.0  ;;  %v1269_v39 = vmul.f32 %v3283_v0, %v922_v1  ;;  %v4883_v12 = vmul.f32 %v3314_v28, %v922_v1 }
 0x1b0   : > { %v953_v59 = vmul.f32 %v3287_v3, %v4865_v50  ;;  %v4874_v4 = vmul.f32 %v3268_v55, %v4865_v50  ;;  %v4879_v45 = vmul.f32 %v3283_v0, %v4865_v50  ;;  %v2654_v23 = vmin.f32 %v2622_v36, 6.0 }
 0x1b1   : > { %v2655_v22 = vmin.f32 %v2623_v61, 6.0  ;;  %v4887_v3 = vmul.f32 %v3316_v30, %v922_v1  ;;  %v1141_v52 = vrot.slane %v1027_v27, 1  ;;  %v1383_v55 = vrot.slane %v1269_v39, 2 }
 0x1b2   : > { %5787 = vst [vmem:[#allocation38_spill] sm:$0xff] %v4874_v4  ;;  %v5542_v24 = vrot.slane %v4874_v4, 1  ;;  %v5541_v6 = vrot.slane %v4879_v45, 2  ;;  %v4893_v0 = vmul.f32 %v3321_v33, %v922_v1  ;;  %v4896_v35 = vmul.f32 %v3324_v34, %v922_v1 }
 0x1b3   : > { %5788 = vst [vmem:[#allocation49_spill] sm:$0xff] %v4879_v45  ;;  %v2682_v18 = vpack.c.bf16 %v2655_v22, %v2654_v23  ;;  %v1713_v17 = vsel %vm1097_vm3, %v1711_v54, %v1712_v41  ;;  %v5790_v48 = vrot.slane %v5789_v21, 1  ;;  %v1953_v23 = vrot.slane %v1831_v43, 2  ;;  %v5796_v21 = vld [vmem:[#allocation65_spill] sm:$0xff] }
 0x1b4   : > { %v1142_v46 = vsel %vm1097_vm3, %v5542_v24, %v1141_v52  ;;  %v1384_v37 = vsel %vm1339_vm4, %v5541_v6, %v1383_v55  ;;  %v1784_v27 = vadd.f32 %v1713_v17, %v1543_v49  ;;  %v2058_v22 = vmul.f32 %v3571_v62, %v4361_v42 }
 0x1b5   : > { %v1715_v53 = vsel %vm1097_vm3, %v1712_v41, %v5790_v48  ;;  %3031 = vmatmul.msk.bf16.gmra.mxu1 %vm2699_vm6, %v2682_v18  ;;  %v1227_v36 = vadd.f32 %v1142_v46, %v953_v59  ;;  %v2059_v54 = vmul.f32 %v3571_v62, %v4474_v32  ;;  %v2136_v41 = vmul.f32 %v3321_v33, %v4361_v42 }
 0x1b6   : > { %v1785_v39 = vadd.f32 %v1715_v53, %v1544_v26  ;;  %v2137_v59 = vmul.f32 %v3321_v33, %v4474_v32  ;;  %v2377_v55 = vmul.f32 %v3324_v34, %v4361_v42  ;;  %v1954_v49 = vsel %vm1339_vm4, %v1952_v56, %v1953_v23  ;;  %v5792_v26 = vld [vmem:[#allocation32_spill] sm:$0xff] }
 0x1b7   : > { %v4915_v52 = vadd.f32 %v1384_v37, %v1227_v36  ;;  %v5793_v43 = vrot.slane %v5792_v26, 2  ;;  %v2378_v46 = vmul.f32 %v3324_v34, %v4474_v32  ;;  %v5794_v37 = vld [vmem:[#allocation13_spill] sm:$0xff]  ;;  %v5797_v48 = vrot.slane %v5796_v21, 1  ;;  %v5798_v56 = vld [vmem:[#allocation64_spill] sm:$0xff]  ;;  %v5799_v26 = vld [vmem:[#allocation14_spill] sm:$0xff] }
 0x1b8   : > { %v5795_v17 = vrot.slane %v5794_v37, 1  ;;  %v2025_v36 = vadd.f32 %v1954_v49, %v1784_v27  ;;  %v2258_v24 = vrot.slane %v2136_v41, 1  ;;  %v2259_v11 = vrot.slane %v2137_v59, 1 }
 0x1b9   : > { %5791 = vst [vmem:[#allocation39_spill] sm:$0xff] %v4915_v52  ;;  %v1956_v18 = vsel %vm1339_vm4, %v1953_v23, %v5793_v43  ;;  %v2499_v10 = vrot.slane %v2377_v55, 2  ;;  %v2500_v61 = vrot.slane %v2378_v46, 2  ;;  %v5800_v52 = vrot.slane %v5799_v26, 2  ;;  %v5801_v23 = vld [vmem:[#allocation66_spill] sm:$0xff] }
 0x1ba   : > { %v1125_v53 = vsel %vm1097_vm3, %v5797_v48, %v5795_v17  ;;  %v2026_v6 = vadd.f32 %v1956_v18, %v1785_v39  ;;  %v5802_v43 = vrot.slane %v5801_v23, 2  ;;  %v2090_v4 = vadd.f32 %v2058_v22, %v2025_v36  ;;  %v5806_v23 = vld [vmem:[#allocation44_spill] sm:$0xff] }
 0x1bb   : > { %v1220_v1 = vadd.f32 %v1125_v53, %v5798_v56  ;;  %v2260_v21 = vsel %vm1097_vm3, %v2258_v24, %v2259_v11  ;;  %v5803_v17 = vrot.slane %v4508_v5, 1  ;;  %v2501_v39 = vsel %vm1339_vm4, %v2499_v10, %v2500_v61 }
 0x1bc   : > { %v1367_v45 = vsel %vm1339_vm4, %v5802_v43, %v5800_v52  ;;  %v2091_v37 = vadd.f32 %v2059_v54, %v2026_v6  ;;  %v5804_v41 = vrot.slane %v4517_v60, 2  ;;  %v1495_v49 = vmul.f32 %v3365_v63, %v4244_v38 }
 0x1bd   : > { %v2262_v27 = vsel %vm1097_vm3, %v2259_v11, %v5803_v17  ;;  %v1462_v55 = vadd.f32 %v1367_v45, %v1220_v1  ;;  %v2331_v18 = vadd.f32 %v2260_v21, %v2090_v4  ;;  %v1496_v6 = vmul.f32 %v3365_v63, %v4366_v51  ;;  %v5805_v4 = vld [vmem:[#allocation68_spill] sm:$0xff]  ;;  %v5808_v17 = vld [vmem:[#allocation45_spill] sm:$0xff] }
 0x1be   : > { %v2503_v59 = vsel %vm1339_vm4, %v2500_v61, %v5804_v41  ;;  %v2332_v52 = vadd.f32 %v2262_v27, %v2091_v37  ;;  %v1565_v5 = vmul.f32 %v3314_v28, %v4244_v38  ;;  %v1566_v10 = vmul.f32 %v3314_v28, %v4366_v51 }
 0x1bf   : > { %v1527_v24 = vadd.f32 %v1495_v49, %v1462_v55  ;;  %v1806_v60 = vmul.f32 %v3316_v30, %v4244_v38  ;;  %v1807_v45 = vmul.f32 %v3316_v30, %v4366_v51  ;;  %v2572_v11 = vadd.f32 %v2501_v39, %v2331_v18 }
 0x1c0   : > { %v2573_v1 = vadd.f32 %v2503_v59, %v2332_v52  ;;  %v1528_v61 = vadd.f32 %v1496_v6, %v5805_v4  ;;  %v1671_v22 = vrot.slane %v1565_v5, 1  ;;  %v1672_v54 = vrot.slane %v1566_v10, 1 }
 0x1c1   : > { %v1912_v46 = vrot.slane %v1806_v60, 2  ;;  %v1913_v48 = vrot.slane %v1807_v45, 2  ;;  %v2042_v53 = vmul.f32 %v3571_v62, %v4480_v2  ;;  %v2608_v36 = vadd.f32 %v4599_v25, %v2572_v11 }
 0x1c2   : > { %v2609_v56 = vadd.f32 %v4599_v25, %v2573_v1  ;;  %v2043_v38 = vmul.f32 %v3571_v62, %v4639_v58  ;;  %v2112_v51 = vmul.f32 %v3321_v33, %v4480_v2  ;;  %v1673_v26 = vsel %vm1097_vm3, %v1671_v22, %v1672_v54 }
 0x1c3   : > { %v5807_v43 = vrot.slane %v5806_v23, 1  ;;  %v1914_v21 = vsel %vm1339_vm4, %v1912_v46, %v1913_v48  ;;  %v5809_v27 = vrot.slane %v5808_v17, 2  ;;  %v2640_v41 = vmax.f32 %v2608_v36, 0.0 }
 0x1c4   : > { %v2641_v59 = vmax.f32 %v2609_v56, 0.0  ;;  %v1768_v55 = vadd.f32 %v1673_v26, %v1527_v24  ;;  %v2113_v18 = vmul.f32 %v3321_v33, %v4639_v58  ;;  %v2218_v52 = vrot.slane %v2112_v51, 1  ;;  %v5814_v26 = vld [vmem:[#allocation16_spill] sm:$0xff] }
 0x1c5   : > { %v1675_v37 = vsel %vm1097_vm3, %v1672_v54, %v5807_v43  ;;  %v1916_v39 = vsel %vm1339_vm4, %v1913_v48, %v5809_v27  ;;  %v2353_v6 = vmul.f32 %v3324_v34, %v4480_v2  ;;  %v2354_v5 = vmul.f32 %v3324_v34, %v4639_v58  ;;  %v5810_v54 = vld [vmem:[#allocation31_spill] sm:$0xff] }
 0x1c6   : > { %v1769_v49 = vadd.f32 %v1675_v37, %v1528_v61  ;;  %v2672_v10 = vmin.f32 %v2640_v41, 6.0  ;;  %v2673_v60 = vmin.f32 %v2641_v59, 6.0  ;;  %v2009_v45 = vadd.f32 %v1914_v21, %v1768_v55  ;;  %v5812_v61 = vld [vmem:[#allocation12_spill] sm:$0xff]  ;;  %v5819_v55 = vld [vmem:[#allocation17_spill] sm:$0xff] }
 0x1c7   : > { %v2219_v1 = vrot.slane %v2113_v18, 1  ;;  %v2459_v4 = vrot.slane %v2353_v6, 2  ;;  %v2460_v22 = vrot.slane %v2354_v5, 2  ;;  %v5811_v24 = vrot.slane %v5810_v54, 1 }
 0x1c8   : > { %v2010_v11 = vadd.f32 %v1916_v39, %v1769_v49  ;;  %v5813_v46 = vrot.slane %v5812_v61, 1  ;;  %v2691_v36 = vpack.c.bf16 %v2673_v60, %v2672_v10  ;;  %v2074_v56 = vadd.f32 %v2042_v53, %v2009_v45  ;;  %v5817_v53 = vld [vmem:[#allocation37_spill] sm:$0xff] }
 0x1c9   : > { %v2220_v43 = vsel %vm1097_vm3, %v2218_v52, %v2219_v1  ;;  %v5815_v37 = vrot.slane %v4666_v7, 1  ;;  %v2461_v17 = vsel %vm1339_vm4, %v2459_v4, %v2460_v22  ;;  %v5816_v27 = vrot.slane %v4671_v9, 2  ;;  %v5821_v4 = vld [vmem:[#allocation23_spill] sm:$0xff] }
 0x1ca   : > { %v1170_v48 = vsel %vm1097_vm3, %v5813_v46, %v5811_v24  ;;  %v2075_v51 = vadd.f32 %v2043_v38, %v2010_v11  ;;  %3040 = vmatmul.msk.bf16.gmra.mxu3 %vm2699_vm6, %v2691_v36  ;;  %v2315_v41 = vadd.f32 %v2220_v43, %v2074_v56  ;;  %v5818_v38 = vrot.slane %v5817_v53, 2 }
 0x1cb   : > { %v1238_v23 = vadd.f32 %v1170_v48, %v5814_v26  ;;  %v2222_v21 = vsel %vm1097_vm3, %v2219_v1, %v5815_v37  ;;  %v2463_v39 = vsel %vm1339_vm4, %v2460_v22, %v5816_v27  ;;  %v5820_v49 = vrot.slane %v5819_v55, 2 }
 0x1cc   : > { %v2316_v59 = vadd.f32 %v2222_v21, %v2075_v51  ;;  %v1513_v7 = vmul.f32 %v3365_v63, %v4361_v42  ;;  %v1514_v6 = vmul.f32 %v3365_v63, %v4474_v32  ;;  %v1592_v9 = vmul.f32 %v3314_v28, %v4361_v42 }
 0x1cd   : > { %v1412_v18 = vsel %vm1339_vm4, %v5820_v49, %v5818_v38  ;;  %v1593_v5 = vmul.f32 %v3314_v28, %v4474_v32  ;;  %v2556_v10 = vadd.f32 %v2461_v17, %v2315_v41  ;;  %v1833_v45 = vmul.f32 %v3316_v30, %v4361_v42 }
 0x1ce   : > { %v1480_v52 = vadd.f32 %v1412_v18, %v1238_v23  ;;  %v2557_v60 = vadd.f32 %v2463_v39, %v2316_v59  ;;  %v1834_v11 = vmul.f32 %v3316_v30, %v4474_v32  ;;  %v1546_v22 = vadd.f32 %v1514_v6, %v5821_v4  ;;  %v5828_v6 = vld [vmem:[#allocation20_spill] sm:$0xff]  ;;  %v5836_v4 = vld [vmem:[#allocation51_spill] sm:$0xff] }
 0x1cf   : > { %v1716_v54 = vrot.slane %v1592_v9, 1  ;;  %v1717_v24 = vrot.slane %v1593_v5, 1  ;;  %v2592_v61 = vadd.f32 %v4599_v25, %v2556_v10  ;;  %v1957_v48 = vrot.slane %v1833_v45, 2  ;;  %v5830_v5 = vld [vmem:[#allocation21_spill] sm:$0xff]  ;;  %v5834_v45 = vld [vmem:[#allocation28_spill] sm:$0xff] }
 0x1d0   : > { %v1545_v1 = vadd.f32 %v1513_v7, %v1480_v52  ;;  %v2593_v46 = vadd.f32 %v4599_v25, %v2557_v60  ;;  %v1958_v36 = vrot.slane %v1834_v11, 2  ;;  %v5822_v51 = vrot.slane %v4498_v47, 1  ;;  %v5832_v60 = vld [vmem:[#allocation33_spill] sm:$0xff] }
 0x1d1   : > { %v1718_v56 = vsel %vm1097_vm3, %v1716_v54, %v1717_v24  ;;  %v2061_v32 = vmul.f32 %v3571_v62, %v4744_v44  ;;  %v5823_v26 = vrot.slane %v4762_v16, 1  ;;  %v5824_v23 = vrot.slane %v4621_v13, 1 }
 0x1d2   : > { %v1720_v42 = vsel %vm1097_vm3, %v1717_v24, %v5822_v51  ;;  %v2624_v37 = vmax.f32 %v2592_v61, 0.0  ;;  %v2625_v21 = vmax.f32 %v2593_v46, 0.0  ;;  %v1786_v17 = vadd.f32 %v1718_v56, %v1545_v1  ;;  %v5837_v24 = vld [vmem:[#allocation27_spill] sm:$0xff]  ;;  %v5838_v46 = vld [vmem:[#allocation42_spill] sm:$0xff] }
 0x1d3   : > { %v2265_v43 = vsel %vm1097_vm3, %v5824_v23, %v5823_v26  ;;  %v1787_v27 = vadd.f32 %v1720_v42, %v1546_v22  ;;  %v1959_v39 = vsel %vm1339_vm4, %v1957_v48, %v1958_v36  ;;  %v5825_v41 = vrot.slane %v4502_v57, 2 }
 0x1d4   : > { %v5826_v59 = vrot.slane %v4767_v20, 1  ;;  %v5827_v53 = vmov %v5823_v26  ;;  %v2381_v13 = vmul.f32 %v3324_v34, %v4744_v44  ;;  %v2656_v55 = vmin.f32 %v2624_v37, 6.0 }
 0x1d5   : > { %v1961_v47 = vsel %vm1339_vm4, %v1958_v36, %v5825_v41  ;;  %v2657_v49 = vmin.f32 %v2625_v21, 6.0  ;;  %v2027_v18 = vadd.f32 %v1959_v39, %v1786_v17  ;;  %v5829_v9 = vrot.slane %v5828_v6, 1  ;;  %v5841_v17 = vld [vmem:[#allocation25_spill] sm:$0xff] }
 0x1d6   : > { %v2267_v38 = vsel %vm1097_vm3, %v5827_v53, %v5826_v59  ;;  %v2028_v7 = vadd.f32 %v1961_v47, %v1787_v27  ;;  %v2505_v52 = vrot.slane %v2381_v13, 2  ;;  %v5831_v57 = vrot.slane %v5830_v5, 1 }
 0x1d7   : > { %v5833_v20 = vrot.slane %v5832_v60, 2  ;;  %v5835_v16 = vrot.slane %v5834_v45, 2  ;;  %v1497_v44 = vmul.f32 %v3365_v63, %v4480_v2  ;;  %v2683_v1 = vpack.c.bf16 %v2657_v49, %v2656_v55 }
 0x1d8   : > { %v1130_v10 = vsel %vm1097_vm3, %v5831_v57, %v5829_v9  ;;  %v2092_v22 = vadd.f32 %v5836_v4, %v2027_v18  ;;  %v2093_v54 = vadd.f32 %v2061_v32, %v2028_v7  ;;  %v5839_v48 = vrot.slane %v5838_v46, 2 }
 0x1d9   : > { %v1372_v11 = vsel %vm1339_vm4, %v5835_v16, %v5833_v20  ;;  %v1222_v61 = vadd.f32 %v1130_v10, %v5837_v24  ;;  %v5840_v56 = vrot.slane %v4771_v29, 2  ;;  %v1498_v42 = vmul.f32 %v3365_v63, %v4639_v58  ;;  %3032 = vmatmul.msk.bf16.gmra.mxu1 %vm2699_vm6, %v2683_v1 }
 0x1da   : > { %v2506_v36 = vsel %vm1339_vm4, %v5839_v48, %v2505_v52  ;;  %v1568_v26 = vmul.f32 %v3314_v28, %v4480_v2  ;;  %v2333_v23 = vadd.f32 %v2265_v43, %v2092_v22  ;;  %v2334_v32 = vadd.f32 %v2267_v38, %v2093_v54 }
 0x1db   : > { %v2508_v51 = vsel %vm1339_vm4, %v2505_v52, %v5840_v56  ;;  %v1464_v37 = vadd.f32 %v1372_v11, %v1222_v61  ;;  %v1569_v21 = vmul.f32 %v3314_v28, %v4639_v58  ;;  %v1530_v27 = vadd.f32 %v1498_v42, %v5841_v17 }
 0x1dc   : > { %v1676_v39 = vrot.slane %v1568_v26, 1  ;;  %v1809_v29 = vmul.f32 %v3316_v30, %v4480_v2  ;;  %v1810_v41 = vmul.f32 %v3316_v30, %v4639_v58  ;;  %v2574_v47 = vadd.f32 %v2506_v36, %v2333_v23  ;;  %v5846_v23 = vld [vmem:[#allocation40_spill] sm:$0xff] }
 0x1dd   : > { %v2575_v59 = vadd.f32 %v2508_v51, %v2334_v32  ;;  %v1529_v53 = vadd.f32 %v1497_v44, %v1464_v37  ;;  %v1677_v13 = vrot.slane %v1569_v21, 1  ;;  %v2044_v38 = vmul.f32 %v3571_v62, %v4776_v8 }
 0x1de   : > { %v1917_v55 = vrot.slane %v1809_v29, 2  ;;  %v1918_v43 = vrot.slane %v1810_v41, 2  ;;  %v2045_v49 = vmul.f32 %v3571_v62, %v4865_v50  ;;  %v2610_v18 = vadd.f32 %v4599_v25, %v2574_v47  ;;  %v5849_v41 = vld [vmem:[#allocation34_spill] sm:$0xff] }
 0x1df   : > { %v2611_v7 = vadd.f32 %v4599_v25, %v2575_v59  ;;  %v1678_v2 = vsel %vm1097_vm3, %v1676_v39, %v1677_v13  ;;  %v5842_v58 = vrot.slane %v4660_v15, 1  ;;  %v5843_v57 = vrot.slane %v4663_v31, 2  ;;  %v5851_v59 = vld [vmem:[#allocation50_spill] sm:$0xff] }
 0x1e0   : > { %v1770_v6 = vadd.f32 %v1678_v2, %v1529_v53  ;;  %v1919_v5 = vsel %vm1339_vm4, %v1917_v55, %v1918_v43  ;;  %v2642_v60 = vmax.f32 %v2610_v18, 0.0  ;;  %v2115_v45 = vmul.f32 %v3321_v33, %v4776_v8 }
 0x1e1   : > { %v1680_v52 = vsel %vm1097_vm3, %v1677_v13, %v5842_v58  ;;  %v1921_v10 = vsel %vm1339_vm4, %v1918_v43, %v5843_v57  ;;  %v2643_v20 = vmax.f32 %v2611_v7, 0.0  ;;  %v2116_v16 = vmul.f32 %v3321_v33, %v4865_v50  ;;  %v5853_v13 = vld [vmem:[#allocation3_spill] sm:$0xff]  ;;  %v5854_v43 = vld [vmem:[#allocation2_spill] sm:$0xff]  ;;  %v5855_v58 = vld [vmem:[#allocation4_spill] sm:$0xff] }
 0x1e2   : > { %v1771_v9 = vadd.f32 %v1680_v52, %v1530_v27  ;;  %v2011_v11 = vadd.f32 %v1919_v5, %v1770_v6  ;;  %v2356_v44 = vmul.f32 %v3324_v34, %v4776_v8  ;;  %v2357_v1 = vmul.f32 %v3324_v34, %v4865_v50 }
 0x1e3   : > { %v2674_v4 = vmin.f32 %v2642_v60, 6.0  ;;  %v2675_v31 = vmin.f32 %v2643_v20, 6.0  ;;  %v2223_v22 = vrot.slane %v2115_v45, 1  ;;  %v2224_v54 = vrot.slane %v2116_v16, 1 }
 0x1e4   : > { %v2012_v15 = vadd.f32 %v1921_v10, %v1771_v9  ;;  %v2076_v24 = vadd.f32 %v2044_v38, %v2011_v11  ;;  %v2464_v46 = vrot.slane %v2356_v44, 2  ;;  %v2465_v48 = vrot.slane %v2357_v1, 2 }
 0x1e5   : > { %v2692_v36 = vpack.c.bf16 %v2675_v31, %v2674_v4  ;;  %v2225_v56 = vsel %vm1097_vm3, %v2223_v22, %v2224_v54  ;;  %v5844_v51 = vrot.slane %v4893_v0, 1  ;;  %v5845_v26 = vrot.slane %v4752_v14, 1 }
 0x1e6   : > { %v2077_v61 = vadd.f32 %v2045_v49, %v2012_v15  ;;  %v5847_v32 = vrot.slane %v5846_v23, 1  ;;  %v2317_v21 = vadd.f32 %v2225_v56, %v2076_v24  ;;  %v2466_v27 = vsel %vm1339_vm4, %v2464_v46, %v2465_v48  ;;  %v5856_v46 = vld [vmem:[#allocation43_spill] sm:$0xff] }
 0x1e7   : > { %v2227_v42 = vsel %vm1097_vm3, %v2224_v54, %v5844_v51  ;;  %v5848_v39 = vrot.slane %v4896_v35, 2  ;;  %3041 = vmatmul.msk.bf16.gmra.mxu3 %vm2699_vm6, %v2692_v36  ;;  %v5850_v47 = vrot.slane %v4757_v19, 2  ;;  %v5852_v14 = vrot.slane %v5851_v59, 2  ;;  %v5858_v36 = vld [vmem:[#allocation26_spill] sm:$0xff] }
 0x1e8   : > { %v1723_v37 = vsel %vm1097_vm3, %v5847_v32, %v5845_v26  ;;  %v2318_v17 = vadd.f32 %v2227_v42, %v2077_v61  ;;  %v2062_v55 = vmul.f32 %v3571_v62, %v5853_v13  ;;  %v2063_v38 = vmul.f32 %v3571_v62, %v5854_v43  ;;  %v2761_v42 = vpop.f32.mrf.mxu1  ;;  %v5860_v32 = vld [vmem:[#allocation30_spill] sm:$0xff] }
 0x1e9   : > { %v2468_v29 = vsel %vm1339_vm4, %v2465_v48, %v5848_v39  ;;  %v1788_v0 = vadd.f32 %v1723_v37, %v5849_v41  ;;  %v1964_v53 = vsel %vm1339_vm4, %v5852_v14, %v5850_v47  ;;  %v2558_v49 = vadd.f32 %v2466_v27, %v2317_v21  ;;  %v5861_v21 = vld [vmem:[#allocation36_spill] sm:$0xff] }
 0x1ea   : > { %v2559_v35 = vadd.f32 %v2468_v29, %v2318_v17  ;;  %v2142_v18 = vmul.f32 %v3321_v33, %v5853_v13  ;;  %v2143_v7 = vmul.f32 %v3321_v33, %v5854_v43  ;;  %v2095_v19 = vadd.f32 %v2063_v38, %v4803_v40  ;;  %v5863_v27 = vld [vmem:[#allocation24_spill] sm:$0xff] }
 0x1eb   : > { %v2029_v2 = vadd.f32 %v1964_v53, %v1788_v0  ;;  %v2144_v52 = vmul.f32 %v3321_v33, %v5855_v58  ;;  %v2383_v6 = vmul.f32 %v3324_v34, %v5853_v13  ;;  %v2594_v9 = vadd.f32 %v4599_v25, %v2558_v49 }
 0x1ec   : > { %v2595_v5 = vadd.f32 %v4599_v25, %v2559_v35  ;;  %v2268_v57 = vrot.slane %v2142_v18, 1  ;;  %v2269_v10 = vrot.slane %v2143_v7, 1  ;;  %v2384_v45 = vmul.f32 %v3324_v34, %v5854_v43  ;;  %v5865_v7 = vld [vmem:[#allocation35_spill] sm:$0xff] }
 0x1ed   : > { %v2094_v60 = vadd.f32 %v2062_v55, %v2029_v2  ;;  %v2271_v20 = vrot.slane %v2144_v52, 1  ;;  %v2385_v40 = vmul.f32 %v3324_v34, %v5855_v58  ;;  %v2626_v16 = vmax.f32 %v2594_v9, 0.0 }
 0x1ee   : > { %v2627_v11 = vmax.f32 %v2595_v5, 0.0  ;;  %v2270_v15 = vsel %vm1097_vm3, %v2268_v57, %v2269_v10  ;;  %v2509_v44 = vrot.slane %v2383_v6, 2  ;;  %v2510_v31 = vrot.slane %v2384_v45, 2 }
 0x1ef   : > { %v2272_v1 = vsel %vm1097_vm3, %v2269_v10, %v2271_v20  ;;  %v2335_v4 = vadd.f32 %v2270_v15, %v2094_v60  ;;  %v2512_v22 = vrot.slane %v2385_v40, 2  ;;  %v2658_v54 = vmin.f32 %v2626_v16, 6.0  ;;  %v5867_v10 = vld [vmem:[#allocation5_spill] sm:$0xff]  ;;  %v5868_v60 = vld [vmem:[#allocation6_spill] sm:$0xff]  ;;  %v3007_v15 = vld [vmem:[%s3207_s10 + $0xf0] sm:$0xff] }
 0x1f0   : > { %v2659_v24 = vmin.f32 %v2627_v11, 6.0  ;;  %v2336_v61 = vadd.f32 %v2272_v1, %v2095_v19  ;;  %v5857_v48 = vrot.slane %v5856_v46, 1  ;;  %v5859_v56 = vrot.slane %v5858_v36, 1  ;;  %v5177_v1 = vld [vmem:[%s5420_s6] ss:$0 sm:$0xff]  ;;  %v5189_v36 = vpop.f32.mrf.mxu1 }
 0x1f1   : > { %v2511_v26 = vsel %vm1339_vm4, %v2509_v44, %v2510_v31  ;;  %v2513_v23 = vsel %vm1339_vm4, %v2510_v31, %v2512_v22  ;;  %v5862_v17 = vrot.slane %v5861_v21, 2  ;;  %v5864_v39 = vrot.slane %v5863_v27, 2  ;;  %v3008_v44 = vld [vmem:[%s3207_s10 + $0xf8] sm:$0xff] }
 0x1f2   : > { %v1135_v51 = vsel %vm1097_vm3, %v5859_v56, %v5857_v48  ;;  %v2684_v41 = vpack.c.bf16 %v2659_v24, %v2658_v54  ;;  %v2576_v0 = vadd.f32 %v2511_v26, %v2335_v4  ;;  %v2577_v47 = vadd.f32 %v2513_v23, %v2336_v61  ;;  %v5191_v56 = vpop.f32.mrf.mxu3 }
 0x1f3   : > { %v1224_v37 = vadd.f32 %v1135_v51, %v5860_v32  ;;  %v1377_v29 = vsel %vm1339_vm4, %v5864_v39, %v5862_v17  ;;  %v1499_v59 = vmul.f32 %v3365_v63, %v4776_v8  ;;  %v1500_v53 = vmul.f32 %v3365_v63, %v4865_v50  ;;  %v5870_v39 = vld [vmem:[#allocation9_spill] sm:$0xff] }
 0x1f4   : > { %v1571_v13 = vmul.f32 %v3314_v28, %v4776_v8  ;;  %v1572_v55 = vmul.f32 %v3314_v28, %v4865_v50  ;;  %3033 = vmatmul.msk.bf16.gmra.mxu1 %vm2699_vm6, %v2684_v41  ;;  %v2612_v43 = vadd.f32 %v4599_v25, %v2576_v0  ;;  %v2613_v38 = vadd.f32 %v4599_v25, %v2577_v47  ;;  %v5872_v47 = vld [vmem:[#allocation38_spill] sm:$0xff] }
 0x1f5   : > { %v1466_v14 = vadd.f32 %v1377_v29, %v1224_v37  ;;  %v1812_v49 = vmul.f32 %v3316_v30, %v4776_v8  ;;  %v1813_v35 = vmul.f32 %v3316_v30, %v4865_v50  ;;  %v1532_v2 = vadd.f32 %v1500_v53, %v5865_v7  ;;  %v5877_v7 = vld [vmem:[#allocation10_spill] sm:$0xff] }
 0x1f6   : > { %v1681_v19 = vrot.slane %v1571_v13, 1  ;;  %v1682_v58 = vrot.slane %v1572_v55, 1  ;;  %v2644_v52 = vmax.f32 %v2612_v43, 0.0  ;;  %v2645_v6 = vmax.f32 %v2613_v38, 0.0  ;;  %v3080_v43 = vld [vmem:[%s3207_s10] sm:$0xff] }
 0x1f7   : > { %v1531_v18 = vadd.f32 %v1499_v59, %v1466_v14  ;;  %v1922_v9 = vrot.slane %v1812_v49, 2  ;;  %v1923_v5 = vrot.slane %v1813_v35, 2  ;;  %v5866_v25 = vrot.slane %v4883_v12, 1  ;;  %v5874_v14 = vld [vmem:[#allocation61_spill] sm:$0xff]  ;;  %v5876_v49 = vld [vmem:[#allocation46_spill] sm:$0xff] }
 0x1f8   : > { %v1683_v57 = vsel %vm1097_vm3, %v1681_v19, %v1682_v58  ;;  %v2046_v50 = vmul.f32 %v3571_v62, %v5867_v10  ;;  %v2047_v20 = vmul.f32 %v3571_v62, %v5868_v60  ;;  %v2676_v45 = vmin.f32 %v2644_v52, 6.0 }
 0x1f9   : > { %v1685_v8 = vsel %vm1097_vm3, %v1682_v58, %v5866_v25  ;;  %v2677_v40 = vmin.f32 %v2645_v6, 6.0  ;;  %v1772_v16 = vadd.f32 %v1683_v57, %v1531_v18  ;;  %v1924_v12 = vsel %vm1339_vm4, %v1922_v9, %v1923_v5  ;;  %v5879_v58 = vld [vmem:[#allocation49_spill] sm:$0xff]  ;;  %v5881_v6 = vld [vmem:[#allocation48_spill] sm:$0xff] }
 0x1fa   : > { %v1773_v11 = vadd.f32 %v1685_v8, %v1532_v2  ;;  %v5869_v4 = vrot.slane %v4887_v3, 2  ;;  %v2118_v22 = vmul.f32 %v3321_v33, %v5867_v10  ;;  %v2119_v54 = vmul.f32 %v3321_v33, %v5868_v60 }
 0x1fb   : > { %v2693_v24 = vpack.c.bf16 %v2677_v40, %v2676_v45  ;;  %v2013_v61 = vadd.f32 %v1924_v12, %v1772_v16  ;;  %v2359_v48 = vmul.f32 %v3324_v34, %v5867_v10  ;;  %v2360_v26 = vmul.f32 %v3324_v34, %v5868_v60 }
 0x1fc   : > { %v1926_v31 = vsel %vm1339_vm4, %v1923_v5, %v5869_v4  ;;  %v2228_v3 = vrot.slane %v2118_v22, 1  ;;  %v2229_v51 = vrot.slane %v2119_v54, 1  ;;  %v371_v23 = vpack.c.bf16 %v3008_v44, %v3007_v15  ;;  %v5242_v15 = vld [vmem:[%s5418_s4] ss:$0 sm:$0xff]  ;;  %v5883_v4 = vld [vmem:[#allocation39_spill] sm:$0xff]  ;;  %v2766_v22 = vpop.f32.mrf.mxu1 }
 0x1fd   : > { %v2014_v46 = vadd.f32 %v1926_v31, %v1773_v11  ;;  %3042 = vmatmul.msk.bf16.gmra.mxu3 %vm2699_vm6, %v2693_v24  ;;  %v2078_v32 = vadd.f32 %v2046_v50, %v2013_v61  ;;  %v2469_v21 = vrot.slane %v2359_v48, 2  ;;  %v2762_v17 = vadd.f32 %v5177_v1, %v2761_v42 }
 0x1fe   : > { %v2230_v27 = vsel %vm1097_vm3, %v2228_v3, %v2229_v51  ;;  %v5871_v29 = vrot.slane %v5870_v39, 1  ;;  %v2470_v0 = vrot.slane %v2360_v26, 2  ;;  %3026 = vmatmul.msk.bf16.gmra.mxu2 %vm377_vm1, %v371_v23  ;;  %v5873_v59 = vrot.slane %v5872_v47, 1  ;;  %v5885_v3 = vld [vmem:[#allocation15_spill] sm:$0xff] }
 0x1ff   : > { %v2079_v37 = vadd.f32 %v2047_v20, %v2014_v46  ;;  %v5875_v53 = vrot.slane %v5874_v14, 1  ;;  %v2319_v13 = vadd.f32 %v2230_v27, %v2078_v32  ;;  %v2841_v38 = vadd.f32 %v3080_v43, %v2762_v17  ;;  %v5886_v23 = vld [vmem:[#allocation7_spill] sm:$0xff]  ;;  %v5888_v17 = vld [vmem:[#allocation8_spill] sm:$0xff] }
 0x200   : > { %v2232_v41 = vsel %vm1097_vm3, %v2229_v51, %v5871_v29  ;;  %v2471_v18 = vsel %vm1339_vm4, %v2469_v21, %v2470_v0  ;;  %v5878_v2 = vrot.slane %v5877_v7, 2  ;;  %v5880_v52 = vrot.slane %v5879_v58, 2 }
 0x201   : > { %v1140_v42 = vsel %vm1097_vm3, %v5875_v53, %v5873_v59  ;;  %v2320_v55 = vadd.f32 %v2232_v41, %v2079_v37  ;;  %v5882_v9 = vrot.slane %v5881_v6, 2  ;;  %v1501_v57 = vmul.f32 %v3365_v63, %v5867_v10  ;;  %2873 = vst.msk [vmem:[%s5207_s16] sm:$0xff] %vm377_vm1, %v2841_v38  ;;  %v5890_v6 = vld [vmem:[#allocation18_spill] sm:$0xff] }
 0x202   : > { %v1226_v35 = vadd.f32 %v1140_v42, %v5876_v49  ;;  %v2473_v19 = vsel %vm1339_vm4, %v2470_v0, %v5878_v2  ;;  %v2560_v25 = vadd.f32 %v2471_v18, %v2319_v13  ;;  %v1502_v20 = vmul.f32 %v3365_v63, %v5868_v60  ;;  %v3082_v2 = vld [vmem:[%s3207_s10 + $0x8] sm:$0xff] }
 0x203   : > { %v1382_v5 = vsel %vm1339_vm4, %v5882_v9, %v5880_v52  ;;  %v2561_v8 = vadd.f32 %v2473_v19, %v2320_v55  ;;  %v1574_v45 = vmul.f32 %v3314_v28, %v5867_v10  ;;  %v1575_v40 = vmul.f32 %v3314_v28, %v5868_v60  ;;  %v2808_v28 = vpop.f32.mrf.mxu3 }
 0x204   : > { %v1468_v50 = vadd.f32 %v1382_v5, %v1226_v35  ;;  %v1815_v16 = vmul.f32 %v3316_v30, %v5867_v10  ;;  %v1816_v11 = vmul.f32 %v3316_v30, %v5868_v60  ;;  %v2596_v44 = vadd.f32 %v5242_v15, %v2560_v25  ;;  %v5884_v60 = vld [vmem:[#allocation11_spill] sm:$0xff]  ;;  %v2768_v58 = vpop.f32.mrf.mxu1 }
 0x205   : > { %v2597_v63 = vadd.f32 %v5242_v15, %v2561_v8  ;;  %v1534_v31 = vadd.f32 %v1502_v20, %v5883_v4  ;;  %v1686_v54 = vrot.slane %v1574_v45, 1  ;;  %v1687_v24 = vrot.slane %v1575_v40, 1  ;;  %v5892_v45 = vld [vmem:[#allocation19_spill] sm:$0xff] }
 0x206   : > { %v1533_v12 = vadd.f32 %v1501_v57, %v1468_v50  ;;  %v1927_v10 = vrot.slane %v1815_v16, 2  ;;  %v1928_v61 = vrot.slane %v1816_v11, 2  ;;  %v2628_v46 = vmax.f32 %v2596_v44, 0.0  ;;  %v3083_v50 = vld [vmem:[%s3207_s10 + $0x90] sm:$0xff] }
 0x207   : > { %v2629_v30 = vmax.f32 %v2597_v63, 0.0  ;;  %v2048_v48 = vmul.f32 %v3571_v62, %v5884_v60  ;;  %v2049_v51 = vmul.f32 %v3571_v62, %v5885_v3  ;;  %v1688_v26 = vsel %vm1097_vm3, %v1686_v54, %v1687_v24 }
 0x208   : > { %v5887_v32 = vrot.slane %v5886_v23, 1  ;;  %v1929_v21 = vsel %vm1339_vm4, %v1927_v10, %v1928_v61  ;;  %v5889_v27 = vrot.slane %v5888_v17, 2  ;;  %v2660_v29 = vmin.f32 %v2628_v46, 6.0  ;;  %v3086_v10 = vld [vmem:[%s3207_s10 + $0x18] sm:$0xff]  ;;  %v3087_v46 = vld [vmem:[%s3207_s10 + $0xa0] sm:$0xff] }
 0x209   : > { %v2661_v41 = vmin.f32 %v2629_v30, 6.0  ;;  %v1774_v0 = vadd.f32 %v1688_v26, %v1533_v12  ;;  %v2121_v62 = vmul.f32 %v3321_v33, %v5884_v60  ;;  %v2122_v59 = vmul.f32 %v3321_v33, %v5885_v3 }
 0x20a   : > { %v1690_v37 = vsel %vm1097_vm3, %v1687_v24, %v5887_v32  ;;  %v1931_v39 = vsel %vm1339_vm4, %v1928_v61, %v5889_v27  ;;  %v2362_v14 = vmul.f32 %v3324_v34, %v5884_v60  ;;  %v2363_v53 = vmul.f32 %v3324_v34, %v5885_v3  ;;  %v3089_v27 = vld [vmem:[%s3207_s10 + $0xa8] sm:$0xff] }
 0x20b   : > { %v1775_v47 = vadd.f32 %v1690_v37, %v1534_v31  ;;  %v2685_v42 = vpack.c.bf16 %v2661_v41, %v2660_v29  ;;  %v2015_v13 = vadd.f32 %v1929_v21, %v1774_v0  ;;  %v2764_v43 = vadd.f32 %v5177_v1, %v5189_v36  ;;  %v2811_v52 = vpop.f32.mrf.mxu3  ;;  %v3084_v31 = vld [vmem:[%s3207_s10 + $0x10] sm:$0xff]  ;;  %v3088_v21 = vld [vmem:[%s3207_s10 + $0x20] sm:$0xff] }
 0x20c   : > { %v2233_v38 = vrot.slane %v2121_v62, 1  ;;  %v2234_v49 = vrot.slane %v2122_v59, 1  ;;  %v2474_v35 = vrot.slane %v2362_v14, 2  ;;  %v2475_v18 = vrot.slane %v2363_v53, 2  ;;  %v3090_v59 = vld [vmem:[%s3207_s10 + $0x28] sm:$0xff]  ;;  %v3091_v53 = vld [vmem:[%s3207_s10 + $0xb0] sm:$0xff] }
 0x20d   : > { %v2016_v55 = vadd.f32 %v1931_v39, %v1775_v47  ;;  %3034 = vmatmul.msk.bf16.gmra.mxu1 %vm2699_vm6, %v2685_v42  ;;  %v2080_v33 = vadd.f32 %v2048_v48, %v2015_v13  ;;  %v2842_v19 = vadd.f32 %v3082_v2, %v2764_v43  ;;  %v2807_v34 = vadd.f32 %v5177_v1, %v5191_v56 }
 0x20e   : > { %v2235_v36 = vsel %vm1097_vm3, %v2233_v38, %v2234_v49  ;;  %v5891_v9 = vrot.slane %v5890_v6, 1  ;;  %v2476_v57 = vsel %vm1339_vm4, %v2474_v35, %v2475_v18  ;;  %v2767_v20 = vadd.f32 %v5177_v1, %v2766_v22  ;;  %v3085_v22 = vld [vmem:[%s3207_s10 + $0x98] sm:$0xff] }
 0x20f   : > { %v2081_v7 = vadd.f32 %v2049_v51, %v2016_v55  ;;  %v2321_v25 = vadd.f32 %v2235_v36, %v2080_v33  ;;  %2874 = vst.msk [vmem:[%s5207_s16 + $0x8] sm:$0xff] %vm377_vm1, %v2842_v19  ;;  %v2859_v56 = vadd.f32 %v3083_v50, %v2807_v34  ;;  %v5893_v40 = vrot.slane %v5892_v45, 2  ;;  %v2771_v51 = vpop.f32.mrf.mxu1  ;;  %v3095_v36 = vld [vmem:[%s3207_s10 + $0xc0] sm:$0xff] }
 0x210   : > { %v2237_v5 = vsel %vm1097_vm3, %v2234_v49, %v5891_v9  ;;  %v2809_v11 = vadd.f32 %v5177_v1, %v2808_v28  ;;  %v2769_v44 = vadd.f32 %v5177_v1, %v2768_v58  ;;  %v2812_v63 = vadd.f32 %v5177_v1, %v2811_v52  ;;  %v3092_v49 = vld [vmem:[%s3207_s10 + $0x30] sm:$0xff]  ;;  %v3094_v58 = vld [vmem:[%s3207_s10 + $0x38] sm:$0xff] }
 0x211   : > { %v2322_v8 = vadd.f32 %v2237_v5, %v2081_v7  ;;  %v2478_v16 = vsel %vm1339_vm4, %v2475_v18, %v5893_v40  ;;  %v2562_v12 = vadd.f32 %v2476_v57, %v2321_v25  ;;  %2891 = vst.msk [vmem:[%s5207_s16 + $0x90] sm:$0xff] %vm377_vm1, %v2859_v56  ;;  %v2843_v54 = vadd.f32 %v3084_v31, %v2767_v20  ;;  %v3093_v18 = vld [vmem:[%s3207_s10 + $0xb8] sm:$0xff]  ;;  %v3096_v57 = vld [vmem:[%s3207_s10 + $0xc8] sm:$0xff]  ;;  %v3097_v56 = vld [vmem:[%s3207_s10 + $0x40] sm:$0xff] }
 0x212   : > { %v2860_v24 = vadd.f32 %v3085_v22, %v2809_v11  ;;  %v2844_v61 = vadd.f32 %v3086_v10, %v2769_v44  ;;  %v2861_v28 = vadd.f32 %v3087_v46, %v2812_v63  ;;  %v2772_v23 = vadd.f32 %v5177_v1, %v2771_v51  ;;  %v3101_v46 = vld [vmem:[%s3207_s10 + $0xd8] sm:$0xff] }
 0x213   : > { %v2563_v4 = vadd.f32 %v2478_v16, %v2322_v8  ;;  %v2598_v30 = vadd.f32 %v5242_v15, %v2562_v12  ;;  %2875 = vst.msk [vmem:[%s5207_s16 + $0x10] sm:$0xff] %vm377_vm1, %v2843_v54  ;;  %v2813_v26 = vpop.f32.mrf.mxu3  ;;  %v3098_v16 = vld [vmem:[%s3207_s10 + $0x48] sm:$0xff]  ;;  %v3099_v12 = vld [vmem:[%s3207_s10 + $0xd0] sm:$0xff] }
 0x214   : > { %2892 = vst.msk [vmem:[%s5207_s16 + $0x98] sm:$0xff] %vm377_vm1, %v2860_v24  ;;  %v2814_v32 = vadd.f32 %v5177_v1, %v2813_v26  ;;  %v2845_v17 = vadd.f32 %v3088_v21, %v2772_v23  ;;  %v3100_v24 = vld [vmem:[%s3207_s10 + $0x50] sm:$0xff]  ;;  %v3103_v23 = vld [vmem:[%s3207_s10 + $0xe0] sm:$0xff] }
 0x215   : > { %v2599_v60 = vadd.f32 %v5242_v15, %v2563_v4  ;;  %v2630_v48 = vmax.f32 %v2598_v30, 0.0  ;;  %2876 = vst.msk [vmem:[%s5207_s16 + $0x18] sm:$0xff] %vm377_vm1, %v2844_v61  ;;  %v3104_v21 = vld [vmem:[%s3207_s10 + $0x60] sm:$0xff] }
 0x216   : > { %2893 = vst.msk [vmem:[%s5207_s16 + $0xa0] sm:$0xff] %vm377_vm1, %v2861_v28  ;;  %v2862_v39 = vadd.f32 %v3089_v27, %v2814_v32 }
 0x217   : > { %v2631_v3 = vmax.f32 %v2599_v60, 0.0  ;;  %v2662_v15 = vmin.f32 %v2630_v48, 6.0  ;;  %2877 = vst.msk [vmem:[%s5207_s16 + $0x20] sm:$0xff] %vm377_vm1, %v2845_v17  ;;  %v2773_v41 = vpop.f32.mrf.mxu1  ;;  %v3102_v48 = vld [vmem:[%s3207_s10 + $0x58] sm:$0xff] }
 0x218   : > { %2894 = vst.msk [vmem:[%s5207_s16 + $0xa8] sm:$0xff] %vm377_vm1, %v2862_v39  ;;  %v2774_v47 = vadd.f32 %v5177_v1, %v2773_v41 }
 0x219   : > { %v2663_v37 = vmin.f32 %v2631_v3, 6.0 }
 0x21a   : > { %v2846_v14 = vadd.f32 %v3090_v59, %v2774_v47 }
 0x21b   : > { %v2686_v29 = vpack.c.bf16 %v2663_v37, %v2662_v15  ;;  %v2816_v0 = vpop.f32.mrf.mxu3 }
 0x21c   : > { %v2817_v62 = vadd.f32 %v5177_v1, %v2816_v0  ;;  %2878 = vst.msk [vmem:[%s5207_s16 + $0x28] sm:$0xff] %vm377_vm1, %v2846_v14 }
 0x21d   : > { %3035 = vmatmul.msk.bf16.gmra.mxu1 %vm2699_vm6, %v2686_v29  ;;  %v3105_v29 = vld [vmem:[%s3207_s10 + $0xe8] sm:$0xff] }
 0x21e   : > { %v2863_v42 = vadd.f32 %v3091_v53, %v2817_v62  ;;  %v3106_v62 = vld [vmem:[%s3207_s10 + $0x68] sm:$0xff] }
 0x21f   : > { %v2776_v13 = vpop.f32.mrf.mxu1 }
 0x220   : > { %2895 = vst.msk [vmem:[%s5207_s16 + $0xb0] sm:$0xff] %vm377_vm1, %v2863_v42  ;;  %v2777_v43 = vadd.f32 %v5177_v1, %v2776_v13  ;;  %v3107_v13 = vld [vmem:[%s3207_s10 + $0xf0] sm:$0xff] }
 0x222   : > { %v2847_v35 = vadd.f32 %v3092_v49, %v2777_v43 }
 0x223   : > { %v2818_v55 = vpop.f32.mrf.mxu3 }
 0x224   : > { %v2819_v38 = vadd.f32 %v5177_v1, %v2818_v55  ;;  %2879 = vst.msk [vmem:[%s5207_s16 + $0x30] sm:$0xff] %vm377_vm1, %v2847_v35 }
 0x226   : > { %v2864_v33 = vadd.f32 %v3093_v18, %v2819_v38 }
 0x227   : > { %v2778_v7 = vpop.f32.mrf.mxu1 }
 0x228   : > { %2896 = vst.msk [vmem:[%s5207_s16 + $0xb8] sm:$0xff] %vm377_vm1, %v2864_v33  ;;  %v2779_v19 = vadd.f32 %v5177_v1, %v2778_v7  ;;  %v3108_v33 = vld [vmem:[%s3207_s10 + $0x70] sm:$0xff] }
 0x22a   : > { %v2848_v52 = vadd.f32 %v3094_v58, %v2779_v19 }
 0x22b   : > { %v2821_v2 = vpop.f32.mrf.mxu3 }
 0x22c   : > { %v2822_v34 = vadd.f32 %v5177_v1, %v2821_v2  ;;  %2880 = vst.msk [vmem:[%s5207_s16 + $0x38] sm:$0xff] %vm377_vm1, %v2848_v52  ;;  %v3109_v2 = vld [vmem:[%s3207_s10 + $0xf8] sm:$0xff] }
 0x22d   : > { %v3110_v52 = vld [vmem:[%s3207_s10 + $0x78] sm:$0xff] }
 0x22e   : > { %v2865_v6 = vadd.f32 %v3095_v36, %v2822_v34 }
 0x230   : > { %2897 = vst.msk [vmem:[%s5207_s16 + $0xc0] sm:$0xff] %vm377_vm1, %v2865_v6 }
 0x232   : > { %v2781_v8 = vpop.f32.mrf.mxu1 }
 0x233   : > { %v2823_v9 = vpop.f32.mrf.mxu3  ;;  %v2782_v50 = vadd.f32 %v5177_v1, %v2781_v8 }
 0x234   : > { %v2824_v5 = vadd.f32 %v5177_v1, %v2823_v9 }
 0x235   : > { %v2849_v20 = vadd.f32 %v3097_v56, %v2782_v50  ;;  %v3112_v50 = vld [vmem:[%s3207_s10 + $0x88] sm:$0xff] }
 0x236   : > { %v2866_v25 = vadd.f32 %v3096_v57, %v2824_v5  ;;  %v3111_v5 = vld [vmem:[%s3207_s10 + $0x80] sm:$0xff] }
 0x237   : > { %2881 = vst.msk [vmem:[%s5207_s16 + $0x40] sm:$0xff] %vm377_vm1, %v2849_v20 }
 0x238   : > { %2898 = vst.msk [vmem:[%s5207_s16 + $0xc8] sm:$0xff] %vm377_vm1, %v2866_v25 }
 0x23a   : > { %v2783_v45 = vpop.f32.mrf.mxu1 }
 0x23b   : > { %v2784_v40 = vadd.f32 %v5177_v1, %v2783_v45 }
 0x23d   : > { %v2850_v11 = vadd.f32 %v3098_v16, %v2784_v40 }
 0x23f   : > { %2882 = vst.msk [vmem:[%s5207_s16 + $0x48] sm:$0xff] %vm377_vm1, %v2850_v11 }
 0x24d   : > { %v2826_v44 = vpop.f32.mrf.mxu3 }
 0x24e   : > { %v2827_v63 = vadd.f32 %v5177_v1, %v2826_v44 }
 0x250   : > { %v2867_v4 = vadd.f32 %v3099_v12, %v2827_v63 }
 0x252   : > { %2899 = vst.msk [vmem:[%s5207_s16 + $0xd0] sm:$0xff] %vm377_vm1, %v2867_v4 }
 0x255   : > { %v2828_v22 = vpop.f32.mrf.mxu3 }
 0x256   : > { %v2786_v31 = vpop.f32.mrf.mxu1  ;;  %v2829_v61 = vadd.f32 %v5177_v1, %v2828_v22 }
 0x257   : > { %v2787_v54 = vadd.f32 %v5177_v1, %v2786_v31 }
 0x258   : > { %v2868_v28 = vadd.f32 %v3101_v46, %v2829_v61 }
 0x259   : > { %v2851_v10 = vadd.f32 %v3100_v24, %v2787_v54 }
 0x25a   : > { %2900 = vst.msk [vmem:[%s5207_s16 + $0xd8] sm:$0xff] %vm377_vm1, %v2868_v28 }
 0x25b   : > { %2883 = vst.msk [vmem:[%s5207_s16 + $0x50] sm:$0xff] %vm377_vm1, %v2851_v10 }
 0x25e   : > { %v2788_v30 = vpop.f32.mrf.mxu1 }
 0x25f   : > { %v2789_v60 = vadd.f32 %v5177_v1, %v2788_v30 }
 0x261   : > { %v2852_v3 = vadd.f32 %v3102_v48, %v2789_v60 }
 0x263   : > { %2884 = vst.msk [vmem:[%s5207_s16 + $0x58] sm:$0xff] %vm377_vm1, %v2852_v3 }
 0x26a   : > { %v2831_v51 = vpop.f32.mrf.mxu3 }
 0x26b   : > { %v2832_v26 = vadd.f32 %v5177_v1, %v2831_v51 }
 0x26d   : > { %v2869_v32 = vadd.f32 %v3103_v23, %v2832_v26 }
 0x26f   : > { %2901 = vst.msk [vmem:[%s5207_s16 + $0xe0] sm:$0xff] %vm377_vm1, %v2869_v32 }
 0x271   : > { %v2791_v15 = vpop.f32.mrf.mxu1 }
 0x272   : > { %v2792_v37 = vadd.f32 %v5177_v1, %v2791_v15  ;;  %v2833_v27 = vpop.f32.mrf.mxu3 }
 0x273   : > { %v2834_v39 = vadd.f32 %v5177_v1, %v2833_v27 }
 0x274   : > { %v2853_v17 = vadd.f32 %v3104_v21, %v2792_v37 }
 0x275   : > { %v2870_v41 = vadd.f32 %v3105_v29, %v2834_v39 }
 0x276   : > { %2885 = vst.msk [vmem:[%s5207_s16 + $0x60] sm:$0xff] %vm377_vm1, %v2853_v17 }
 0x277   : > { %2902 = vst.msk [vmem:[%s5207_s16 + $0xe8] sm:$0xff] %vm377_vm1, %v2870_v41 }
 0x279   : > { %v2793_v0 = vpop.f32.mrf.mxu1 }
 0x27a   : > { %v2794_v47 = vadd.f32 %v5177_v1, %v2793_v0 }
 0x27c   : > { %v2854_v59 = vadd.f32 %v3106_v62, %v2794_v47 }
 0x27e   : > { %2886 = vst.msk [vmem:[%s5207_s16 + $0x68] sm:$0xff] %vm377_vm1, %v2854_v59 }
 0x280   : > { %v2836_v14 = vpop.f32.mrf.mxu3 }
 0x281   : > { %v2837_v53 = vadd.f32 %v5177_v1, %v2836_v14  ;;  %v530_v42 = vpop.f32.mrf.mxu2 }
 0x283   : > { %v2871_v55 = vadd.f32 %v3107_v13, %v2837_v53 }
 0x285   : > { %2903 = vst.msk [vmem:[%s5207_s16 + $0xf0] sm:$0xff] %vm377_vm1, %v2871_v55 }
 0x288   : > { %v2838_v38 = vpop.f32.mrf.mxu3 }
 0x289   : > { %v2839_v35 = vadd.f32 %v5177_v1, %v2838_v38  ;;  %v532_v18 = vpop.f32.mrf.mxu2 }
 0x28a   : > { %v2796_v43 = vpop.f32.mrf.mxu1 }
 0x28b   : > { %v2797_v49 = vadd.f32 %v5177_v1, %v2796_v43  ;;  %v2872_v19 = vadd.f32 %v3109_v2, %v2839_v35 }
 0x28d   : > { %v2855_v7 = vadd.f32 %v3108_v33, %v2797_v49  ;;  %2904 = vst.msk [vmem:[%s5207_s16 + $0xf8] sm:$0xff] %vm377_vm1, %v2872_v19 }
 0x28f   : > { %2887 = vst.msk [vmem:[%s5207_s16 + $0x70] sm:$0xff] %vm377_vm1, %v2855_v7 }
 0x292   : > { %v2798_v34 = vpop.f32.mrf.mxu1 }
 0x293   : > { %v2799_v58 = vadd.f32 %v5177_v1, %v2798_v34 }
 0x295   : > { %v2856_v36 = vadd.f32 %v3110_v52, %v2799_v58 }
 0x297   : > { %2888 = vst.msk [vmem:[%s5207_s16 + $0x78] sm:$0xff] %vm377_vm1, %v2856_v36 }
 0x29a   : > { %v2801_v6 = vpop.f32.mrf.mxu1 }
 0x29b   : > { %v2802_v9 = vadd.f32 %v5177_v1, %v2801_v6 }
 0x29d   : > { %v2857_v57 = vadd.f32 %v3111_v5, %v2802_v9 }
 0x29f   : > { %2889 = vst.msk [vmem:[%s5207_s16 + $0x80] sm:$0xff] %vm377_vm1, %v2857_v57 }
 0x2a2   : > { %v2803_v25 = vpop.f32.mrf.mxu1 }
 0x2a3   : > { %v2804_v8 = vadd.f32 %v5177_v1, %v2803_v25 }
 0x2a5   : > { %v2858_v56 = vadd.f32 %v3112_v50, %v2804_v8 }
 0x2a7   : > { %2890 = vst.msk [vmem:[%s5207_s16 + $0x88] sm:$0xff] %vm377_vm1, %v2858_v56 }
 0x2a8 PF: > { %s17_s26 = sadd.s32 1, %s3135_s26   ;;  %s5894_s24 = smov %s3131_s25 }
 0x2a9   : > { %p14_p5 = scmp.ge.s32.totalorder %s17_s26, 4   ;;  %s5895_s25 = smov %s5897_s27 }
 0x2ab   :  { %16 = sbr.rel (!%p14_p5) target bundleno = 2 (0x2), region = 81 }

</bundles_post_ra>
